<compile_context>
chip_gen: v7x
topology: tpu7x:2x2x1
jax: 0.10.0
libtpu: 0.0.40
codegen_flags: <defaults>
</compile_context>

<pallas_src>
import functools

import jax
import jax.numpy as jnp
from jax.experimental import pallas as pl
from jax.experimental.pallas import tpu as pltpu

BN_EPS = 1e-5
LEAKY_SLOPE = 0.01
LANE = 128   # output-channel padding granularity (lane-dense stores / MXU cols)


def _round_up(x, m):
    return (x + m - 1) // m * m


def _vmem_capacity_bytes():
    try:
        cap = getattr(pltpu.get_tpu_info(), "vmem_capacity_bytes", None)
        if cap:
            return int(cap)
    except Exception:
        pass
    return 128 * 1024 * 1024


def _pick_row_tile(H, W, Hp, Wp, Cinp, Cop, csize, cap):
    """Largest divisor of H whose pass-1 VMEM footprint fits comfortably."""
    budget = int(0.55 * cap)
    fixed = 2 * (Hp * Wp * Cinp * csize + 16 * Cinp * Cop * csize)
    fallback = H
    for th in range(H, 0, -1):
        if H % th:
            continue
        if (th * W) % 8 and th != H:       # keep (8,128)-legal output blocks
            continue
        per_tile = (2 * 4 * th * W * Cop * csize             # 2x-buffered y block
                    + th * W * (8 * Cinp * csize + Cop * 4))  # in-kernel temps
        if fixed + per_tile <= budget:
            return th
        fallback = th
    return fallback


# --------------------------------------------------------------------------- #
# Pass 1: sub-pixel conv (upsample folded into weights) + BN partial stats.   #
# --------------------------------------------------------------------------- #
def _conv_stats_kernel(x_ref, w_ref, y_ref, stat_ref):
    """One (batch image, row tile) per grid step.

    x_ref   : (1, H+2, W+2, Cinp)   padded input, compute dtype (resident per n)
    w_ref   : (4, 4*Cinp, Cop)      folded weights; phase = a*2+b, K-rows
                                    ordered (dy, dx, cin)
    y_ref   : (1, 2, 2, TH*W, Cop)  conv output row tile, compute dtype
    stat_ref: (1, 1, 2, Cop)  f32   [sum, sum_of_squares] for this tile
    """
    W = x_ref.shape[2] - 2
    Cinp = x_ref.shape[3]
    Cop = y_ref.shape[4]
    THW = y_ref.shape[3]
    TH = THW // W

    row0 = pl.program_id(1) * TH        # first output row of this tile

    psum = jnp.zeros((1, Cop), jnp.float32)
    psumsq = jnp.zeros((1, Cop), jnp.float32)
    for a in range(2):                  # output row phase: out_row = 2*i + a
        for b in range(2):              # output col phase: out_col = 2*j + b
            # Per-phase LHS: the 4 shifted 2x2-window slices concatenated along
            # channels (built lazily; at most 4 windows live at once).
            parts = []
            for dy in range(2):
                for dx in range(2):
                    sl = x_ref[0,
                               pl.ds(row0 + a + dy, TH),
                               pl.ds(b + dx, W),
                               :]
                    parts.append(sl.reshape(THW, Cinp))
            lhs = jnp.concatenate(parts, axis=-1)                 # (THW, 4*Cinp)
            acc = jnp.dot(lhs, w_ref[a * 2 + b],
                          preferred_element_type=jnp.float32)     # (THW, Cop) f32
            y_ref[0, a, b] = acc.astype(y_ref.dtype)              # single store
            psum = psum + jnp.sum(acc, axis=0, keepdims=True)
            psumsq = psumsq + jnp.sum(acc * acc, axis=0, keepdims=True)

    stat_ref[0, 0, 0:1, :] = psum
    stat_ref[0, 0, 1:2, :] = psumsq


# --------------------------------------------------------------------------- #
# Wrapper                                                                     #
# --------------------------------------------------------------------------- #
@functools.partial(jax.jit, static_argnames=("compute_dtype", "row_tile"))
def vqvae_dec_block(x_nchw, w_oihw, bias, gamma, beta, *,
                    compute_dtype=jnp.bfloat16, row_tile=None):
    """x_nchw: (N, Cin, H, W) -> (N, Cout, 2H, 2W) float32."""
    del bias  # exactly cancelled by training-mode BatchNorm mean-centering.

    N, Cin, H, W = x_nchw.shape
    Cout = w_oihw.shape[0]
    csize = jnp.dtype(compute_dtype).itemsize
    sub = 8 * (4 // csize)              # dtype-aware sublane pack: f32->8, bf16->16
    Cinp = _round_up(Cin, sub)
    Cop = _round_up(Cout, LANE)         # lane-dense output channels
    Hp, Wp = H + 2, W + 2
    HW = H * W

    cap = _vmem_capacity_bytes()
    TH = row_tile if row_tile is not None else _pick_row_tile(
        H, W, Hp, Wp, Cinp, Cop, csize, cap)
    assert H % TH == 0 and ((TH * W) % 8 == 0 or TH == H), (TH, H, W)
    R = H // TH
    THW = TH * W

    # ---- XLA glue: layout + sub-pixel weight fold (tiny, done once) --------
    x = jnp.transpose(x_nchw, (0, 2, 3, 1)).astype(jnp.float32)          # NHWC
    x_pad = jnp.pad(x, ((0, 0), (1, 1), (1, 1), (0, Cinp - Cin)))
    x_pad = x_pad.astype(compute_dtype)                                  # (N,Hp,Wp,Cinp)

    # Fold nearest-x2 upsample into the 3x3 taps.  Rm[a, dy, kh] = which kernel
    # rows contribute to (output phase a, original-row tap dy); same for cols.
    Rm = jnp.array([[[1., 0., 0.], [0., 1., 1.]],
                    [[1., 1., 0.], [0., 0., 1.]]], dtype=jnp.float32)
    w_eff = jnp.einsum("aph,bqv,ochv->abpqco", Rm, Rm,
                       w_oihw.astype(jnp.float32))            # (2,2,dy,dx,Cin,Cout)
    w_eff = jnp.pad(w_eff, ((0, 0),) * 4 + ((0, Cinp - Cin), (0, Cop - Cout)))
    w_eff = w_eff.reshape(4, 4 * Cinp, Cop).astype(compute_dtype)

    # ---- Pass 1: conv + per-tile BN partial statistics ----------------------
    x_blk = Hp * Wp * Cinp * csize
    w_blk = 16 * Cinp * Cop * csize
    y_blk = 4 * THW * Cop * csize
    temps = THW * (8 * Cinp * csize + Cop * 4) + 2 * Cop * 4
    vmem1 = 2 * (x_blk + w_blk + y_blk) + temps + (4 << 20)
    vmem1 = int(min(max(vmem1, 16 << 20), int(0.75 * cap)))

    y_conv, stats = pl.pallas_call(
        _conv_stats_kernel,
        grid=(N, R),
        in_specs=[
            pl.BlockSpec((1, Hp, Wp, Cinp), lambda n, r: (n, 0, 0, 0)),
            pl.BlockSpec((4, 4 * Cinp, Cop), lambda n, r: (0, 0, 0)),
        ],
        out_specs=(
            pl.BlockSpec((1, 2, 2, THW, Cop), lambda n, r: (n, 0, 0, r, 0)),
            pl.BlockSpec((1, 1, 2, Cop), lambda n, r: (n, r, 0, 0)),
        ),
        out_shape=(
            jax.ShapeDtypeStruct((N, 2, 2, HW, Cop), compute_dtype),
            jax.ShapeDtypeStruct((N, R, 2, Cop), jnp.float32),
        ),
        compiler_params=pltpu.CompilerParams(
            dimension_semantics=("parallel", "parallel"),
            vmem_limit_bytes=vmem1),
    )(x_pad, w_eff)

    # ---- Tiny XLA reduction -> fused per-channel scale / shift --------------
    # Chan-style combine of per-tile (sum, sumsq): milder cancellation than a
    # single global E[x^2] - mean^2.
    cnt = 4 * THW                               # elements per tile per channel
    total = N * R * cnt                         # = N * (2H) * (2W)
    s = stats[:, :, 0, :]                       # (N, R, Cop)
    q = stats[:, :, 1, :]
    m_t = s / cnt
    mean = jnp.sum(s, axis=(0, 1)) / total      # (Cop,)
    m2_t = q - cnt * m_t * m_t                  # per-tile centered sum of squares
    var = (jnp.sum(m2_t, axis=(0, 1))
           + cnt * jnp.sum((m_t - mean) ** 2, axis=(0, 1))) / total
    var = jnp.maximum(var, 0.0)

    gamma_p = jnp.pad(gamma.astype(jnp.float32), (0, Cop - Cout))
    beta_p = jnp.pad(beta.astype(jnp.float32), (0, Cop - Cout))
    scale = gamma_p * jax.lax.rsqrt(var + BN_EPS)      # (Cop,)
    shift = beta_p - mean * scale

    # ---- Epilogue in XLA: BN FMA + LeakyReLU fused with the phase            #
    #      interleave / channel un-pad / NCHW transpose (one HBM round trip). #
    z = y_conv.astype(jnp.float32) * scale + shift
    z = jnp.where(z >= 0, z, LEAKY_SLOPE * z)
    out = z[..., :Cout].reshape(N, 2, 2, H, W, Cout)   # (n, a, b, i, j, c)
    out = jnp.transpose(out, (0, 5, 3, 1, 4, 2))       # (n, c, i, a, j, b)
    return out.reshape(N, Cout, 2 * H, 2 * W)


# --------------------------------------------------------------------------- #
# Pure-JAX reference matching the PyTorch forward (training-mode BN).         #
# --------------------------------------------------------------------------- #
def _ref_forward(x, w, b, gamma, beta):
    xu = jnp.repeat(jnp.repeat(x, 2, axis=2), 2, axis=3)
    y = jax.lax.conv_general_dilated(
        xu, w, window_strides=(1, 1), padding=((1, 1), (1, 1)),
        dimension_numbers=("NCHW", "OIHW", "NCHW"),
        precision=jax.lax.Precision.HIGHEST,
    ) + b.reshape(1, -1, 1, 1)
    mean = jnp.mean(y, axis=(0, 2, 3), keepdims=True)
    var = jnp.mean((y - mean) ** 2, axis=(0, 2, 3), keepdims=True)
    yh = (y - mean) / jnp.sqrt(var + BN_EPS)
    yh = yh * gamma.reshape(1, -1, 1, 1) + beta.reshape(1, -1, 1, 1)
    return jnp.where(yh >= 0, yh, LEAKY_SLOPE * yh)


if __name__ == "__main__":
    key = jax.random.PRNGKey(0)
    N, Cin, Cout, H, W = 2, 4, 8, 16, 16

    kx, kw, kb, kg, kbt = jax.random.split(key, 5)
    x = jax.random.normal(kx, (N, Cin, H, W), dtype=jnp.float32)

    # Conv2d-style uniform init; non-trivial BN affine to exercise the math.
    fan_in = Cin * 3 * 3
    bound = 1.0 / (fan_in ** 0.5)
    w = jax.random.uniform(kw, (Cout, Cin, 3, 3), jnp.float32, -bound, bound)
    b = jax.random.uniform(kb, (Cout,), jnp.float32, -bound, bound)
    gamma = 1.0 + 0.1 * jax.random.normal(kg, (Cout,), jnp.float32)
    beta = 0.1 * jax.random.normal(kbt, (Cout,), jnp.float32)

    ref = jax.block_until_ready(_ref_forward(x, w, b, gamma, beta))

    # f32 MXU path, whole image per row tile: tight check of the sub-pixel
    # fold + tap-concat matmul + two-pass BN (and of the dropped conv bias).
    out_f32 = jax.block_until_ready(
        vqvae_dec_block(x, w, b, gamma, beta, compute_dtype=jnp.float32))
    assert out_f32.shape == (N, Cout, 2 * H, 2 * W), out_f32.shape
    err32 = float(jnp.max(jnp.abs(out_f32 - ref)))
    assert err32 < 1e-3, f"f32 max err {err32}"

    # Same f32 math with explicit row tiling (exercises the (N, R) grid path
    # used for large images / v7x's smaller VMEM).
    out_tiled = jax.block_until_ready(
        vqvae_dec_block(x, w, b, gamma, beta, compute_dtype=jnp.float32,
                        row_tile=8))
    err_t = float(jnp.max(jnp.abs(out_tiled - ref)))
    assert err_t < 1e-3, f"f32 row-tiled max err {err_t}"

    # bf16 MXU operands / f32 accumulation / bf16 conv intermediate (fast
    # path); tolerance reflects bf16 input/weight/intermediate rounding.
    out_bf16 = jax.block_until_ready(
        vqvae_dec_block(x, w, b, gamma, beta, compute_dtype=jnp.bfloat16))
    assert out_bf16.shape == (N, Cout, 2 * H, 2 * W), out_bf16.shape
    errbf = float(jnp.max(jnp.abs(out_bf16 - ref)))
    assert errbf < 1e-1, f"bf16 max err {errbf}"

    print("KERNEL_OK")
</pallas_src>

<mosaic_0001>
module attributes {stable_mosaic.version = 11 : i64} {
  func.func @_conv_stats_kernel(%arg0: i32, %arg1: i32, %arg2: memref<1x18x18x8xf32, #tpu.memory_space<vmem>>, %arg3: memref<4x32x128xf32, #tpu.memory_space<vmem>>, %arg4: memref<1x2x2x256x128xf32, #tpu.memory_space<vmem>>, %arg5: memref<1x1x2x128xf32, #tpu.memory_space<vmem>>) attributes {dimension_semantics = [#tpu.dimension_semantics<parallel>, #tpu.dimension_semantics<parallel>], iteration_bounds = array<i64: 2, 1>, scalar_prefetch = 0 : i64, scratch_operands = 0 : i64, tpu.core_type = #tpu.core_type<tc>, window_params = [{transform_indices = @transform_0, window_bounds = array<i64: 1, 18, 18, 8>}, {pipeline_mode = #tpu.pipeline_mode<synchronous>, transform_indices = @transform_1, window_bounds = array<i64: 4, 32, 128>}, {transform_indices = @transform_2, window_bounds = array<i64: 1, 2, 2, 256, 128>}, {transform_indices = @transform_3, window_bounds = array<i64: 1, 1, 2, 128>}]} {
    %c16_i32 = arith.constant 16 : i32
    %0 = arith.muli %arg1, %c16_i32 : i32
    %cst = arith.constant 0.000000e+00 : f32
    %1 = vector.broadcast %cst : f32 to vector<1x128xf32>
    %cst_0 = arith.constant 0.000000e+00 : f32
    %2 = vector.broadcast %cst_0 : f32 to vector<1x128xf32>
    %c0_i32 = arith.constant 0 : i32
    %3 = arith.addi %0, %c0_i32 : i32
    %c0_i32_1 = arith.constant 0 : i32
    %4 = arith.addi %3, %c0_i32_1 : i32
    %c0 = arith.constant 0 : index
    %5 = arith.index_cast %4 : i32 to index
    %c0_2 = arith.constant 0 : index
    %c0_3 = arith.constant 0 : index
    %6 = vector.load %arg2[%c0, %5, %c0_2, %c0_3] : memref<1x18x18x8xf32, #tpu.memory_space<vmem>>, vector<1x16x16x8xf32>
    %7 = vector.shape_cast %6 : vector<1x16x16x8xf32> to vector<16x16x8xf32>
    %8 = vector.shape_cast %7 : vector<16x16x8xf32> to vector<256x8xf32>
    %c0_i32_4 = arith.constant 0 : i32
    %9 = arith.addi %0, %c0_i32_4 : i32
    %c0_i32_5 = arith.constant 0 : i32
    %10 = arith.addi %9, %c0_i32_5 : i32
    %c0_6 = arith.constant 0 : index
    %11 = arith.index_cast %10 : i32 to index
    %c1 = arith.constant 1 : index
    %c0_7 = arith.constant 0 : index
    %12 = vector.load %arg2[%c0_6, %11, %c1, %c0_7] : memref<1x18x18x8xf32, #tpu.memory_space<vmem>>, vector<1x16x16x8xf32>
    %13 = vector.shape_cast %12 : vector<1x16x16x8xf32> to vector<16x16x8xf32>
    %14 = vector.shape_cast %13 : vector<16x16x8xf32> to vector<256x8xf32>
    %c0_i32_8 = arith.constant 0 : i32
    %15 = arith.addi %0, %c0_i32_8 : i32
    %c1_i32 = arith.constant 1 : i32
    %16 = arith.addi %15, %c1_i32 : i32
    %c0_9 = arith.constant 0 : index
    %17 = arith.index_cast %16 : i32 to index
    %c0_10 = arith.constant 0 : index
    %c0_11 = arith.constant 0 : index
    %18 = vector.load %arg2[%c0_9, %17, %c0_10, %c0_11] : memref<1x18x18x8xf32, #tpu.memory_space<vmem>>, vector<1x16x16x8xf32>
    %19 = vector.shape_cast %18 : vector<1x16x16x8xf32> to vector<16x16x8xf32>
    %20 = vector.shape_cast %19 : vector<16x16x8xf32> to vector<256x8xf32>
    %c0_i32_12 = arith.constant 0 : i32
    %21 = arith.addi %0, %c0_i32_12 : i32
    %c1_i32_13 = arith.constant 1 : i32
    %22 = arith.addi %21, %c1_i32_13 : i32
    %c0_14 = arith.constant 0 : index
    %23 = arith.index_cast %22 : i32 to index
    %c1_15 = arith.constant 1 : index
    %c0_16 = arith.constant 0 : index
    %24 = vector.load %arg2[%c0_14, %23, %c1_15, %c0_16] : memref<1x18x18x8xf32, #tpu.memory_space<vmem>>, vector<1x16x16x8xf32>
    %25 = vector.shape_cast %24 : vector<1x16x16x8xf32> to vector<16x16x8xf32>
    %26 = vector.shape_cast %25 : vector<16x16x8xf32> to vector<256x8xf32>
    %27 = tpu.concatenate %8, %14, %20, %26 in 1 : vector<256x8xf32>, vector<256x8xf32>, vector<256x8xf32>, vector<256x8xf32> -> vector<256x32xf32>
    %c0_17 = arith.constant 0 : index
    %c0_18 = arith.constant 0 : index
    %c0_19 = arith.constant 0 : index
    %28 = vector.load %arg3[%c0_17, %c0_18, %c0_19] : memref<4x32x128xf32, #tpu.memory_space<vmem>>, vector<1x32x128xf32>
    %29 = vector.shape_cast %28 : vector<1x32x128xf32> to vector<32x128xf32>
    %cst_20 = arith.constant dense<0.000000e+00> : vector<256x128xf32>
    %30 = tpu.matmul %27, %29, %cst_20 {dimension_numbers = #tpu.dot_dimension_numbers<[1], [0], [0], [1], [0, 0, 1, 1], [], []>} : vector<256x32xf32>, vector<32x128xf32>, vector<256x128xf32> -> vector<256x128xf32>
    %c0_21 = arith.constant 0 : index
    %c0_22 = arith.constant 0 : index
    %c0_23 = arith.constant 0 : index
    %c0_24 = arith.constant 0 : index
    %c0_25 = arith.constant 0 : index
    %31 = vector.load %arg4[%c0_21, %c0_22, %c0_23, %c0_24, %c0_25] : memref<1x2x2x256x128xf32, #tpu.memory_space<vmem>>, vector<1x1x1x256x128xf32>
    %32 = vector.shape_cast %31 : vector<1x1x1x256x128xf32> to vector<256x128xf32>
    %33 = vector.shape_cast %30 : vector<256x128xf32> to vector<1x1x1x256x128xf32>
    tpu.vector_store %arg4[%c0_21, %c0_22, %c0_23, %c0_24, %c0_25], %33 {strides = array<i32>} : memref<1x2x2x256x128xf32, #tpu.memory_space<vmem>>, vector<1x1x1x256x128xf32>,
    %cst_26 = arith.constant dense<0.000000e+00> : vector<128xf32>
    %34 = vector.multi_reduction <add>, %30, %cst_26 [0] : vector<256x128xf32> to vector<128xf32>
    %35 = vector.shape_cast %34 : vector<128xf32> to vector<1x128xf32>
    %36 = arith.addf %1, %35 : vector<1x128xf32>
    %37 = arith.mulf %30, %30 : vector<256x128xf32>
    %cst_27 = arith.constant dense<0.000000e+00> : vector<128xf32>
    %38 = vector.multi_reduction <add>, %37, %cst_27 [0] : vector<256x128xf32> to vector<128xf32>
    %39 = vector.shape_cast %38 : vector<128xf32> to vector<1x128xf32>
    %40 = arith.addf %2, %39 : vector<1x128xf32>
    %c0_i32_28 = arith.constant 0 : i32
    %41 = arith.addi %0, %c0_i32_28 : i32
    %c0_i32_29 = arith.constant 0 : i32
    %42 = arith.addi %41, %c0_i32_29 : i32
    %c0_30 = arith.constant 0 : index
    %43 = arith.index_cast %42 : i32 to index
    %c1_31 = arith.constant 1 : index
    %c0_32 = arith.constant 0 : index
    %44 = vector.load %arg2[%c0_30, %43, %c1_31, %c0_32] : memref<1x18x18x8xf32, #tpu.memory_space<vmem>>, vector<1x16x16x8xf32>
    %45 = vector.shape_cast %44 : vector<1x16x16x8xf32> to vector<16x16x8xf32>
    %46 = vector.shape_cast %45 : vector<16x16x8xf32> to vector<256x8xf32>
    %c0_i32_33 = arith.constant 0 : i32
    %47 = arith.addi %0, %c0_i32_33 : i32
    %c0_i32_34 = arith.constant 0 : i32
    %48 = arith.addi %47, %c0_i32_34 : i32
    %c0_35 = arith.constant 0 : index
    %49 = arith.index_cast %48 : i32 to index
    %c2 = arith.constant 2 : index
    %c0_36 = arith.constant 0 : index
    %50 = vector.load %arg2[%c0_35, %49, %c2, %c0_36] : memref<1x18x18x8xf32, #tpu.memory_space<vmem>>, vector<1x16x16x8xf32>
    %51 = vector.shape_cast %50 : vector<1x16x16x8xf32> to vector<16x16x8xf32>
    %52 = vector.shape_cast %51 : vector<16x16x8xf32> to vector<256x8xf32>
    %c0_i32_37 = arith.constant 0 : i32
    %53 = arith.addi %0, %c0_i32_37 : i32
    %c1_i32_38 = arith.constant 1 : i32
    %54 = arith.addi %53, %c1_i32_38 : i32
    %c0_39 = arith.constant 0 : index
    %55 = arith.index_cast %54 : i32 to index
    %c1_40 = arith.constant 1 : index
    %c0_41 = arith.constant 0 : index
    %56 = vector.load %arg2[%c0_39, %55, %c1_40, %c0_41] : memref<1x18x18x8xf32, #tpu.memory_space<vmem>>, vector<1x16x16x8xf32>
    %57 = vector.shape_cast %56 : vector<1x16x16x8xf32> to vector<16x16x8xf32>
    %58 = vector.shape_cast %57 : vector<16x16x8xf32> to vector<256x8xf32>
    %c0_i32_42 = arith.constant 0 : i32
    %59 = arith.addi %0, %c0_i32_42 : i32
    %c1_i32_43 = arith.constant 1 : i32
    %60 = arith.addi %59, %c1_i32_43 : i32
    %c0_44 = arith.constant 0 : index
    %61 = arith.index_cast %60 : i32 to index
    %c2_45 = arith.constant 2 : index
    %c0_46 = arith.constant 0 : index
    %62 = vector.load %arg2[%c0_44, %61, %c2_45, %c0_46] : memref<1x18x18x8xf32, #tpu.memory_space<vmem>>, vector<1x16x16x8xf32>
    %63 = vector.shape_cast %62 : vector<1x16x16x8xf32> to vector<16x16x8xf32>
    %64 = vector.shape_cast %63 : vector<16x16x8xf32> to vector<256x8xf32>
    %65 = tpu.concatenate %46, %52, %58, %64 in 1 : vector<256x8xf32>, vector<256x8xf32>, vector<256x8xf32>, vector<256x8xf32> -> vector<256x32xf32>
    %c1_47 = arith.constant 1 : index
    %c0_48 = arith.constant 0 : index
    %c0_49 = arith.constant 0 : index
    %66 = vector.load %arg3[%c1_47, %c0_48, %c0_49] : memref<4x32x128xf32, #tpu.memory_space<vmem>>, vector<1x32x128xf32>
    %67 = vector.shape_cast %66 : vector<1x32x128xf32> to vector<32x128xf32>
    %cst_50 = arith.constant dense<0.000000e+00> : vector<256x128xf32>
    %68 = tpu.matmul %65, %67, %cst_50 {dimension_numbers = #tpu.dot_dimension_numbers<[1], [0], [0], [1], [0, 0, 1, 1], [], []>} : vector<256x32xf32>, vector<32x128xf32>, vector<256x128xf32> -> vector<256x128xf32>
    %c0_51 = arith.constant 0 : index
    %c0_52 = arith.constant 0 : index
    %c1_53 = arith.constant 1 : index
    %c0_54 = arith.constant 0 : index
    %c0_55 = arith.constant 0 : index
    %69 = vector.load %arg4[%c0_51, %c0_52, %c1_53, %c0_54, %c0_55] : memref<1x2x2x256x128xf32, #tpu.memory_space<vmem>>, vector<1x1x1x256x128xf32>
    %70 = vector.shape_cast %69 : vector<1x1x1x256x128xf32> to vector<256x128xf32>
    %71 = vector.shape_cast %68 : vector<256x128xf32> to vector<1x1x1x256x128xf32>
    tpu.vector_store %arg4[%c0_51, %c0_52, %c1_53, %c0_54, %c0_55], %71 {strides = array<i32>} : memref<1x2x2x256x128xf32, #tpu.memory_space<vmem>>, vector<1x1x1x256x128xf32>,
    %cst_56 = arith.constant dense<0.000000e+00> : vector<128xf32>
    %72 = vector.multi_reduction <add>, %68, %cst_56 [0] : vector<256x128xf32> to vector<128xf32>
    %73 = vector.shape_cast %72 : vector<128xf32> to vector<1x128xf32>
    %74 = arith.addf %36, %73 : vector<1x128xf32>
    %75 = arith.mulf %68, %68 : vector<256x128xf32>
    %cst_57 = arith.constant dense<0.000000e+00> : vector<128xf32>
    %76 = vector.multi_reduction <add>, %75, %cst_57 [0] : vector<256x128xf32> to vector<128xf32>
    %77 = vector.shape_cast %76 : vector<128xf32> to vector<1x128xf32>
    %78 = arith.addf %40, %77 : vector<1x128xf32>
    %c1_i32_58 = arith.constant 1 : i32
    %79 = arith.addi %0, %c1_i32_58 : i32
    %c0_i32_59 = arith.constant 0 : i32
    %80 = arith.addi %79, %c0_i32_59 : i32
    %c0_60 = arith.constant 0 : index
    %81 = arith.index_cast %80 : i32 to index
    %c0_61 = arith.constant 0 : index
    %c0_62 = arith.constant 0 : index
    %82 = vector.load %arg2[%c0_60, %81, %c0_61, %c0_62] : memref<1x18x18x8xf32, #tpu.memory_space<vmem>>, vector<1x16x16x8xf32>
    %83 = vector.shape_cast %82 : vector<1x16x16x8xf32> to vector<16x16x8xf32>
    %84 = vector.shape_cast %83 : vector<16x16x8xf32> to vector<256x8xf32>
    %c1_i32_63 = arith.constant 1 : i32
    %85 = arith.addi %0, %c1_i32_63 : i32
    %c0_i32_64 = arith.constant 0 : i32
    %86 = arith.addi %85, %c0_i32_64 : i32
    %c0_65 = arith.constant 0 : index
    %87 = arith.index_cast %86 : i32 to index
    %c1_66 = arith.constant 1 : index
    %c0_67 = arith.constant 0 : index
    %88 = vector.load %arg2[%c0_65, %87, %c1_66, %c0_67] : memref<1x18x18x8xf32, #tpu.memory_space<vmem>>, vector<1x16x16x8xf32>
    %89 = vector.shape_cast %88 : vector<1x16x16x8xf32> to vector<16x16x8xf32>
    %90 = vector.shape_cast %89 : vector<16x16x8xf32> to vector<256x8xf32>
    %c1_i32_68 = arith.constant 1 : i32
    %91 = arith.addi %0, %c1_i32_68 : i32
    %c1_i32_69 = arith.constant 1 : i32
    %92 = arith.addi %91, %c1_i32_69 : i32
    %c0_70 = arith.constant 0 : index
    %93 = arith.index_cast %92 : i32 to index
    %c0_71 = arith.constant 0 : index
    %c0_72 = arith.constant 0 : index
    %94 = vector.load %arg2[%c0_70, %93, %c0_71, %c0_72] : memref<1x18x18x8xf32, #tpu.memory_space<vmem>>, vector<1x16x16x8xf32>
    %95 = vector.shape_cast %94 : vector<1x16x16x8xf32> to vector<16x16x8xf32>
    %96 = vector.shape_cast %95 : vector<16x16x8xf32> to vector<256x8xf32>
    %c1_i32_73 = arith.constant 1 : i32
    %97 = arith.addi %0, %c1_i32_73 : i32
    %c1_i32_74 = arith.constant 1 : i32
    %98 = arith.addi %97, %c1_i32_74 : i32
    %c0_75 = arith.constant 0 : index
    %99 = arith.index_cast %98 : i32 to index
    %c1_76 = arith.constant 1 : index
    %c0_77 = arith.constant 0 : index
    %100 = vector.load %arg2[%c0_75, %99, %c1_76, %c0_77] : memref<1x18x18x8xf32, #tpu.memory_space<vmem>>, vector<1x16x16x8xf32>
    %101 = vector.shape_cast %100 : vector<1x16x16x8xf32> to vector<16x16x8xf32>
    %102 = vector.shape_cast %101 : vector<16x16x8xf32> to vector<256x8xf32>
    %103 = tpu.concatenate %84, %90, %96, %102 in 1 : vector<256x8xf32>, vector<256x8xf32>, vector<256x8xf32>, vector<256x8xf32> -> vector<256x32xf32>
    %c2_78 = arith.constant 2 : index
    %c0_79 = arith.constant 0 : index
    %c0_80 = arith.constant 0 : index
    %104 = vector.load %arg3[%c2_78, %c0_79, %c0_80] : memref<4x32x128xf32, #tpu.memory_space<vmem>>, vector<1x32x128xf32>
    %105 = vector.shape_cast %104 : vector<1x32x128xf32> to vector<32x128xf32>
    %cst_81 = arith.constant dense<0.000000e+00> : vector<256x128xf32>
    %106 = tpu.matmul %103, %105, %cst_81 {dimension_numbers = #tpu.dot_dimension_numbers<[1], [0], [0], [1], [0, 0, 1, 1], [], []>} : vector<256x32xf32>, vector<32x128xf32>, vector<256x128xf32> -> vector<256x128xf32>
    %c0_82 = arith.constant 0 : index
    %c1_83 = arith.constant 1 : index
    %c0_84 = arith.constant 0 : index
    %c0_85 = arith.constant 0 : index
    %c0_86 = arith.constant 0 : index
    %107 = vector.load %arg4[%c0_82, %c1_83, %c0_84, %c0_85, %c0_86] : memref<1x2x2x256x128xf32, #tpu.memory_space<vmem>>, vector<1x1x1x256x128xf32>
    %108 = vector.shape_cast %107 : vector<1x1x1x256x128xf32> to vector<256x128xf32>
    %109 = vector.shape_cast %106 : vector<256x128xf32> to vector<1x1x1x256x128xf32>
    tpu.vector_store %arg4[%c0_82, %c1_83, %c0_84, %c0_85, %c0_86], %109 {strides = array<i32>} : memref<1x2x2x256x128xf32, #tpu.memory_space<vmem>>, vector<1x1x1x256x128xf32>,
    %cst_87 = arith.constant dense<0.000000e+00> : vector<128xf32>
    %110 = vector.multi_reduction <add>, %106, %cst_87 [0] : vector<256x128xf32> to vector<128xf32>
    %111 = vector.shape_cast %110 : vector<128xf32> to vector<1x128xf32>
    %112 = arith.addf %74, %111 : vector<1x128xf32>
    %113 = arith.mulf %106, %106 : vector<256x128xf32>
    %cst_88 = arith.constant dense<0.000000e+00> : vector<128xf32>
    %114 = vector.multi_reduction <add>, %113, %cst_88 [0] : vector<256x128xf32> to vector<128xf32>
    %115 = vector.shape_cast %114 : vector<128xf32> to vector<1x128xf32>
    %116 = arith.addf %78, %115 : vector<1x128xf32>
    %c1_i32_89 = arith.constant 1 : i32
    %117 = arith.addi %0, %c1_i32_89 : i32
    %c0_i32_90 = arith.constant 0 : i32
    %118 = arith.addi %117, %c0_i32_90 : i32
    %c0_91 = arith.constant 0 : index
    %119 = arith.index_cast %118 : i32 to index
    %c1_92 = arith.constant 1 : index
    %c0_93 = arith.constant 0 : index
    %120 = vector.load %arg2[%c0_91, %119, %c1_92, %c0_93] : memref<1x18x18x8xf32, #tpu.memory_space<vmem>>, vector<1x16x16x8xf32>
    %121 = vector.shape_cast %120 : vector<1x16x16x8xf32> to vector<16x16x8xf32>
    %122 = vector.shape_cast %121 : vector<16x16x8xf32> to vector<256x8xf32>
    %c1_i32_94 = arith.constant 1 : i32
    %123 = arith.addi %0, %c1_i32_94 : i32
    %c0_i32_95 = arith.constant 0 : i32
    %124 = arith.addi %123, %c0_i32_95 : i32
    %c0_96 = arith.constant 0 : index
    %125 = arith.index_cast %124 : i32 to index
    %c2_97 = arith.constant 2 : index
    %c0_98 = arith.constant 0 : index
    %126 = vector.load %arg2[%c0_96, %125, %c2_97, %c0_98] : memref<1x18x18x8xf32, #tpu.memory_space<vmem>>, vector<1x16x16x8xf32>
    %127 = vector.shape_cast %126 : vector<1x16x16x8xf32> to vector<16x16x8xf32>
    %128 = vector.shape_cast %127 : vector<16x16x8xf32> to vector<256x8xf32>
    %c1_i32_99 = arith.constant 1 : i32
    %129 = arith.addi %0, %c1_i32_99 : i32
    %c1_i32_100 = arith.constant 1 : i32
    %130 = arith.addi %129, %c1_i32_100 : i32
    %c0_101 = arith.constant 0 : index
    %131 = arith.index_cast %130 : i32 to index
    %c1_102 = arith.constant 1 : index
    %c0_103 = arith.constant 0 : index
    %132 = vector.load %arg2[%c0_101, %131, %c1_102, %c0_103] : memref<1x18x18x8xf32, #tpu.memory_space<vmem>>, vector<1x16x16x8xf32>
    %133 = vector.shape_cast %132 : vector<1x16x16x8xf32> to vector<16x16x8xf32>
    %134 = vector.shape_cast %133 : vector<16x16x8xf32> to vector<256x8xf32>
    %c1_i32_104 = arith.constant 1 : i32
    %135 = arith.addi %0, %c1_i32_104 : i32
    %c1_i32_105 = arith.constant 1 : i32
    %136 = arith.addi %135, %c1_i32_105 : i32
    %c0_106 = arith.constant 0 : index
    %137 = arith.index_cast %136 : i32 to index
    %c2_107 = arith.constant 2 : index
    %c0_108 = arith.constant 0 : index
    %138 = vector.load %arg2[%c0_106, %137, %c2_107, %c0_108] : memref<1x18x18x8xf32, #tpu.memory_space<vmem>>, vector<1x16x16x8xf32>
    %139 = vector.shape_cast %138 : vector<1x16x16x8xf32> to vector<16x16x8xf32>
    %140 = vector.shape_cast %139 : vector<16x16x8xf32> to vector<256x8xf32>
    %141 = tpu.concatenate %122, %128, %134, %140 in 1 : vector<256x8xf32>, vector<256x8xf32>, vector<256x8xf32>, vector<256x8xf32> -> vector<256x32xf32>
    %c3 = arith.constant 3 : index
    %c0_109 = arith.constant 0 : index
    %c0_110 = arith.constant 0 : index
    %142 = vector.load %arg3[%c3, %c0_109, %c0_110] : memref<4x32x128xf32, #tpu.memory_space<vmem>>, vector<1x32x128xf32>
    %143 = vector.shape_cast %142 : vector<1x32x128xf32> to vector<32x128xf32>
    %cst_111 = arith.constant dense<0.000000e+00> : vector<256x128xf32>
    %144 = tpu.matmul %141, %143, %cst_111 {dimension_numbers = #tpu.dot_dimension_numbers<[1], [0], [0], [1], [0, 0, 1, 1], [], []>} : vector<256x32xf32>, vector<32x128xf32>, vector<256x128xf32> -> vector<256x128xf32>
    %c0_112 = arith.constant 0 : index
    %c1_113 = arith.constant 1 : index
    %c1_114 = arith.constant 1 : index
    %c0_115 = arith.constant 0 : index
    %c0_116 = arith.constant 0 : index
    %145 = vector.load %arg4[%c0_112, %c1_113, %c1_114, %c0_115, %c0_116] : memref<1x2x2x256x128xf32, #tpu.memory_space<vmem>>, vector<1x1x1x256x128xf32>
    %146 = vector.shape_cast %145 : vector<1x1x1x256x128xf32> to vector<256x128xf32>
    %147 = vector.shape_cast %144 : vector<256x128xf32> to vector<1x1x1x256x128xf32>
    tpu.vector_store %arg4[%c0_112, %c1_113, %c1_114, %c0_115, %c0_116], %147 {strides = array<i32>} : memref<1x2x2x256x128xf32, #tpu.memory_space<vmem>>, vector<1x1x1x256x128xf32>,
    %cst_117 = arith.constant dense<0.000000e+00> : vector<128xf32>
    %148 = vector.multi_reduction <add>, %144, %cst_117 [0] : vector<256x128xf32> to vector<128xf32>
    %149 = vector.shape_cast %148 : vector<128xf32> to vector<1x128xf32>
    %150 = arith.addf %112, %149 : vector<1x128xf32>
    %151 = arith.mulf %144, %144 : vector<256x128xf32>
    %cst_118 = arith.constant dense<0.000000e+00> : vector<128xf32>
    %152 = vector.multi_reduction <add>, %151, %cst_118 [0] : vector<256x128xf32> to vector<128xf32>
    %153 = vector.shape_cast %152 : vector<128xf32> to vector<1x128xf32>
    %154 = arith.addf %116, %153 : vector<1x128xf32>
    %c0_119 = arith.constant 0 : index
    %c0_120 = arith.constant 0 : index
    %c0_121 = arith.constant 0 : index
    %c0_122 = arith.constant 0 : index
    %155 = vector.load %arg5[%c0_119, %c0_120, %c0_121, %c0_122] : memref<1x1x2x128xf32, #tpu.memory_space<vmem>>, vector<1x1x1x128xf32>
    %156 = vector.shape_cast %155 : vector<1x1x1x128xf32> to vector<1x128xf32>
    %157 = vector.shape_cast %150 : vector<1x128xf32> to vector<1x1x1x128xf32>
    tpu.vector_store %arg5[%c0_119, %c0_120, %c0_121, %c0_122], %157 {strides = array<i32>} : memref<1x1x2x128xf32, #tpu.memory_space<vmem>>, vector<1x1x1x128xf32>,
    %c0_123 = arith.constant 0 : index
    %c0_124 = arith.constant 0 : index
    %c1_125 = arith.constant 1 : index
    %c0_126 = arith.constant 0 : index
    %158 = vector.load %arg5[%c0_123, %c0_124, %c1_125, %c0_126] : memref<1x1x2x128xf32, #tpu.memory_space<vmem>>, vector<1x1x1x128xf32>
    %159 = vector.shape_cast %158 : vector<1x1x1x128xf32> to vector<1x128xf32>
    %160 = vector.shape_cast %154 : vector<1x128xf32> to vector<1x1x1x128xf32>
    tpu.vector_store %arg5[%c0_123, %c0_124, %c1_125, %c0_126], %160 {strides = array<i32>} : memref<1x1x2x128xf32, #tpu.memory_space<vmem>>, vector<1x1x1x128xf32>,
    return
  }
  func.func @transform_0(%arg0: i32, %arg1: i32) -> (i32, i32, i32, i32) {
    %c0_i32 = arith.constant 0 : i32
    %c0_i32_0 = arith.constant 0 : i32
    %c0_i32_1 = arith.constant 0 : i32
    %c0_i32_2 = arith.constant 0 : i32
    return %arg0, %c0_i32, %c0_i32_0, %c0_i32_1 : i32, i32, i32, i32
  }
  func.func @transform_1(%arg0: i32, %arg1: i32) -> (i32, i32, i32) {
    %c0_i32 = arith.constant 0 : i32
    %c0_i32_0 = arith.constant 0 : i32
    %c0_i32_1 = arith.constant 0 : i32
    %c0_i32_2 = arith.constant 0 : i32
    return %c0_i32, %c0_i32_0, %c0_i32_1 : i32, i32, i32
  }
  func.func @transform_2(%arg0: i32, %arg1: i32) -> (i32, i32, i32, i32, i32) {
    %c0_i32 = arith.constant 0 : i32
    %c0_i32_0 = arith.constant 0 : i32
    %c0_i32_1 = arith.constant 0 : i32
    %c0_i32_2 = arith.constant 0 : i32
    return %arg0, %c0_i32, %c0_i32_0, %arg1, %c0_i32_1 : i32, i32, i32, i32, i32
  }
  func.func @transform_3(%arg0: i32, %arg1: i32) -> (i32, i32, i32, i32) {
    %c0_i32 = arith.constant 0 : i32
    %c0_i32_0 = arith.constant 0 : i32
    %c0_i32_1 = arith.constant 0 : i32
    return %arg0, %arg1, %c0_i32, %c0_i32_0 : i32, i32, i32, i32
  }
}

</mosaic_0001>

<bundles_post_ra>
// kernel: vqvae_dec_block.1
= control target key start
LH: loop header
LB: loop body
LE: loop exit
PB: predicated region body
PF: predicated region fallthrough
CT: control target
= control target key end

     0   :  { %s5768_s12 = smov 0   ;;  %s5770_s13 = smov 0   ;;  %s8325_s0 = inlined_call_operand.vmem [shape: f32[2,18,18,8], index: 0, kind: input, shape index: {}]   ;;  %s8326_s1 = inlined_call_operand.vmem [shape: f32[4,32,128], index: 1, kind: input, shape index: {}]   ;;  %s8327_s2 = inlined_call_operand.vmem [shape: f32[2,2,2,256,128], index: 2, kind: output, shape index: {0}]   ;;  %s8328_s3 = inlined_call_operand.vmem [shape: f32[2,1,2,128], index: 3, kind: output, shape index: {1}]  }
   0x1   :  { %s5772_s14 = smov 0  }
   0x2 LB: > { %s26_s15 = sadd.s32 1, %s5739_s13  ;;  %p4662_p0 = scmp.ge.s32.totalorder %s5743_s14, 1  ;;  %s5743_s14 = sphi %s5772_s14, %s14_s14   ;;  %s5739_s13 = sphi %s5770_s13, %s8643_s13   ;;  %s5735_s12 = sphi %s5768_s12, %s8642_s12  }
   0x3   : > { %p28_p1 = scmp.ge.s32.totalorder %s26_s15, 2  ;;  %p156_p2 = scmp.lt.s32.totalorder %s5743_s14, 3 }
   0x5   : > { %s8645_s15 = smov (%p28_p1, %s26_s15), 0  ;;  %p157_p3 = pnand %p4662_p0, %p156_p2 }
   0x7   : > { %160 = sbr.rel (%p157_p3) target bundleno = 1137 (0x471), region = 28 }
   0xe   : > { %p191_p4 = scmp.lt.s32.totalorder %s5735_s12, 1  ;;  %s5745_s20 = smov 8   ;;  %v830_v56 = vld [vmem:[%s8326_s1] sm:$0xff]  ;;  %v831_v57 = vld [vmem:[%s8326_s1 + $0x8] sm:$0xff]  ;;  %v832_v61 = vld [vmem:[%s8326_s1 + $0x10] sm:$0xff]  ;;  %vm731_vm0 = vcmask 64512  }
   0xf   : > { %s5746_s21 = smov 16   ;;  %v5658_v58 = vpack.c.bf16 %v831_v57, %v830_v56  ;;  %v833_v62 = vld [vmem:[%s8326_s1 + $0x18] sm:$0xff]  ;;  %s5747_s30 = smov 24   ;;  %vm764_vm1 = vcmask 130048   ;;  %vm797_vm2 = vcmask 195584   ;;  %vm834_vm3 = vcmask 261120  }
  0x10   : > { %s8647_s12 = smov (!%p191_p4, %s5735_s12), 1  ;;  %v5662_v63 = vpack.c.bf16 %v833_v62, %v832_v61 }
  0x11   : > { %s5690_s16 = smul.u32 432, %s8647_s12  ;;  %5659 = vmatprep.subr.bf16.mxu0 %v5658_v58  ;;  %s5289_s9 = sshll.u32 %s8647_s12, 10 }
  0x12   : > { %5661 = vmatpush3.bf16.msra.mxu0 %v5658_v58 }
  0x13   : > { %s5792_s19 = scalar_lea.vmem %s8325_s0, %s5690_s16  ;;  %5663 = vmatprep.subr.bf16.mxu0 %v5662_v63  ;;  %s7213_s16 = scalar_lea.vmem %s8327_s2, %s5289_s9 }
  0x14   : > { %v5795_v0 = vld [vmem:[%s5792_s19 + $0x19] sm:$0xff]  ;;  %v248_v1 = vld [vmem:[%s5792_s19 + $0x1] sm:$0xff]  ;;  %v249_v3 = vld [vmem:[%s5792_s19 + $0x9] sm:$0xff] }
  0x15   : > { %383 = vrot.lane.b32.xlu1 %v5795_v0, %s5745_s20  ;;  %379 = vrot.lane.b32.xlu0 %v248_v1, %s5745_s20  ;;  %v5802_v2 = vld [vmem:[%s5792_s19 + $0x21] sm:$0xff]  ;;  %v5809_v4 = vld [vmem:[%s5792_s19 + $0x39] sm:$0xff] }
  0x16   : > { %v5812_v5 = vld [vmem:[%s5792_s19 + $0x31] sm:$0xff]  ;;  %v5822_v7 = vld [vmem:[%s5792_s19 + $0x49] sm:$0xff]  ;;  %v5832_v9 = vld [vmem:[%s5792_s19 + $0x61] sm:$0xff]  ;;  %5665 = vmatpush3.bf16.msra.mxu0 %v5662_v63 }
  0x17   : > { %v5819_v6 = vld [vmem:[%s5792_s19 + $0x51] sm:$0xff]  ;;  %v5829_v8 = vld [vmem:[%s5792_s19 + $0x69] sm:$0xff]  ;;  %v5839_v10 = vld [vmem:[%s5792_s19 + $0x81] sm:$0xff] }
  0x18   : > { %8394 = vst [vmem:[#allocation2_spill] sm:$0xff] %v5839_v10  ;;  %v5842_v11 = vld [vmem:[%s5792_s19 + $0x79] sm:$0xff]  ;;  %v5852_v13 = vld [vmem:[%s5792_s19 + $0x91] sm:$0xff]  ;;  %v5862_v15 = vld [vmem:[%s5792_s19 + $0xa9] sm:$0xff] }
  0x19   : > { %385 = vrot.lane.b32.xlu1 %v5802_v2, %s5745_s20  ;;  %381 = vrot.lane.b32.xlu0 %v249_v3, %s5745_s20  ;;  %8395 = vst [vmem:[#allocation3_spill] sm:$0xff] %v5842_v11  ;;  %v5849_v12 = vld [vmem:[%s5792_s19 + $0x99] sm:$0xff]  ;;  %8397 = vst [vmem:[#allocation5_spill] sm:$0xff] %v5852_v13  ;;  %v5859_v14 = vld [vmem:[%s5792_s19 + $0xb1] sm:$0xff] }
  0x1a   : > { %8396 = vst [vmem:[#allocation4_spill] sm:$0xff] %v5849_v12  ;;  %8398 = vst [vmem:[#allocation6_spill] sm:$0xff] %v5859_v14  ;;  %v5869_v16 = vld [vmem:[%s5792_s19 + $0xc9] sm:$0xff]  ;;  %v5872_v17 = vld [vmem:[%s5792_s19 + $0xc1] sm:$0xff] }
  0x1b   : > { %8399 = vst [vmem:[#allocation7_spill] sm:$0xff] %v5862_v15  ;;  %8400 = vst [vmem:[#allocation8_spill] sm:$0xff] %v5869_v16  ;;  %v5879_v18 = vld [vmem:[%s5792_s19 + $0xe1] sm:$0xff]  ;;  %v5882_v19 = vld [vmem:[%s5792_s19 + $0xd9] sm:$0xff] }
  0x1c   : > { %8401 = vst [vmem:[#allocation9_spill] sm:$0xff] %v5872_v17  ;;  %8402 = vst [vmem:[#allocation10_spill] sm:$0xff] %v5879_v18  ;;  %v5889_v20 = vld [vmem:[%s5792_s19 + $0xf9] sm:$0xff]  ;;  %v5892_v21 = vld [vmem:[%s5792_s19 + $0xf1] sm:$0xff] }
  0x1d   : > { %389 = vrot.lane.b32.xlu1 %v5809_v4, %s5745_s20  ;;  %387 = vrot.lane.b32.xlu0 %v5812_v5, %s5745_s20  ;;  %8403 = vst [vmem:[#allocation11_spill] sm:$0xff] %v5882_v19  ;;  %8404 = vst [vmem:[#allocation12_spill] sm:$0xff] %v5889_v20  ;;  %v5899_v22 = vld [vmem:[%s5792_s19 + $0x111] sm:$0xff]  ;;  %v5902_v23 = vld [vmem:[%s5792_s19 + $0x109] sm:$0xff] }
  0x1e   : > { %8405 = vst [vmem:[#allocation13_spill] sm:$0xff] %v5892_v21  ;;  %8406 = vst [vmem:[#allocation14_spill] sm:$0xff] %v5899_v22  ;;  %v5909_v24 = vld [vmem:[%s5792_s19 + $0x129] sm:$0xff]  ;;  %v5912_v25 = vld [vmem:[%s5792_s19 + $0x121] sm:$0xff] }
  0x1f   : > { %8407 = vst [vmem:[#allocation15_spill] sm:$0xff] %v5902_v23  ;;  %v5919_v26 = vld [vmem:[%s5792_s19 + $0x141] sm:$0xff]  ;;  %v5922_v27 = vld [vmem:[%s5792_s19 + $0x139] sm:$0xff]  ;;  %v5932_v29 = vld [vmem:[%s5792_s19 + $0x151] sm:$0xff] }
  0x20   : > { %v5929_v28 = vld [vmem:[%s5792_s19 + $0x159] sm:$0xff]  ;;  %v5939_v30 = vld [vmem:[%s5792_s19 + $0x171] sm:$0xff]  ;;  %v5942_v31 = vld [vmem:[%s5792_s19 + $0x169] sm:$0xff] }
  0x21   : > { %393 = vrot.lane.b32.xlu1 %v5819_v6, %s5745_s20  ;;  %391 = vrot.lane.b32.xlu0 %v5822_v7, %s5745_s20  ;;  %v5949_v32 = vld [vmem:[%s5792_s19 + $0x20] sm:$0xff]  ;;  %v5952_v33 = vld [vmem:[%s5792_s19 + $0x18] sm:$0xff] }
  0x22   : > { %v5959_v34 = vld [vmem:[%s5792_s19 + $0x38] sm:$0xff]  ;;  %v5962_v35 = vld [vmem:[%s5792_s19 + $0x30] sm:$0xff]  ;;  %v5972_v37 = vld [vmem:[%s5792_s19 + $0x48] sm:$0xff] }
  0x23   : > { %v5969_v36 = vld [vmem:[%s5792_s19 + $0x50] sm:$0xff]  ;;  %v5979_v38 = vld [vmem:[%s5792_s19 + $0x68] sm:$0xff]  ;;  %v5982_v39 = vld [vmem:[%s5792_s19 + $0x60] sm:$0xff] }
  0x24   : > { %v5989_v40 = vld [vmem:[%s5792_s19 + $0x80] sm:$0xff]  ;;  %v5992_v41 = vld [vmem:[%s5792_s19 + $0x78] sm:$0xff]  ;;  %v6002_v43 = vld [vmem:[%s5792_s19 + $0x90] sm:$0xff] }
  0x25   : > { %397 = vrot.lane.b32.xlu1 %v5829_v8, %s5745_s20  ;;  %395 = vrot.lane.b32.xlu0 %v5832_v9, %s5745_s20  ;;  %v5999_v42 = vld [vmem:[%s5792_s19 + $0x98] sm:$0xff]  ;;  %v6009_v44 = vld [vmem:[%s5792_s19 + $0xb0] sm:$0xff] }
  0x26   : > { %v6012_v45 = vld [vmem:[%s5792_s19 + $0xa8] sm:$0xff]  ;;  %v6022_v47 = vld [vmem:[%s5792_s19 + $0xc0] sm:$0xff]  ;;  %v6032_v49 = vld [vmem:[%s5792_s19 + $0xd8] sm:$0xff] }
  0x27   : > { %v6019_v46 = vld [vmem:[%s5792_s19 + $0xc8] sm:$0xff]  ;;  %8409 = vst [vmem:[#allocation17_spill] sm:$0xff] %v6022_v47  ;;  %v6029_v48 = vld [vmem:[%s5792_s19 + $0xe0] sm:$0xff]  ;;  %8411 = vst [vmem:[#allocation19_spill] sm:$0xff] %v6032_v49 }
  0x28   : > { %8408 = vst [vmem:[#allocation16_spill] sm:$0xff] %v6019_v46  ;;  %8410 = vst [vmem:[#allocation18_spill] sm:$0xff] %v6029_v48  ;;  %v6039_v50 = vld [vmem:[%s5792_s19 + $0xf8] sm:$0xff]  ;;  %v6042_v51 = vld [vmem:[%s5792_s19 + $0xf0] sm:$0xff] }
  0x29   : > { %401 = vrot.lane.b32.xlu1 %v5839_v10, %s5745_s20  ;;  %399 = vrot.lane.b32.xlu0 %v5842_v11, %s5745_s20  ;;  %8412 = vst [vmem:[#allocation20_spill] sm:$0xff] %v6039_v50  ;;  %8413 = vst [vmem:[#allocation21_spill] sm:$0xff] %v6042_v51  ;;  %v6049_v52 = vld [vmem:[%s5792_s19 + $0x110] sm:$0xff]  ;;  %v6052_v53 = vld [vmem:[%s5792_s19 + $0x108] sm:$0xff] }
  0x2a   : > { %8414 = vst [vmem:[#allocation22_spill] sm:$0xff] %v6049_v52  ;;  %8415 = vst [vmem:[#allocation23_spill] sm:$0xff] %v6052_v53  ;;  %v6059_v54 = vld [vmem:[%s5792_s19 + $0x128] sm:$0xff]  ;;  %v6062_v55 = vld [vmem:[%s5792_s19 + $0x120] sm:$0xff] }
  0x2b   : > { %8416 = vst [vmem:[#allocation24_spill] sm:$0xff] %v6059_v54  ;;  %8417 = vst [vmem:[#allocation25_spill] sm:$0xff] %v6062_v55  ;;  %v6075_v59 = vld [vmem:[%s5792_s19 + $0x140] sm:$0xff]  ;;  %v6078_v60 = vld [vmem:[%s5792_s19 + $0x138] sm:$0xff] }
  0x2c   : > { %8418 = vst [vmem:[#allocation26_spill] sm:$0xff] %v6075_v59  ;;  %8419 = vst [vmem:[#allocation27_spill] sm:$0xff] %v6078_v60  ;;  %v6091_v1 = vld [vmem:[%s5792_s19 + $0x158] sm:$0xff]  ;;  %v6094_v3 = vld [vmem:[%s5792_s19 + $0x150] sm:$0xff] }
  0x2d   : > { %405 = vrot.lane.b32.xlu1 %v5849_v12, %s5745_s20  ;;  %403 = vrot.lane.b32.xlu0 %v5852_v13, %s5745_s20  ;;  %8420 = vst [vmem:[#allocation28_spill] sm:$0xff] %v6091_v1  ;;  %8421 = vst [vmem:[#allocation29_spill] sm:$0xff] %v6094_v3  ;;  %v6105_v58 = vld [vmem:[%s5792_s19 + $0x170] sm:$0xff]  ;;  %v6108_v61 = vld [vmem:[%s5792_s19 + $0x168] sm:$0xff] }
  0x2e   : > { %8422 = vst [vmem:[#allocation30_spill] sm:$0xff] %v6105_v58  ;;  %8423 = vst [vmem:[#allocation31_spill] sm:$0xff] %v6108_v61  ;;  %v4698_v63 = vld [vmem:[%s5792_s19 + $0x188] sm:$0xff] }
  0x31   : > { %409 = vrot.lane.b32.xlu1 %v5859_v14, %s5745_s20  ;;  %407 = vrot.lane.b32.xlu0 %v5862_v15, %s5745_s20 }
  0x35   : > { %413 = vrot.lane.b32.xlu1 %v5869_v16, %s5745_s20  ;;  %411 = vrot.lane.b32.xlu0 %v5872_v17, %s5745_s20 }
  0x39   : > { %417 = vrot.lane.b32.xlu1 %v5879_v18, %s5745_s20  ;;  %415 = vrot.lane.b32.xlu0 %v5882_v19, %s5745_s20 }
  0x3d   : > { %421 = vrot.lane.b32.xlu1 %v5889_v20, %s5745_s20  ;;  %419 = vrot.lane.b32.xlu0 %v5892_v21, %s5745_s20 }
  0x41   : > { %425 = vrot.lane.b32.xlu1 %v5899_v22, %s5745_s20  ;;  %423 = vrot.lane.b32.xlu0 %v5902_v23, %s5745_s20 }
  0x45   : > { %429 = vrot.lane.b32.xlu1 %v5909_v24, %s5745_s20  ;;  %427 = vrot.lane.b32.xlu0 %v5912_v25, %s5745_s20 }
  0x49   : > { %433 = vrot.lane.b32.xlu1 %v5919_v26, %s5745_s20  ;;  %431 = vrot.lane.b32.xlu0 %v5922_v27, %s5745_s20 }
  0x4d   : > { %437 = vrot.lane.b32.xlu1 %v5929_v28, %s5745_s20  ;;  %435 = vrot.lane.b32.xlu0 %v5932_v29, %s5745_s20 }
  0x51   : > { %441 = vrot.lane.b32.xlu1 %v5939_v30, %s5745_s20  ;;  %439 = vrot.lane.b32.xlu0 %v5942_v31, %s5745_s20 }
  0x55   : > { %509 = vrot.lane.b32.xlu1 %v5949_v32, %s5746_s21  ;;  %507 = vrot.lane.b32.xlu0 %v5952_v33, %s5746_s21 }
  0x59   : > { %513 = vrot.lane.b32.xlu1 %v5959_v34, %s5746_s21  ;;  %511 = vrot.lane.b32.xlu0 %v5962_v35, %s5746_s21 }
  0x5d   : > { %517 = vrot.lane.b32.xlu1 %v5969_v36, %s5746_s21  ;;  %515 = vrot.lane.b32.xlu0 %v5972_v37, %s5746_s21 }
  0x61   : > { %521 = vrot.lane.b32.xlu1 %v5979_v38, %s5746_s21  ;;  %519 = vrot.lane.b32.xlu0 %v5982_v39, %s5746_s21 }
  0x65   : > { %525 = vrot.lane.b32.xlu1 %v5989_v40, %s5746_s21  ;;  %523 = vrot.lane.b32.xlu0 %v5992_v41, %s5746_s21 }
  0x69   : > { %529 = vrot.lane.b32.xlu1 %v5999_v42, %s5746_s21  ;;  %527 = vrot.lane.b32.xlu0 %v6002_v43, %s5746_s21 }
  0x6d   : > { %533 = vrot.lane.b32.xlu1 %v6009_v44, %s5746_s21  ;;  %531 = vrot.lane.b32.xlu0 %v6012_v45, %s5746_s21 }
  0x71   : > { %537 = vrot.lane.b32.xlu1 %v6019_v46, %s5746_s21  ;;  %535 = vrot.lane.b32.xlu0 %v6022_v47, %s5746_s21 }
  0x75   : > { %541 = vrot.lane.b32.xlu1 %v6029_v48, %s5746_s21  ;;  %539 = vrot.lane.b32.xlu0 %v6032_v49, %s5746_s21 }
  0x79   : > { %545 = vrot.lane.b32.xlu1 %v6039_v50, %s5746_s21  ;;  %543 = vrot.lane.b32.xlu0 %v6042_v51, %s5746_s21 }
  0x7d   : > { %549 = vrot.lane.b32.xlu1 %v6049_v52, %s5746_s21  ;;  %547 = vrot.lane.b32.xlu0 %v6052_v53, %s5746_s21 }
  0x81   : > { %553 = vrot.lane.b32.xlu1 %v6059_v54, %s5746_s21  ;;  %551 = vrot.lane.b32.xlu0 %v6062_v55, %s5746_s21 }
  0x85   : > { %557 = vrot.lane.b32.xlu1 %v6075_v59, %s5746_s21  ;;  %555 = vrot.lane.b32.xlu0 %v6078_v60, %s5746_s21  ;;  %v4697_v59 = vld [vmem:[%s5792_s19 + $0x180] sm:$0xff] }
  0x87   : > { %v6096_v56 = vpop.permute.xlu1 %383  ;;  %v6098_v57 = vpop.permute.xlu0 %379 }
  0x89   : > { %561 = vrot.lane.b32.xlu1 %v6091_v1, %s5746_s21  ;;  %559 = vrot.lane.b32.xlu0 %v6094_v3, %s5746_s21 }
  0x8b   : > { %v6110_v62 = vpop.permute.xlu1 %385  ;;  %v6112_v60 = vpop.permute.xlu0 %381 }
  0x8d   : > { %565 = vrot.lane.b32.xlu1 %v6105_v58, %s5746_s21  ;;  %563 = vrot.lane.b32.xlu0 %v6108_v61, %s5746_s21 }
  0x8f   : > { %v6120_v1 = vpop.permute.xlu1 %389  ;;  %v6122_v55 = vpop.permute.xlu0 %387 }
  0x91   : > { %569 = vrot.lane.b32.xlu1 %v4698_v63, %s5746_s21  ;;  %567 = vrot.lane.b32.xlu0 %v4697_v59, %s5746_s21 }
  0x93   : > { %v6126_v3 = vpop.permute.xlu1 %393  ;;  %v6128_v54 = vpop.permute.xlu0 %391 }
  0x95   : > { %637 = vrot.lane.b32.xlu1 %v5802_v2, %s5747_s30  ;;  %635 = vrot.lane.b32.xlu0 %v5795_v0, %s5747_s30 }
  0x97   : > { %v6134_v61 = vpop.permute.xlu1 %397  ;;  %v6136_v58 = vpop.permute.xlu0 %395 }
  0x99   : > { %641 = vrot.lane.b32.xlu1 %v5809_v4, %s5747_s30  ;;  %639 = vrot.lane.b32.xlu0 %v5812_v5, %s5747_s30 }
  0x9b   : > { %v6142_v59 = vpop.permute.xlu1 %401  ;;  %v6144_v63 = vpop.permute.xlu0 %399 }
  0x9d   : > { %645 = vrot.lane.b32.xlu1 %v5819_v6, %s5747_s30  ;;  %643 = vrot.lane.b32.xlu0 %v5822_v7, %s5747_s30 }
  0x9f   : > { %v6150_v53 = vpop.permute.xlu1 %405  ;;  %v6152_v52 = vpop.permute.xlu0 %403 }
  0xa1   : > { %649 = vrot.lane.b32.xlu1 %v5829_v8, %s5747_s30  ;;  %647 = vrot.lane.b32.xlu0 %v5832_v9, %s5747_s30 }
  0xa3   : > { %v6158_v51 = vpop.permute.xlu1 %409  ;;  %v6160_v50 = vpop.permute.xlu0 %407 }
  0xa5   : > { %653 = vrot.lane.b32.xlu1 %v5839_v10, %s5747_s30  ;;  %651 = vrot.lane.b32.xlu0 %v5842_v11, %s5747_s30 }
  0xa7   : > { %v6166_v49 = vpop.permute.xlu1 %413  ;;  %v6168_v48 = vpop.permute.xlu0 %411 }
  0xa8   : > { %8424 = vst [vmem:[#allocation32_spill] sm:$0xff] %v6166_v49  ;;  %8425 = vst [vmem:[#allocation33_spill] sm:$0xff] %v6168_v48 }
  0xa9   : > { %657 = vrot.lane.b32.xlu1 %v5849_v12, %s5747_s30  ;;  %655 = vrot.lane.b32.xlu0 %v5852_v13, %s5747_s30 }
  0xab   : > { %v6174_v47 = vpop.permute.xlu1 %417  ;;  %v6176_v46 = vpop.permute.xlu0 %415 }
  0xac   : > { %8426 = vst [vmem:[#allocation34_spill] sm:$0xff] %v6174_v47  ;;  %8427 = vst [vmem:[#allocation35_spill] sm:$0xff] %v6176_v46  ;;  %v6342_v46 = vld [vmem:[%s5792_s19 + $0x92] sm:$0xff] }
  0xad   : > { %661 = vrot.lane.b32.xlu1 %v5859_v14, %s5747_s30  ;;  %659 = vrot.lane.b32.xlu0 %v5862_v15, %s5747_s30  ;;  %8455 = vst [vmem:[#allocation63_spill] sm:$0xff] %v6342_v46 }
  0xaf   : > { %v6182_v11 = vpop.permute.xlu1 %421  ;;  %v6184_v49 = vpop.permute.xlu0 %419 }
  0xb0   : > { %8428 = vst [vmem:[#allocation36_spill] sm:$0xff] %v6182_v11  ;;  %8429 = vst [vmem:[#allocation37_spill] sm:$0xff] %v6184_v49  ;;  %v6328_v49 = vld [vmem:[%s5792_s19 + $0x7a] sm:$0xff] }
  0xb1   : > { %665 = vrot.lane.b32.xlu1 %v5869_v16, %s5747_s30  ;;  %663 = vrot.lane.b32.xlu0 %v5872_v17, %s5747_s30  ;;  %8451 = vst [vmem:[#allocation59_spill] sm:$0xff] %v6328_v49 }
  0xb3   : > { %v6190_v13 = vpop.permute.xlu1 %425  ;;  %v6192_v47 = vpop.permute.xlu0 %423 }
  0xb4   : > { %8430 = vst [vmem:[#allocation38_spill] sm:$0xff] %v6190_v13  ;;  %8431 = vst [vmem:[#allocation39_spill] sm:$0xff] %v6192_v47  ;;  %v6314_v47 = vld [vmem:[%s5792_s19 + $0x62] sm:$0xff] }
  0xb5   : > { %669 = vrot.lane.b32.xlu1 %v5879_v18, %s5747_s30  ;;  %667 = vrot.lane.b32.xlu0 %v5882_v19, %s5747_s30  ;;  %8449 = vst [vmem:[#allocation57_spill] sm:$0xff] %v6314_v47 }
  0xb7   : > { %v6198_v15 = vpop.permute.xlu1 %429  ;;  %v6200_v11 = vpop.permute.xlu0 %427 }
  0xb8   : > { %8432 = vst [vmem:[#allocation40_spill] sm:$0xff] %v6198_v15  ;;  %8433 = vst [vmem:[#allocation41_spill] sm:$0xff] %v6200_v11  ;;  %v6300_v15 = vld [vmem:[%s5792_s19 + $0x4a] sm:$0xff] }
  0xb9   : > { %673 = vrot.lane.b32.xlu1 %v5889_v20, %s5747_s30  ;;  %671 = vrot.lane.b32.xlu0 %v5892_v21, %s5747_s30  ;;  %v6283_v21 = vld [vmem:[%s5792_s19 + $0x3a] sm:$0xff]  ;;  %8447 = vst [vmem:[#allocation55_spill] sm:$0xff] %v6300_v15 }
  0xba   : > { %8444 = vst [vmem:[#allocation52_spill] sm:$0xff] %v6283_v21 }
  0xbb   : > { %v6206_v17 = vpop.permute.xlu1 %433  ;;  %v6208_v13 = vpop.permute.xlu0 %431 }
  0xbc   : > { %8434 = vst [vmem:[#allocation42_spill] sm:$0xff] %v6206_v17  ;;  %8435 = vst [vmem:[#allocation43_spill] sm:$0xff] %v6208_v13 }
  0xbd   : > { %677 = vrot.lane.b32.xlu1 %v5899_v22, %s5747_s30  ;;  %675 = vrot.lane.b32.xlu0 %v5902_v23, %s5747_s30  ;;  %v6269_v23 = vld [vmem:[%s5792_s19 + $0x22] sm:$0xff]  ;;  %v6272_v22 = vld [vmem:[%s5792_s19 + $0x1a] sm:$0xff] }
  0xbe   : > { %8442 = vst [vmem:[#allocation50_spill] sm:$0xff] %v6269_v23  ;;  %8443 = vst [vmem:[#allocation51_spill] sm:$0xff] %v6272_v22 }
  0xbf   : > { %v6214_v19 = vpop.permute.xlu1 %437  ;;  %v6216_v11 = vpop.permute.xlu0 %435 }
  0xc0   : > { %8436 = vst [vmem:[#allocation44_spill] sm:$0xff] %v6214_v19  ;;  %8437 = vst [vmem:[#allocation45_spill] sm:$0xff] %v6216_v11 }
  0xc1   : > { %681 = vrot.lane.b32.xlu1 %v5909_v24, %s5747_s30  ;;  %679 = vrot.lane.b32.xlu0 %v5912_v25, %s5747_s30 }
  0xc3   : > { %v6222_v17 = vpop.permute.xlu1 %441  ;;  %v6224_v13 = vpop.permute.xlu0 %439 }
  0xc4   : > { %8438 = vst [vmem:[#allocation46_spill] sm:$0xff] %v6222_v17  ;;  %8439 = vst [vmem:[#allocation47_spill] sm:$0xff] %v6224_v13  ;;  %v1328_v13 = vld [vmem:[%s5792_s19 + $0x2] sm:$0xff] }
  0xc5   : > { %685 = vrot.lane.b32.xlu1 %v5919_v26, %s5747_s30  ;;  %683 = vrot.lane.b32.xlu0 %v5922_v27, %s5747_s30  ;;  %v6247_v26 = vld [vmem:[%s5792_s19 + $0x189] sm:$0xff]  ;;  %v6250_v27 = vld [vmem:[%s5792_s19 + $0x181] sm:$0xff] }
  0xc6   : > { %8440 = vst [vmem:[#allocation48_spill] sm:$0xff] %v6247_v26  ;;  %8441 = vst [vmem:[#allocation49_spill] sm:$0xff] %v6250_v27 }
  0xc7   : > { %v6230_v11 = vpop.permute.xlu1 %509  ;;  %v6232_v19 = vpop.permute.xlu0 %507 }
  0xc9   : > { %689 = vrot.lane.b32.xlu1 %v5929_v28, %s5747_s30  ;;  %687 = vrot.lane.b32.xlu0 %v5932_v29, %s5747_s30 }
  0xcb   : > { %v6238_v24 = vpop.permute.xlu1 %513  ;;  %v6240_v25 = vpop.permute.xlu0 %511 }
  0xcd   : > { %693 = vrot.lane.b32.xlu1 %v5939_v30, %s5747_s30  ;;  %691 = vrot.lane.b32.xlu0 %v5942_v31, %s5747_s30  ;;  %v1329_v30 = vld [vmem:[%s5792_s19 + $0xa] sm:$0xff] }
  0xcf   : > { %v6252_v28 = vpop.permute.xlu1 %517  ;;  %v6254_v29 = vpop.permute.xlu0 %515 }
  0xd1   : > { %697 = vrot.lane.b32.xlu1 %v6247_v26, %s5747_s30  ;;  %695 = vrot.lane.b32.xlu0 %v6250_v27, %s5747_s30 }
  0xd3   : > { %v6262_v17 = vpop.permute.xlu1 %521  ;;  %v6264_v31 = vpop.permute.xlu0 %519 }
  0xd5   : > { %1458 = vrot.lane.b32.xlu1 %v1329_v30, %s5745_s20  ;;  %1456 = vrot.lane.b32.xlu0 %v1328_v13, %s5745_s20  ;;  %v6286_v30 = vld [vmem:[%s5792_s19 + $0x32] sm:$0xff] }
  0xd6   : > { %8445 = vst [vmem:[#allocation53_spill] sm:$0xff] %v6286_v30 }
  0xd7   : > { %v6274_v26 = vpop.permute.xlu1 %525  ;;  %v6276_v27 = vpop.permute.xlu0 %523 }
  0xd9   : > { %1462 = vrot.lane.b32.xlu1 %v6269_v23, %s5745_s20  ;;  %1460 = vrot.lane.b32.xlu0 %v6272_v22, %s5745_s20  ;;  %v6297_v23 = vld [vmem:[%s5792_s19 + $0x52] sm:$0xff] }
  0xda   : > { %8446 = vst [vmem:[#allocation54_spill] sm:$0xff] %v6297_v23 }
  0xdb   : > { %v6288_v13 = vpop.permute.xlu1 %529  ;;  %v6290_v20 = vpop.permute.xlu0 %527 }
  0xdd   : > { %1466 = vrot.lane.b32.xlu1 %v6283_v21, %s5745_s20  ;;  %1464 = vrot.lane.b32.xlu0 %v6286_v30, %s5745_s20  ;;  %v6311_v21 = vld [vmem:[%s5792_s19 + $0x6a] sm:$0xff] }
  0xde   : > { %8448 = vst [vmem:[#allocation56_spill] sm:$0xff] %v6311_v21 }
  0xdf   : > { %v6302_v22 = vpop.permute.xlu1 %533  ;;  %v6304_v18 = vpop.permute.xlu0 %531 }
  0xe1   : > { %1470 = vrot.lane.b32.xlu1 %v6297_v23, %s5745_s20  ;;  %1468 = vrot.lane.b32.xlu0 %v6300_v15, %s5745_s20  ;;  %v6325_v23 = vld [vmem:[%s5792_s19 + $0x82] sm:$0xff] }
  0xe2   : > { %8450 = vst [vmem:[#allocation58_spill] sm:$0xff] %v6325_v23 }
  0xe3   : > { %v6316_v30 = vpop.permute.xlu1 %537  ;;  %v6318_v16 = vpop.permute.xlu0 %535 }
  0xe5   : > { %1474 = vrot.lane.b32.xlu1 %v6311_v21, %s5745_s20  ;;  %1472 = vrot.lane.b32.xlu0 %v6314_v47, %s5745_s20  ;;  %v6339_v21 = vld [vmem:[%s5792_s19 + $0x9a] sm:$0xff] }
  0xe6   : > { %8454 = vst [vmem:[#allocation62_spill] sm:$0xff] %v6339_v21 }
  0xe7   : > { %v6330_v15 = vpop.permute.xlu1 %541  ;;  %v6332_v14 = vpop.permute.xlu0 %539 }
  0xe8   : > { %8452 = vst [vmem:[#allocation60_spill] sm:$0xff] %v6330_v15  ;;  %8453 = vst [vmem:[#allocation61_spill] sm:$0xff] %v6332_v14  ;;  %v6356_v14 = vld [vmem:[%s5792_s19 + $0xaa] sm:$0xff] }
  0xe9   : > { %1478 = vrot.lane.b32.xlu1 %v6325_v23, %s5745_s20  ;;  %1476 = vrot.lane.b32.xlu0 %v6328_v49, %s5745_s20  ;;  %v6353_v23 = vld [vmem:[%s5792_s19 + $0xb2] sm:$0xff]  ;;  %8459 = vst [vmem:[#allocation67_spill] sm:$0xff] %v6356_v14 }
  0xea   : > { %8458 = vst [vmem:[#allocation66_spill] sm:$0xff] %v6353_v23 }
  0xeb   : > { %v6344_v47 = vpop.permute.xlu1 %545  ;;  %v6346_v12 = vpop.permute.xlu0 %543 }
  0xec   : > { %8456 = vst [vmem:[#allocation64_spill] sm:$0xff] %v6344_v47  ;;  %8457 = vst [vmem:[#allocation65_spill] sm:$0xff] %v6346_v12  ;;  %v6370_v12 = vld [vmem:[%s5792_s19 + $0xc2] sm:$0xff] }
  0xed   : > { %1482 = vrot.lane.b32.xlu1 %v6339_v21, %s5745_s20  ;;  %1480 = vrot.lane.b32.xlu0 %v6342_v46, %s5745_s20  ;;  %v6367_v21 = vld [vmem:[%s5792_s19 + $0xca] sm:$0xff]  ;;  %8463 = vst [vmem:[#allocation71_spill] sm:$0xff] %v6370_v12 }
  0xee   : > { %8462 = vst [vmem:[#allocation70_spill] sm:$0xff] %v6367_v21 }
  0xef   : > { %v6358_v49 = vpop.permute.xlu1 %549  ;;  %v6360_v15 = vpop.permute.xlu0 %547 }
  0xf0   : > { %8460 = vst [vmem:[#allocation68_spill] sm:$0xff] %v6358_v49  ;;  %8461 = vst [vmem:[#allocation69_spill] sm:$0xff] %v6360_v15  ;;  %v6384_v15 = vld [vmem:[%s5792_s19 + $0xda] sm:$0xff] }
  0xf1   : > { %1486 = vrot.lane.b32.xlu1 %v6353_v23, %s5745_s20  ;;  %1484 = vrot.lane.b32.xlu0 %v6356_v14, %s5745_s20  ;;  %v6381_v23 = vld [vmem:[%s5792_s19 + $0xe2] sm:$0xff]  ;;  %8467 = vst [vmem:[#allocation75_spill] sm:$0xff] %v6384_v15 }
  0xf2   : > { %8466 = vst [vmem:[#allocation74_spill] sm:$0xff] %v6381_v23 }
  0xf3   : > { %v6372_v46 = vpop.permute.xlu1 %553  ;;  %v6374_v47 = vpop.permute.xlu0 %551 }
  0xf4   : > { %8464 = vst [vmem:[#allocation72_spill] sm:$0xff] %v6372_v46  ;;  %8465 = vst [vmem:[#allocation73_spill] sm:$0xff] %v6374_v47 }
  0xf5   : > { %1490 = vrot.lane.b32.xlu1 %v6367_v21, %s5745_s20  ;;  %1488 = vrot.lane.b32.xlu0 %v6370_v12, %s5745_s20  ;;  %v6395_v21 = vld [vmem:[%s5792_s19 + $0xfa] sm:$0xff]  ;;  %v6398_v12 = vld [vmem:[%s5792_s19 + $0xf2] sm:$0xff] }
  0xf6   : > { %8470 = vst [vmem:[#allocation78_spill] sm:$0xff] %v6395_v21  ;;  %8471 = vst [vmem:[#allocation79_spill] sm:$0xff] %v6398_v12 }
  0xf7   : > { %v6386_v14 = vpop.permute.xlu1 %557  ;;  %v6388_v49 = vpop.permute.xlu0 %555 }
  0xf8   : > { %8468 = vst [vmem:[#allocation76_spill] sm:$0xff] %v6386_v14  ;;  %8469 = vst [vmem:[#allocation77_spill] sm:$0xff] %v6388_v49  ;;  %v6412_v49 = vld [vmem:[%s5792_s19 + $0x10a] sm:$0xff] }
  0xf9   : > { %1494 = vrot.lane.b32.xlu1 %v6381_v23, %s5745_s20  ;;  %1492 = vrot.lane.b32.xlu0 %v6384_v15, %s5745_s20  ;;  %v6409_v23 = vld [vmem:[%s5792_s19 + $0x112] sm:$0xff]  ;;  %8475 = vst [vmem:[#allocation83_spill] sm:$0xff] %v6412_v49 }
  0xfa   : > { %8474 = vst [vmem:[#allocation82_spill] sm:$0xff] %v6409_v23 }
  0xfb   : > { %v6400_v47 = vpop.permute.xlu1 %561  ;;  %v6402_v46 = vpop.permute.xlu0 %559 }
  0xfc   : > { %8472 = vst [vmem:[#allocation80_spill] sm:$0xff] %v6400_v47  ;;  %8473 = vst [vmem:[#allocation81_spill] sm:$0xff] %v6402_v46  ;;  %v6426_v46 = vld [vmem:[%s5792_s19 + $0x122] sm:$0xff] }
  0xfd   : > { %1498 = vrot.lane.b32.xlu1 %v6395_v21, %s5745_s20  ;;  %1496 = vrot.lane.b32.xlu0 %v6398_v12, %s5745_s20  ;;  %v6423_v21 = vld [vmem:[%s5792_s19 + $0x12a] sm:$0xff]  ;;  %8479 = vst [vmem:[#allocation87_spill] sm:$0xff] %v6426_v46  ;;  %v216_v12 = vld [vmem:[%s5792_s19] sm:$0xff] }
  0xfe   : > { %8478 = vst [vmem:[#allocation86_spill] sm:$0xff] %v6423_v21  ;;  %v217_v47 = vld [vmem:[%s5792_s19 + $0x8] sm:$0xff] }
  0xff   : > { %v6414_v15 = vpop.permute.xlu1 %565  ;;  %v6416_v14 = vpop.permute.xlu0 %563 }
 0x100   : > { %8476 = vst [vmem:[#allocation84_spill] sm:$0xff] %v6414_v15  ;;  %8477 = vst [vmem:[#allocation85_spill] sm:$0xff] %v6416_v14  ;;  %v6443_v14 = vld [vmem:[%s5792_s19 + $0x142] sm:$0xff] }
 0x101   : > { %1502 = vrot.lane.b32.xlu1 %v6409_v23, %s5745_s20  ;;  %1500 = vrot.lane.b32.xlu0 %v6412_v49, %s5745_s20  ;;  %v732_v49 = vsel %vm731_vm0, %v216_v12, %v6098_v57  ;;  %v733_v23 = vsel %vm731_vm0, %v217_v47, %v6112_v60  ;;  %v736_v60 = vsel %vm731_vm0, %v5962_v35, %v6122_v55 }
 0x102   : > { %v739_v55 = vsel %vm731_vm0, %v5969_v36, %v6126_v3 }
 0x103   : > { %v6430_v48 = vpop.permute.xlu1 %569  ;;  %v6432_v15 = vpop.permute.xlu0 %567 }
 0x104   : > { %8480 = vst [vmem:[#allocation88_spill] sm:$0xff] %v6430_v48  ;;  %8481 = vst [vmem:[#allocation89_spill] sm:$0xff] %v6432_v15  ;;  %v6446_v48 = vld [vmem:[%s5792_s19 + $0x13a] sm:$0xff]  ;;  %v766_v15 = vsel %vm764_vm1, %v733_v23, %v6230_v11  ;;  %v734_v11 = vsel %vm731_vm0, %v5952_v33, %v6096_v56  ;;  %v6490_v56 = vld [vmem:[%s5792_s19 + $0x172] sm:$0xff] }
 0x105   : > { %1506 = vrot.lane.b32.xlu1 %v6423_v21, %s5745_s20  ;;  %1504 = vrot.lane.b32.xlu0 %v6426_v46, %s5745_s20  ;;  %v765_v21 = vsel %vm764_vm1, %v732_v49, %v6232_v19  ;;  %v735_v19 = vsel %vm731_vm0, %v5949_v32, %v6110_v62  ;;  %v767_v23 = vsel %vm764_vm1, %v734_v11, %v6240_v25  ;;  %v6493_v62 = vld [vmem:[%s5792_s19 + $0x16a] sm:$0xff] }
 0x106   : > { %v737_v49 = vsel %vm731_vm0, %v5959_v34, %v6120_v1  ;;  %v769_v25 = vsel %vm764_vm1, %v736_v60, %v6254_v29  ;;  %v772_v29 = vsel %vm764_vm1, %v739_v55, %v6262_v17  ;;  %v741_v17 = vsel %vm731_vm0, %v5979_v38, %v6134_v61  ;;  %v8492_v55 = vld [vmem:[#allocation34_spill] sm:$0xff] }
 0x107   : > { %v638_v46 = vpop.permute.xlu1 %637  ;;  %v636_v10 = vpop.permute.xlu0 %635 }
 0x108   : > { %v799_v12 = vsel %vm797_vm2, %v766_v15, %v638_v46  ;;  %v798_v57 = vsel %vm797_vm2, %v765_v21, %v636_v10  ;;  %v6466_v15 = vld [vmem:[%s5792_s19 + $0x15a] sm:$0xff]  ;;  %v6469_v10 = vld [vmem:[%s5792_s19 + $0x152] sm:$0xff]  ;;  %v768_v21 = vsel %vm764_vm1, %v735_v19, %v6238_v24  ;;  %v770_v24 = vsel %vm764_vm1, %v737_v49, %v6252_v28 }
 0x109   : > { %1510 = vrot.lane.b32.xlu1 %v6443_v14, %s5745_s20  ;;  %1508 = vrot.lane.b32.xlu0 %v6446_v48, %s5745_s20  ;;  %v738_v28 = vsel %vm731_vm0, %v5972_v37, %v6128_v54  ;;  %v740_v37 = vsel %vm731_vm0, %v5982_v39, %v6136_v58  ;;  %v774_v54 = vsel %vm764_vm1, %v741_v17, %v6274_v26  ;;  %v8489_v49 = vld [vmem:[#allocation61_spill] sm:$0xff] }
 0x10a   : > { %5442 = vmatprep.mubr.msk.f32.mxu0 %vm834_vm3, %v798_v57  ;;  %v771_v57 = vsel %vm764_vm1, %v738_v28, %v6264_v31  ;;  %v773_v3 = vsel %vm764_vm1, %v740_v37, %v6276_v27  ;;  %v743_v39 = vsel %vm731_vm0, %v5989_v40, %v6142_v59  ;;  %v742_v58 = vsel %vm731_vm0, %v5992_v41, %v6144_v63  ;;  %v8493_v28 = vld [vmem:[#allocation18_spill] sm:$0xff]  ;;  %v8497_v17 = vld [vmem:[#allocation65_spill] sm:$0xff] }
 0x10b   : > { %5443 = vmatmul.mubr.msk.f32.vlgmr.msra.gmra.mrb[0].mxu0 %vm834_vm3, %v799_v12  ;;  %v642_v33 = vpop.permute.xlu1 %641  ;;  %v640_v46 = vpop.permute.xlu0 %639  ;;  %v776_v61 = vsel %vm764_vm1, %v743_v39, %v6288_v13  ;;  %v775_v26 = vsel %vm764_vm1, %v742_v58, %v6290_v20  ;;  %v745_v41 = vsel %vm731_vm0, %v5999_v42, %v6150_v53  ;;  %v744_v20 = vsel %vm731_vm0, %v6002_v43, %v6152_v52  ;;  %v8500_v39 = vld [vmem:[#allocation36_spill] sm:$0xff] }
 0x10c   : > { %v801_v32 = vsel %vm797_vm2, %v768_v21, %v642_v33  ;;  %v800_v47 = vsel %vm797_vm2, %v767_v23, %v640_v46  ;;  %v778_v59 = vsel %vm764_vm1, %v745_v41, %v6302_v22  ;;  %v777_v63 = vsel %vm764_vm1, %v744_v20, %v6304_v18  ;;  %v8485_v23 = vld [vmem:[#allocation16_spill] sm:$0xff]  ;;  %v8486_v33 = vld [vmem:[#allocation33_spill] sm:$0xff] }
 0x10d   : > { %1514 = vrot.lane.b32.xlu1 %v6466_v15, %s5745_s20  ;;  %1512 = vrot.lane.b32.xlu0 %v6469_v10, %s5745_s20  ;;  %v747_v22 = vsel %vm731_vm0, %v6009_v44, %v6158_v51  ;;  %v746_v18 = vsel %vm731_vm0, %v6012_v45, %v6160_v50  ;;  %v8482_v51 = vld [vmem:[#allocation2_spill] sm:$0xff]  ;;  %v8483_v45 = vld [vmem:[#allocation3_spill] sm:$0xff]  ;;  %v8484_v50 = vld [vmem:[#allocation32_spill] sm:$0xff] }
 0x10e   : > { %5445 = vmatprep.mubr.msk.f32.mxu0 %vm834_vm3, %v800_v47  ;;  %v780_v43 = vsel %vm764_vm1, %v747_v22, %v6316_v30  ;;  %v779_v52 = vsel %vm764_vm1, %v746_v18, %v6318_v16  ;;  %v749_v30 = vsel %vm731_vm0, %v8485_v23, %v8484_v50  ;;  %v8487_v16 = vld [vmem:[#allocation17_spill] sm:$0xff]  ;;  %v8501_v58 = vld [vmem:[#allocation20_spill] sm:$0xff]  ;;  %v8508_v22 = vld [vmem:[#allocation38_spill] sm:$0xff] }
 0x10f   : > { %5446 = vmatmul.mubr.msk.f32.gmra.mrb[2].mxu0 %vm834_vm3, %v801_v32  ;;  %v646_v12 = vpop.permute.xlu1 %645  ;;  %v644_v34 = vpop.permute.xlu0 %643  ;;  %v748_v46 = vsel %vm731_vm0, %v8487_v16, %v8486_v33  ;;  %v8488_v32 = vld [vmem:[#allocation60_spill] sm:$0xff]  ;;  %v8505_v41 = vld [vmem:[#allocation69_spill] sm:$0xff]  ;;  %v8509_v18 = vld [vmem:[#allocation22_spill] sm:$0xff] }
 0x110   : > { %v803_v1 = vsel %vm797_vm2, %v770_v24, %v646_v12  ;;  %v802_v35 = vsel %vm797_vm2, %v769_v25, %v644_v34  ;;  %v782_v47 = vsel %vm764_vm1, %v749_v30, %v8488_v32  ;;  %v781_v60 = vsel %vm764_vm1, %v748_v46, %v8489_v49  ;;  %v8514_v16 = vld [vmem:[#allocation10_spill] sm:$0xff]  ;;  %v8515_v46 = vld [vmem:[#allocation11_spill] sm:$0xff]  ;;  %v8516_v32 = vld [vmem:[#allocation40_spill] sm:$0xff] }
 0x111   : > { %1518 = vrot.lane.b32.xlu1 %v6490_v56, %s5745_s20  ;;  %1516 = vrot.lane.b32.xlu0 %v6493_v62, %s5745_s20 }
 0x112   : > { %5448 = vmatprep.mubr.msk.f32.mxu0 %vm834_vm3, %v802_v35  ;;  %v8491_v35 = vld [vmem:[#allocation5_spill] sm:$0xff] }
 0x113   : > { %5449 = vmatmul.mubr.msk.f32.gmra.mrb[4].mxu0 %vm834_vm3, %v803_v1  ;;  %v650_v11 = vpop.permute.xlu1 %649  ;;  %v648_v19 = vpop.permute.xlu0 %647  ;;  %v8490_v1 = vld [vmem:[#allocation4_spill] sm:$0xff] }
 0x114   : > { %v805_v21 = vsel %vm797_vm2, %v772_v29, %v650_v11  ;;  %v804_v36 = vsel %vm797_vm2, %v771_v57, %v648_v19  ;;  %v751_v29 = vsel %vm731_vm0, %v8493_v28, %v8492_v55  ;;  %v8494_v57 = vld [vmem:[#allocation35_spill] sm:$0xff] }
 0x115   : > { %1586 = vrot.lane.b32.xlu1 %v5802_v2, %s5746_s21  ;;  %1584 = vrot.lane.b32.xlu0 %v5795_v0, %s5746_s21  ;;  %v8495_v11 = vld [vmem:[#allocation19_spill] sm:$0xff] }
 0x116   : > { %5451 = vmatprep.mubr.msk.f32.mxu0 %vm834_vm3, %v804_v36  ;;  %v750_v19 = vsel %vm731_vm0, %v8495_v11, %v8494_v57  ;;  %v8522_v11 = vld [vmem:[#allocation12_spill] sm:$0xff] }
 0x117   : > { %5452 = vmatmul.mubr.msk.f32.gmra.mrb[6].mxu0 %vm834_vm3, %v805_v21  ;;  %v654_v2 = vpop.permute.xlu1 %653  ;;  %v652_v0 = vpop.permute.xlu0 %651  ;;  %v8496_v21 = vld [vmem:[#allocation64_spill] sm:$0xff]  ;;  %v783_v37 = vsel %vm764_vm1, %v750_v19, %v8497_v17  ;;  %v8523_v19 = vld [vmem:[#allocation13_spill] sm:$0xff] }
 0x118   : > { %v807_v31 = vsel %vm797_vm2, %v774_v54, %v654_v2  ;;  %v806_v38 = vsel %vm797_vm2, %v773_v3, %v652_v0  ;;  %v784_v36 = vsel %vm764_vm1, %v751_v29, %v8496_v21  ;;  %v8524_v21 = vld [vmem:[#allocation42_spill] sm:$0xff] }
 0x119   : > { %1590 = vrot.lane.b32.xlu1 %v5809_v4, %s5746_s21  ;;  %1588 = vrot.lane.b32.xlu0 %v5812_v5, %s5746_s21 }
 0x11a   : > { %5454 = vmatprep.mubr.msk.f32.mxu0 %vm834_vm3, %v806_v38  ;;  %v8499_v38 = vld [vmem:[#allocation7_spill] sm:$0xff] }
 0x11b   : > { %5455 = vmatmul.mubr.msk.f32.gmra.mrb[8].mxu0 %vm834_vm3, %v807_v31  ;;  %v658_v4 = vpop.permute.xlu1 %657  ;;  %v656_v5 = vpop.permute.xlu0 %655  ;;  %v8498_v31 = vld [vmem:[#allocation6_spill] sm:$0xff] }
 0x11c   : > { %v809_v27 = vsel %vm797_vm2, %v776_v61, %v658_v4  ;;  %v808_v40 = vsel %vm797_vm2, %v775_v26, %v656_v5  ;;  %v753_v61 = vsel %vm731_vm0, %v8501_v58, %v8500_v39  ;;  %v8502_v26 = vld [vmem:[#allocation37_spill] sm:$0xff] }
 0x11d   : > { %1594 = vrot.lane.b32.xlu1 %v5819_v6, %s5746_s21  ;;  %1592 = vrot.lane.b32.xlu0 %v5822_v7, %s5746_s21  ;;  %v8503_v4 = vld [vmem:[#allocation21_spill] sm:$0xff] }
 0x11e   : > { %5457 = vmatprep.mubr.msk.f32.mxu0 %vm834_vm3, %v808_v40  ;;  %v752_v5 = vsel %vm731_vm0, %v8503_v4, %v8502_v26  ;;  %v8530_v4 = vld [vmem:[#allocation14_spill] sm:$0xff] }
 0x11f   : > { %5458 = vmatmul.mubr.msk.f32.gmra.mrb[10].mxu0 %vm834_vm3, %v809_v27  ;;  %v662_v6 = vpop.permute.xlu1 %661  ;;  %v660_v7 = vpop.permute.xlu0 %659  ;;  %v8504_v27 = vld [vmem:[#allocation68_spill] sm:$0xff]  ;;  %v785_v20 = vsel %vm764_vm1, %v752_v5, %v8505_v41  ;;  %v8531_v5 = vld [vmem:[#allocation15_spill] sm:$0xff] }
 0x120   : > { %v811_v13 = vsel %vm797_vm2, %v778_v59, %v662_v6  ;;  %v810_v42 = vsel %vm797_vm2, %v777_v63, %v660_v7  ;;  %v786_v40 = vsel %vm764_vm1, %v753_v61, %v8504_v27  ;;  %v8532_v27 = vld [vmem:[#allocation44_spill] sm:$0xff] }
 0x121   : > { %1598 = vrot.lane.b32.xlu1 %v5829_v8, %s5746_s21  ;;  %1596 = vrot.lane.b32.xlu0 %v5832_v9, %s5746_s21 }
 0x122   : > { %5460 = vmatprep.mubr.msk.f32.mxu0 %vm834_vm3, %v810_v42  ;;  %v8507_v42 = vld [vmem:[#allocation9_spill] sm:$0xff] }
 0x123   : > { %5461 = vmatmul.mubr.msk.f32.gmra.mrb[12].mxu0 %vm834_vm3, %v811_v13  ;;  %v666_v8 = vpop.permute.xlu1 %665  ;;  %v664_v9 = vpop.permute.xlu0 %663  ;;  %v8506_v13 = vld [vmem:[#allocation8_spill] sm:$0xff] }
 0x124   : > { %v813_v53 = vsel %vm797_vm2, %v780_v43, %v666_v8  ;;  %v812_v44 = vsel %vm797_vm2, %v779_v52, %v664_v9  ;;  %v755_v43 = vsel %vm731_vm0, %v8509_v18, %v8508_v22  ;;  %v8510_v52 = vld [vmem:[#allocation39_spill] sm:$0xff]  ;;  %v8539_v22 = vld [vmem:[#allocation85_spill] sm:$0xff] }
 0x125   : > { %1602 = vrot.lane.b32.xlu1 %v8482_v51, %s5746_s21  ;;  %1600 = vrot.lane.b32.xlu0 %v8483_v45, %s5746_s21  ;;  %v8511_v8 = vld [vmem:[#allocation23_spill] sm:$0xff]  ;;  %v8513_v51 = vld [vmem:[#allocation73_spill] sm:$0xff] }
 0x126   : > { %5463 = vmatprep.mubr.msk.f32.mxu0 %vm834_vm3, %v812_v44  ;;  %v754_v9 = vsel %vm731_vm0, %v8511_v8, %v8510_v52 }
 0x127   : > { %5464 = vmatmul.mubr.msk.f32.gmra.mrb[14].mxu0 %vm834_vm3, %v813_v53  ;;  %v670_v24 = vpop.permute.xlu1 %669  ;;  %v668_v25 = vpop.permute.xlu0 %667  ;;  %v8512_v53 = vld [vmem:[#allocation72_spill] sm:$0xff]  ;;  %v787_v45 = vsel %vm764_vm1, %v754_v9, %v8513_v51 }
 0x128   : > { %v815_v12 = vsel %vm797_vm2, %v782_v47, %v670_v24  ;;  %v814_v34 = vsel %vm797_vm2, %v781_v60, %v668_v25  ;;  %v788_v44 = vsel %vm764_vm1, %v755_v43, %v8512_v53  ;;  %v8517_v47 = vld [vmem:[#allocation24_spill] sm:$0xff]  ;;  %v8518_v60 = vld [vmem:[#allocation41_spill] sm:$0xff]  ;;  %v4827_v53 = vld [vmem:[%s8326_s1 + $0x20] sm:$0xff] }
 0x129   : > { %1606 = vrot.lane.b32.xlu1 %v8490_v1, %s5746_s21  ;;  %1604 = vrot.lane.b32.xlu0 %v8491_v35, %s5746_s21  ;;  %v757_v49 = vsel %vm731_vm0, %v8517_v47, %v8516_v32  ;;  %v8519_v24 = vld [vmem:[#allocation25_spill] sm:$0xff]  ;;  %v8546_v47 = vld [vmem:[#allocation88_spill] sm:$0xff] }
 0x12a   : > { %5466 = vmatprep.mubr.msk.f32.mxu0 %vm834_vm3, %v814_v34  ;;  %v756_v25 = vsel %vm731_vm0, %v8519_v24, %v8518_v60  ;;  %v8521_v1 = vld [vmem:[#allocation77_spill] sm:$0xff] }
 0x12b   : > { %5467 = vmatmul.mubr.msk.f32.gmra.mrb[16].mxu0 %vm834_vm3, %v815_v12  ;;  %v674_v54 = vpop.permute.xlu1 %673  ;;  %v672_v3 = vpop.permute.xlu0 %671  ;;  %v8520_v12 = vld [vmem:[#allocation76_spill] sm:$0xff]  ;;  %v789_v35 = vsel %vm764_vm1, %v756_v25, %v8521_v1  ;;  %v6745_v32 = vld [vmem:[%s5792_s19 + $0x139] sm:$0xff] }
 0x12c   : > { %v817_v2 = vsel %vm797_vm2, %v784_v36, %v674_v54  ;;  %v816_v0 = vsel %vm797_vm2, %v783_v37, %v672_v3  ;;  %v790_v34 = vsel %vm764_vm1, %v757_v49, %v8520_v12  ;;  %v8525_v36 = vld [vmem:[#allocation26_spill] sm:$0xff]  ;;  %v8526_v37 = vld [vmem:[#allocation43_spill] sm:$0xff]  ;;  %8545 = vst [vmem:[#allocation16_spill] sm:$0xff] %v6745_v32  ;;  %v8547_v60 = vld [vmem:[#allocation89_spill] sm:$0xff] }
 0x12d   : > { %1610 = vrot.lane.b32.xlu1 %v8498_v31, %s5746_s21  ;;  %1608 = vrot.lane.b32.xlu0 %v8499_v38, %s5746_s21  ;;  %v759_v17 = vsel %vm731_vm0, %v8525_v36, %v8524_v21  ;;  %v8527_v54 = vld [vmem:[#allocation27_spill] sm:$0xff]  ;;  %v8529_v31 = vld [vmem:[#allocation81_spill] sm:$0xff] }
 0x12e   : > { %5469 = vmatprep.mubr.msk.f32.mxu0 %vm834_vm3, %v816_v0  ;;  %v758_v3 = vsel %vm731_vm0, %v8527_v54, %v8526_v37  ;;  %v6781_v21 = vld [vmem:[%s5792_s19 + $0x171] sm:$0xff]  ;;  %v6784_v36 = vld [vmem:[%s5792_s19 + $0x169] sm:$0xff] }
 0x12f   : > { %5470 = vmatmul.mubr.msk.f32.gmra.mrb[18].mxu0 %vm834_vm3, %v817_v2  ;;  %v678_v59 = vpop.permute.xlu1 %677  ;;  %v676_v63 = vpop.permute.xlu0 %675  ;;  %v8528_v2 = vld [vmem:[#allocation80_spill] sm:$0xff]  ;;  %v791_v38 = vsel %vm764_vm1, %v758_v3, %v8529_v31  ;;  %8550 = vst [vmem:[#allocation60_spill] sm:$0xff] %v6781_v21  ;;  %8551 = vst [vmem:[#allocation61_spill] sm:$0xff] %v6784_v36 }
 0x130   : > { %v819_v6 = vsel %vm797_vm2, %v786_v40, %v678_v59  ;;  %v818_v7 = vsel %vm797_vm2, %v785_v20, %v676_v63  ;;  %v792_v0 = vsel %vm764_vm1, %v759_v17, %v8528_v2  ;;  %v8533_v40 = vld [vmem:[#allocation28_spill] sm:$0xff]  ;;  %v8534_v20 = vld [vmem:[#allocation45_spill] sm:$0xff] }
 0x131   : > { %1614 = vrot.lane.b32.xlu1 %v8506_v13, %s5746_s21  ;;  %1612 = vrot.lane.b32.xlu0 %v8507_v42, %s5746_s21  ;;  %v761_v41 = vsel %vm731_vm0, %v8533_v40, %v8532_v27  ;;  %v8535_v59 = vld [vmem:[#allocation29_spill] sm:$0xff]  ;;  %v8538_v13 = vld [vmem:[#allocation84_spill] sm:$0xff] }
 0x132   : > { %5472 = vmatprep.mubr.msk.f32.mxu0 %vm834_vm3, %v818_v7  ;;  %v760_v63 = vsel %vm731_vm0, %v8535_v59, %v8534_v20  ;;  %v6715_v7 = vld [vmem:[%s5792_s19 + $0x121] sm:$0xff]  ;;  %v794_v42 = vsel %vm764_vm1, %v761_v41, %v8538_v13  ;;  %v8552_v2 = vld [vmem:[#allocation48_spill] sm:$0xff] }
 0x133   : > { %5473 = vmatmul.mubr.msk.f32.gmra.mrb[20].mxu0 %vm834_vm3, %v819_v6  ;;  %v682_v50 = vpop.permute.xlu1 %681  ;;  %v680_v23 = vpop.permute.xlu0 %679  ;;  %v6712_v6 = vld [vmem:[%s5792_s19 + $0x129] sm:$0xff]  ;;  %8537 = vst [vmem:[#allocation3_spill] sm:$0xff] %v6715_v7  ;;  %v793_v18 = vsel %vm764_vm1, %v760_v63, %v8539_v22  ;;  %v8558_v41 = vld [vmem:[#allocation54_spill] sm:$0xff] }
 0x134   : > { %v821_v30 = vsel %vm797_vm2, %v788_v44, %v682_v50  ;;  %v820_v33 = vsel %vm797_vm2, %v787_v45, %v680_v23  ;;  %8536 = vst [vmem:[#allocation2_spill] sm:$0xff] %v6712_v6  ;;  %v4828_v44 = vld [vmem:[%s8326_s1 + $0x28] sm:$0xff]  ;;  %v8540_v45 = vld [vmem:[#allocation46_spill] sm:$0xff]  ;;  %v8560_v13 = vld [vmem:[#allocation56_spill] sm:$0xff] }
 0x135   : > { %1618 = vrot.lane.b32.xlu1 %v8514_v16, %s5746_s21  ;;  %1616 = vrot.lane.b32.xlu0 %v8515_v46, %s5746_s21  ;;  %v5666_v51 = vpack.c.bf16 %v4828_v44, %v4827_v53  ;;  %v8541_v50 = vld [vmem:[#allocation30_spill] sm:$0xff]  ;;  %v8559_v20 = vld [vmem:[#allocation55_spill] sm:$0xff] }
 0x136   : > { %5475 = vmatprep.mubr.msk.f32.mxu0 %vm834_vm3, %v820_v33  ;;  %v763_v23 = vsel %vm731_vm0, %v8541_v50, %v8540_v45  ;;  %v8543_v33 = vld [vmem:[#allocation31_spill] sm:$0xff]  ;;  %v8564_v53 = vld [vmem:[#allocation62_spill] sm:$0xff] }
 0x137   : > { %5476 = vmatmul.mubr.msk.f32.gmra.mrb[22].mxu0 %vm834_vm3, %v821_v30  ;;  %v686_v55 = vpop.permute.xlu1 %685  ;;  %v684_v28 = vpop.permute.xlu0 %683  ;;  %v8542_v30 = vld [vmem:[#allocation47_spill] sm:$0xff]  ;;  %v796_v49 = vsel %vm764_vm1, %v763_v23, %v8546_v47  ;;  %5667 = vmatprep.subr.bf16.mxu1 %v5666_v51  ;;  %v8567_v50 = vld [vmem:[#allocation66_spill] sm:$0xff] }
 0x138   : > { %v823_v29 = vsel %vm797_vm2, %v790_v34, %v686_v55  ;;  %v822_v57 = vsel %vm797_vm2, %v789_v35, %v684_v28  ;;  %v762_v16 = vsel %vm731_vm0, %v8543_v33, %v8542_v30  ;;  %v6742_v46 = vld [vmem:[%s5792_s19 + $0x141] sm:$0xff]  ;;  %5669 = vmatpush3.bf16.msra.mxu1 %v5666_v51  ;;  %v4829_v35 = vld [vmem:[%s8326_s1 + $0x30] sm:$0xff]  ;;  %v4830_v55 = vld [vmem:[%s8326_s1 + $0x38] sm:$0xff] }
 0x139   : > { %1622 = vrot.lane.b32.xlu1 %v8522_v11, %s5746_s21  ;;  %1620 = vrot.lane.b32.xlu0 %v8523_v19, %s5746_s21  ;;  %8544 = vst [vmem:[#allocation32_spill] sm:$0xff] %v6742_v46  ;;  %v795_v24 = vsel %vm764_vm1, %v762_v16, %v8547_v60  ;;  %v5670_v28 = vpack.c.bf16 %v4830_v55, %v4829_v35  ;;  %v8565_v44 = vld [vmem:[#allocation63_spill] sm:$0xff]  ;;  %v8571_v16 = vld [vmem:[#allocation70_spill] sm:$0xff] }
 0x13a   : > { %5478 = vmatprep.mubr.msk.f32.mxu0 %vm834_vm3, %v822_v57  ;;  %v6769_v57 = vld [vmem:[%s5792_s19 + $0x151] sm:$0xff]  ;;  %v8568_v23 = vld [vmem:[#allocation67_spill] sm:$0xff] }
 0x13b   : > { %5479 = vmatmul.mubr.msk.f32.gmra.mrb[24].mxu0 %vm834_vm3, %v823_v29  ;;  %v690_v39 = vpop.permute.xlu1 %689  ;;  %v688_v58 = vpop.permute.xlu0 %687  ;;  %v6766_v29 = vld [vmem:[%s5792_s19 + $0x159] sm:$0xff]  ;;  %8549 = vst [vmem:[#allocation17_spill] sm:$0xff] %v6769_v57  ;;  %5671 = vmatprep.subr.bf16.mxu1 %v5670_v28  ;;  %v8572_v47 = vld [vmem:[#allocation71_spill] sm:$0xff] }
 0x13c   : > { %v825_v61 = vsel %vm797_vm2, %v792_v0, %v690_v39  ;;  %v824_v26 = vsel %vm797_vm2, %v791_v38, %v688_v58  ;;  %8548 = vst [vmem:[#allocation33_spill] sm:$0xff] %v6766_v29  ;;  %5673 = vmatpush3.bf16.msra.mxu1 %v5670_v28  ;;  %v8553_v0 = vld [vmem:[#allocation49_spill] sm:$0xff]  ;;  %v8554_v39 = vld [vmem:[#allocation50_spill] sm:$0xff]  ;;  %v8555_v58 = vld [vmem:[#allocation51_spill] sm:$0xff] }
 0x13d   : > { %1626 = vrot.lane.b32.xlu1 %v8530_v4, %s5746_s21  ;;  %1624 = vrot.lane.b32.xlu0 %v8531_v5, %s5746_s21  ;;  %v8556_v4 = vld [vmem:[#allocation52_spill] sm:$0xff]  ;;  %v8557_v5 = vld [vmem:[#allocation53_spill] sm:$0xff]  ;;  %v8580_v35 = vld [vmem:[#allocation79_spill] sm:$0xff] }
 0x13e   : > { %5481 = vmatprep.mubr.msk.f32.mxu0 %vm834_vm3, %v824_v26 }
 0x13f   : > { %5482 = vmatmul.mubr.msk.f32.gmra.mrb[26].mxu0 %vm834_vm3, %v825_v61  ;;  %v694_v43 = vpop.permute.xlu1 %693  ;;  %v692_v52 = vpop.permute.xlu0 %691 }
 0x140   : > { %v827_v8 = vsel %vm797_vm2, %v794_v42, %v694_v43  ;;  %v826_v9 = vsel %vm797_vm2, %v793_v18, %v692_v52  ;;  %v8561_v42 = vld [vmem:[#allocation57_spill] sm:$0xff]  ;;  %v8562_v43 = vld [vmem:[#allocation58_spill] sm:$0xff]  ;;  %v8563_v52 = vld [vmem:[#allocation59_spill] sm:$0xff] }
 0x141   : > { %1630 = vrot.lane.b32.xlu1 %v6712_v6, %s5746_s21  ;;  %1628 = vrot.lane.b32.xlu0 %v6715_v7, %s5746_s21  ;;  %v7034_v7 = vld [vmem:[%s5792_s19 + $0xa9] sm:$0xff] }
 0x142   : > { %5484 = vmatprep.mubr.msk.f32.mxu0 %vm834_vm3, %v826_v9 }
 0x143   : > { %5485 = vmatmul.mubr.msk.f32.gmra.mrb[28].mxu0 %vm834_vm3, %v827_v8  ;;  %v698_v25 = vpop.permute.xlu1 %697  ;;  %v696_v12 = vpop.permute.xlu0 %695 }
 0x144   : > { %v829_v34 = vsel %vm797_vm2, %v796_v49, %v698_v25  ;;  %v828_v1 = vsel %vm797_vm2, %v795_v24, %v696_v12  ;;  %v8575_v24 = vld [vmem:[#allocation74_spill] sm:$0xff]  ;;  %v8576_v25 = vld [vmem:[#allocation75_spill] sm:$0xff] }
 0x145   : > { %1634 = vrot.lane.b32.xlu1 %v6742_v46, %s5746_s21  ;;  %1632 = vrot.lane.b32.xlu0 %v6745_v32, %s5746_s21  ;;  %v7020_v32 = vld [vmem:[%s5792_s19 + $0x91] sm:$0xff] }
 0x146   : > { %5487 = vmatprep.mubr.msk.f32.mxu0 %vm834_vm3, %v828_v1  ;;  %v8579_v1 = vld [vmem:[#allocation78_spill] sm:$0xff] }
 0x147   : > { %5488 = vmatmul.mubr.msk.f32.gmra.mrb[30].mxu0 %vm834_vm3, %v829_v34  ;;  %v6772_v11 = vpop.permute.xlu1 %1458  ;;  %v6774_v19 = vpop.permute.xlu0 %1456 }
 0x149   : > { %1638 = vrot.lane.b32.xlu1 %v6766_v29, %s5746_s21  ;;  %1636 = vrot.lane.b32.xlu0 %v6769_v57, %s5746_s21 }
 0x14b   : > { %v6786_v17 = vpop.permute.xlu1 %1462  ;;  %v6788_v37 = vpop.permute.xlu0 %1460 }
 0x14d   : > { %1642 = vrot.lane.b32.xlu1 %v6781_v21, %s5746_s21  ;;  %1640 = vrot.lane.b32.xlu0 %v6784_v36, %s5746_s21  ;;  %v5023_v36 = vld [vmem:[%s8326_s1 + $0x40] sm:$0xff] }
 0x14e   : > { %v6997_v21 = vld [vmem:[%s5792_s19 + $0x81] sm:$0xff] }
 0x14f   : > { %v6794_v54 = vpop.permute.xlu1 %1466  ;;  %v6796_v3 = vpop.permute.xlu0 %1464 }
 0x151   : > { %1646 = vrot.lane.b32.xlu1 %v8552_v2, %s5746_s21  ;;  %1644 = vrot.lane.b32.xlu0 %v8553_v0, %s5746_s21  ;;  %v8583_v2 = vld [vmem:[#allocation82_spill] sm:$0xff]  ;;  %v8584_v0 = vld [vmem:[#allocation83_spill] sm:$0xff] }
 0x153   : > { %v6802_v31 = vpop.permute.xlu1 %1470  ;;  %v6804_v38 = vpop.permute.xlu0 %1468 }
 0x155   : > { %1714 = vrot.lane.b32.xlu1 %v8554_v39, %s5747_s30  ;;  %1712 = vrot.lane.b32.xlu0 %v8555_v58, %s5747_s30 }
 0x157   : > { %v6810_v61 = vpop.permute.xlu1 %1474  ;;  %v6812_v26 = vpop.permute.xlu0 %1472 }
 0x159   : > { %1718 = vrot.lane.b32.xlu1 %v8556_v4, %s5747_s30  ;;  %1716 = vrot.lane.b32.xlu0 %v8557_v5, %s5747_s30  ;;  %v8587_v4 = vld [vmem:[#allocation86_spill] sm:$0xff]  ;;  %v8588_v5 = vld [vmem:[#allocation87_spill] sm:$0xff] }
 0x15b   : > { %v6818_v27 = vpop.permute.xlu1 %1478  ;;  %v6820_v40 = vpop.permute.xlu0 %1476 }
 0x15d   : > { %1722 = vrot.lane.b32.xlu1 %v8558_v41, %s5747_s30  ;;  %1720 = vrot.lane.b32.xlu0 %v8559_v20, %s5747_s30 }
 0x15f   : > { %v6826_v59 = vpop.permute.xlu1 %1482  ;;  %v6828_v63 = vpop.permute.xlu0 %1480 }
 0x161   : > { %1726 = vrot.lane.b32.xlu1 %v8560_v13, %s5747_s30  ;;  %1724 = vrot.lane.b32.xlu0 %v8561_v42, %s5747_s30 }
 0x163   : > { %v6834_v22 = vpop.permute.xlu1 %1486  ;;  %v6836_v18 = vpop.permute.xlu0 %1484 }
 0x165   : > { %1730 = vrot.lane.b32.xlu1 %v8562_v43, %s5747_s30  ;;  %1728 = vrot.lane.b32.xlu0 %v8563_v52, %s5747_s30 }
 0x167   : > { %v6842_v8 = vpop.permute.xlu1 %1490  ;;  %v6844_v9 = vpop.permute.xlu0 %1488 }
 0x169   : > { %1734 = vrot.lane.b32.xlu1 %v8564_v53, %s5747_s30  ;;  %1732 = vrot.lane.b32.xlu0 %v8565_v44, %s5747_s30  ;;  %v6935_v44 = vld [vmem:[%s5792_s19 + $0x21] sm:$0xff] }
 0x16b   : > { %v6850_v51 = vpop.permute.xlu1 %1494  ;;  %v6852_v45 = vpop.permute.xlu0 %1492 }
 0x16c   : > { %8566 = vst [vmem:[#allocation4_spill] sm:$0xff] %v6852_v45 }
 0x16d   : > { %1738 = vrot.lane.b32.xlu1 %v8567_v50, %s5747_s30  ;;  %1736 = vrot.lane.b32.xlu0 %v8568_v23, %s5747_s30 }
 0x16f   : > { %v6858_v30 = vpop.permute.xlu1 %1498  ;;  %v6860_v33 = vpop.permute.xlu0 %1496 }
 0x170   : > { %8569 = vst [vmem:[#allocation5_spill] sm:$0xff] %v6858_v30  ;;  %8570 = vst [vmem:[#allocation34_spill] sm:$0xff] %v6860_v33  ;;  %v1297_v33 = vld [vmem:[%s5792_s19 + $0x9] sm:$0xff] }
 0x171   : > { %1742 = vrot.lane.b32.xlu1 %v8571_v16, %s5747_s30  ;;  %1740 = vrot.lane.b32.xlu0 %v8572_v47, %s5747_s30  ;;  %v6949_v16 = vld [vmem:[%s5792_s19 + $0x39] sm:$0xff]  ;;  %v6952_v47 = vld [vmem:[%s5792_s19 + $0x31] sm:$0xff] }
 0x173   : > { %v6866_v49 = vpop.permute.xlu1 %1502  ;;  %v6868_v60 = vpop.permute.xlu0 %1500 }
 0x174   : > { %8573 = vst [vmem:[#allocation18_spill] sm:$0xff] %v6866_v49  ;;  %8574 = vst [vmem:[#allocation35_spill] sm:$0xff] %v6868_v60  ;;  %v5123_v49 = vld [vmem:[%s5792_s19 + $0x1a] sm:$0xff] }
 0x175   : > { %1746 = vrot.lane.b32.xlu1 %v8575_v24, %s5747_s30  ;;  %1744 = vrot.lane.b32.xlu0 %v8576_v25, %s5747_s30 }
 0x177   : > { %v6874_v12 = vpop.permute.xlu1 %1506  ;;  %v6876_v34 = vpop.permute.xlu0 %1504 }
 0x178   : > { %8577 = vst [vmem:[#allocation19_spill] sm:$0xff] %v6874_v12  ;;  %8578 = vst [vmem:[#allocation64_spill] sm:$0xff] %v6876_v34  ;;  %v5220_v12 = vld [vmem:[%s8326_s1 + $0x68] sm:$0xff] }
 0x179   : > { %1750 = vrot.lane.b32.xlu1 %v8579_v1, %s5747_s30  ;;  %1748 = vrot.lane.b32.xlu0 %v8580_v35, %s5747_s30  ;;  %v6963_v1 = vld [vmem:[%s5792_s19 + $0x51] sm:$0xff]  ;;  %v6966_v35 = vld [vmem:[%s5792_s19 + $0x49] sm:$0xff] }
 0x17b   : > { %v6882_v55 = vpop.permute.xlu1 %1510  ;;  %v6884_v28 = vpop.permute.xlu0 %1508 }
 0x17c   : > { %8581 = vst [vmem:[#allocation65_spill] sm:$0xff] %v6882_v55  ;;  %8582 = vst [vmem:[#allocation6_spill] sm:$0xff] %v6884_v28  ;;  %v7031_v55 = vld [vmem:[%s5792_s19 + $0xb1] sm:$0xff] }
 0x17d   : > { %1754 = vrot.lane.b32.xlu1 %v8583_v2, %s5747_s30  ;;  %1752 = vrot.lane.b32.xlu0 %v8584_v0, %s5747_s30 }
 0x17f   : > { %v6890_v39 = vpop.permute.xlu1 %1514  ;;  %v6892_v58 = vpop.permute.xlu0 %1512 }
 0x180   : > { %8585 = vst [vmem:[#allocation7_spill] sm:$0xff] %v6890_v39  ;;  %8586 = vst [vmem:[#allocation36_spill] sm:$0xff] %v6892_v58  ;;  %v5025_v39 = vld [vmem:[%s8326_s1 + $0x50] sm:$0xff] }
 0x181   : > { %1758 = vrot.lane.b32.xlu1 %v8587_v4, %s5747_s30  ;;  %1756 = vrot.lane.b32.xlu0 %v8588_v5, %s5747_s30  ;;  %v6977_v4 = vld [vmem:[%s5792_s19 + $0x69] sm:$0xff]  ;;  %v6980_v5 = vld [vmem:[%s5792_s19 + $0x61] sm:$0xff] }
 0x183   : > { %v6898_v41 = vpop.permute.xlu1 %1518  ;;  %v6900_v20 = vpop.permute.xlu0 %1516 }
 0x184   : > { %8589 = vst [vmem:[#allocation20_spill] sm:$0xff] %v6898_v41  ;;  %8590 = vst [vmem:[#allocation37_spill] sm:$0xff] %v6900_v20  ;;  %v5024_v20 = vld [vmem:[%s8326_s1 + $0x48] sm:$0xff]  ;;  %v7000_v41 = vld [vmem:[%s5792_s19 + $0x79] sm:$0xff] }
 0x185   : > { %1762 = vrot.lane.b32.xlu1 %v6443_v14, %s5747_s30  ;;  %1760 = vrot.lane.b32.xlu0 %v6446_v48, %s5747_s30  ;;  %v4826_v14 = vld [vmem:[%s5792_s19 + $0x18a] sm:$0xff]  ;;  %v4825_v48 = vld [vmem:[%s5792_s19 + $0x182] sm:$0xff]  ;;  %v5674_v57 = vpack.c.bf16 %v5024_v20, %v5023_v36 }
 0x186   : > { %v5026_v36 = vld [vmem:[%s8326_s1 + $0x58] sm:$0xff] }
 0x187   : > { %v6906_v13 = vpop.permute.xlu1 %1586  ;;  %v6908_v42 = vpop.permute.xlu0 %1584  ;;  %5675 = vmatprep.subr.bf16.mxu0 %v5674_v57  ;;  %v7017_v20 = vld [vmem:[%s5792_s19 + $0x99] sm:$0xff]  ;;  %v5678_v28 = vpack.c.bf16 %v5026_v36, %v5025_v39  ;;  %v7042_v36 = vld [vmem:[%s5792_s19 + $0x30] sm:$0xff] }
 0x188   : > { %5677 = vmatpush3.bf16.msra.mxu0 %v5674_v57  ;;  %v4960_v39 = vld [vmem:[%s5792_s19 + $0x38] sm:$0xff]  ;;  %8593 = vst [vmem:[#allocation69_spill] sm:$0xff] %v7042_v36 }
 0x189   : > { %1766 = vrot.lane.b32.xlu1 %v6466_v15, %s5747_s30  ;;  %1764 = vrot.lane.b32.xlu0 %v6469_v10, %s5747_s30 }
 0x18a   : > { %5679 = vmatprep.subr.bf16.mxu0 %v5678_v28 }
 0x18b   : > { %v6914_v43 = vpop.permute.xlu1 %1590  ;;  %v6916_v52 = vpop.permute.xlu0 %1588 }
 0x18c   : > { %5681 = vmatpush3.bf16.msra.mxu0 %v5678_v28  ;;  %v5219_v28 = vld [vmem:[%s8326_s1 + $0x60] sm:$0xff] }
 0x18d   : > { %1770 = vrot.lane.b32.xlu1 %v6490_v56, %s5747_s30  ;;  %1768 = vrot.lane.b32.xlu0 %v6493_v62, %s5747_s30  ;;  %v6938_v62 = vld [vmem:[%s5792_s19 + $0x19] sm:$0xff]  ;;  %v5682_v60 = vpack.c.bf16 %v5220_v12, %v5219_v28  ;;  %v5124_v12 = vld [vmem:[%s5792_s19 + $0x22] sm:$0xff] }
 0x18f   : > { %v6924_v53 = vpop.permute.xlu1 %1594  ;;  %v6926_v15 = vpop.permute.xlu0 %1592  ;;  %5683 = vmatprep.subr.bf16.mxu1 %v5682_v60 }
 0x191   : > { %1774 = vrot.lane.b32.xlu1 %v4826_v14, %s5747_s30  ;;  %1772 = vrot.lane.b32.xlu0 %v4825_v48, %s5747_s30 }
 0x193   : > { %v6930_v10 = vpop.permute.xlu1 %1598  ;;  %v6932_v56 = vpop.permute.xlu0 %1596 }
 0x195   : > { %2536 = vrot.lane.b32.xlu1 %v6935_v44, %s5745_s20  ;;  %2534 = vrot.lane.b32.xlu0 %v6938_v62, %s5745_s20 }
 0x197   : > { %v6944_v50 = vpop.permute.xlu1 %1602  ;;  %v6946_v23 = vpop.permute.xlu0 %1600 }
 0x199   : > { %2540 = vrot.lane.b32.xlu1 %v6949_v16, %s5745_s20  ;;  %2538 = vrot.lane.b32.xlu0 %v6952_v47, %s5745_s20 }
 0x19b   : > { %v6958_v24 = vpop.permute.xlu1 %1606  ;;  %v6960_v25 = vpop.permute.xlu0 %1604 }
 0x19d   : > { %2544 = vrot.lane.b32.xlu1 %v6963_v1, %s5745_s20  ;;  %2542 = vrot.lane.b32.xlu0 %v6966_v35, %s5745_s20 }
 0x19f   : > { %v6972_v2 = vpop.permute.xlu1 %1610  ;;  %v6974_v0 = vpop.permute.xlu0 %1608 }
 0x1a1   : > { %2548 = vrot.lane.b32.xlu1 %v6977_v4, %s5745_s20  ;;  %2546 = vrot.lane.b32.xlu0 %v6980_v5, %s5745_s20 }
 0x1a3   : > { %v6986_v14 = vpop.permute.xlu1 %1614  ;;  %v6988_v48 = vpop.permute.xlu0 %1612 }
 0x1a5   : > { %2552 = vrot.lane.b32.xlu1 %v6997_v21, %s5745_s20  ;;  %2550 = vrot.lane.b32.xlu0 %v7000_v41, %s5745_s20 }
 0x1a7   : > { %v7006_v58 = vpop.permute.xlu1 %1618  ;;  %v7008_v29 = vpop.permute.xlu0 %1616 }
 0x1a9   : > { %2556 = vrot.lane.b32.xlu1 %v7017_v20, %s5745_s20  ;;  %2554 = vrot.lane.b32.xlu0 %v7020_v32, %s5745_s20 }
 0x1ab   : > { %v7026_v57 = vpop.permute.xlu1 %1622  ;;  %v7028_v46 = vpop.permute.xlu0 %1620 }
 0x1ac   : > { %8591 = vst [vmem:[#allocation21_spill] sm:$0xff] %v7026_v57  ;;  %8592 = vst [vmem:[#allocation68_spill] sm:$0xff] %v7028_v46 }
 0x1ad   : > { %2560 = vrot.lane.b32.xlu1 %v7031_v55, %s5745_s20  ;;  %2558 = vrot.lane.b32.xlu0 %v7034_v7, %s5745_s20 }
 0x1af   : > { %v7044_v34 = vpop.permute.xlu1 %1626  ;;  %v7046_v6 = vpop.permute.xlu0 %1624 }
 0x1b0   : > { %8594 = vst [vmem:[#allocation8_spill] sm:$0xff] %v7044_v34  ;;  %8595 = vst [vmem:[#allocation9_spill] sm:$0xff] %v7046_v6 }
 0x1b1   : > { %2664 = vrot.lane.b32.xlu1 %v4960_v39, %s5746_s21  ;;  %2662 = vrot.lane.b32.xlu0 %v7042_v36, %s5746_s21 }
 0x1b3   : > { %v7058_v34 = vpop.permute.xlu1 %1630  ;;  %v7060_v6 = vpop.permute.xlu0 %1628 }
 0x1b4   : > { %8596 = vst [vmem:[#allocation38_spill] sm:$0xff] %v7058_v34  ;;  %8597 = vst [vmem:[#allocation22_spill] sm:$0xff] %v7060_v6  ;;  %v5187_v6 = vld [vmem:[%s5792_s19 + $0x32] sm:$0xff] }
 0x1b5   : > { %3609 = vrot.lane.b32.xlu1 %v5123_v49, %s5745_s20  ;;  %2790 = vrot.lane.b32.xlu0 %v6952_v47, %s5747_s30 }
 0x1b7   : > { %v7066_v39 = vpop.permute.xlu1 %1634  ;;  %v7068_v28 = vpop.permute.xlu0 %1632 }
 0x1b8   : > { %8598 = vst [vmem:[#allocation39_spill] sm:$0xff] %v7066_v39  ;;  %8599 = vst [vmem:[#allocation23_spill] sm:$0xff] %v7068_v28  ;;  %v4961_v39 = vld [vmem:[%s5792_s19 + $0x48] sm:$0xff] }
 0x1b9   : > { %3611 = vrot.lane.b32.xlu1 %v5124_v12, %s5745_s20  ;;  %2792 = vrot.lane.b32.xlu0 %v6949_v16, %s5747_s30  ;;  %v4962_v12 = vld [vmem:[%s5792_s19 + $0x50] sm:$0xff] }
 0x1bb   : > { %v7073_v36 = vpop.permute.xlu1 %1638  ;;  %v7075_v49 = vpop.permute.xlu0 %1636 }
 0x1bc   : > { %8600 = vst [vmem:[#allocation72_spill] sm:$0xff] %v7073_v36  ;;  %8601 = vst [vmem:[#allocation73_spill] sm:$0xff] %v7075_v49  ;;  %v5188_v36 = vld [vmem:[%s5792_s19 + $0x3a] sm:$0xff] }
 0x1bd   : > { %3739 = vrot.lane.b32.xlu1 %v6949_v16, %s5746_s21  ;;  %3737 = vrot.lane.b32.xlu0 %v6952_v47, %s5746_s21  ;;  %v1296_v49 = vld [vmem:[%s5792_s19 + $0x1] sm:$0xff] }
 0x1bf   : > { %v7083_v34 = vpop.permute.xlu1 %1642  ;;  %v7085_v28 = vpop.permute.xlu0 %1640 }
 0x1c0   : > { %8602 = vst [vmem:[#allocation10_spill] sm:$0xff] %v7083_v34  ;;  %8603 = vst [vmem:[#allocation11_spill] sm:$0xff] %v7085_v28  ;;  %v1809_v34 = vsel %vm731_vm0, %v1297_v33, %v6772_v11  ;;  %v1811_v33 = vsel %vm731_vm0, %v6935_v44, %v6786_v17 }
 0x1c1   : > { %2666 = vrot.lane.b32.xlu1 %v4961_v39, %s5746_s21  ;;  %3865 = vrot.lane.b32.xlu0 %v5187_v6, %s5747_s30  ;;  %v1808_v39 = vsel %vm731_vm0, %v1296_v49, %v6774_v19  ;;  %v1841_v28 = vsel %vm764_vm1, %v1809_v34, %v6906_v13  ;;  %v1810_v34 = vsel %vm731_vm0, %v6938_v62, %v6788_v37  ;;  %v5190_v49 = vld [vmem:[%s5792_s19 + $0x52] sm:$0xff] }
 0x1c2   : > { %v1840_v57 = vsel %vm764_vm1, %v1808_v39, %v6908_v42  ;;  %v1812_v37 = vsel %vm731_vm0, %v6952_v47, %v6796_v3  ;;  %v1815_v3 = vsel %vm731_vm0, %v6963_v1, %v6802_v31 }
 0x1c3   : > { %v7093_v30 = vpop.permute.xlu1 %1646  ;;  %v7095_v46 = vpop.permute.xlu0 %1644  ;;  %v1847_v47 = vsel %vm764_vm1, %v1815_v3, %v6930_v10  ;;  %v1817_v10 = vsel %vm731_vm0, %v6977_v4, %v6810_v61 }
 0x1c4   : > { %8604 = vst [vmem:[#allocation40_spill] sm:$0xff] %v7093_v30  ;;  %8605 = vst [vmem:[#allocation24_spill] sm:$0xff] %v7095_v46  ;;  %v5222_v46 = vld [vmem:[%s8326_s1 + $0x78] sm:$0xff]  ;;  %v1849_v39 = vsel %vm764_vm1, %v1817_v10, %v6944_v50  ;;  %v1818_v50 = vsel %vm731_vm0, %v7000_v41, %v6820_v40  ;;  %v1821_v40 = vsel %vm731_vm0, %v7017_v20, %v6826_v59  ;;  %v7269_v10 = vld [vmem:[%s5792_s19 + $0x62] sm:$0xff] }
 0x1c5   : > { %2668 = vrot.lane.b32.xlu1 %v4962_v12, %s5746_s21  ;;  %3867 = vrot.lane.b32.xlu0 %v5188_v36, %s5747_s30  ;;  %v5221_v12 = vld [vmem:[%s8326_s1 + $0x70] sm:$0xff] }
 0x1c6   : > { %v5686_v13 = vpack.c.bf16 %v5222_v46, %v5221_v12  ;;  %v1813_v46 = vsel %vm731_vm0, %v6949_v16, %v6794_v54  ;;  %v5189_v16 = vld [vmem:[%s5792_s19 + $0x4a] sm:$0xff] }
 0x1c7   : > { %v1715_v45 = vpop.permute.xlu1 %1714  ;;  %v1713_v30 = vpop.permute.xlu0 %1712 }
 0x1c8   : > { %v1873_v11 = vsel %vm797_vm2, %v1841_v28, %v1715_v45  ;;  %v1872_v19 = vsel %vm797_vm2, %v1840_v57, %v1713_v30  ;;  %v1843_v45 = vsel %vm764_vm1, %v1811_v33, %v6914_v43  ;;  %v1844_v43 = vsel %vm764_vm1, %v1812_v37, %v6926_v15  ;;  %v7161_v15 = vld [vmem:[%s5792_s19 + $0x60] sm:$0xff] }
 0x1c9   : > { %3613 = vrot.lane.b32.xlu1 %v5187_v6, %s5745_s20  ;;  %2794 = vrot.lane.b32.xlu0 %v6966_v35, %s5747_s30  ;;  %v1842_v6 = vsel %vm764_vm1, %v1810_v34, %v6916_v52  ;;  %v1850_v34 = vsel %vm764_vm1, %v1818_v50, %v6960_v25  ;;  %v1820_v25 = vsel %vm731_vm0, %v7020_v32, %v6828_v63  ;;  %v1317_v50 = vld [vmem:[%s5792_s19 + $0xf9] sm:$0xff] }
 0x1ca   : > { %5498 = vmatprep.mubr.msk.f32.mxu1 %vm834_vm3, %v1872_v19  ;;  %v1852_v59 = vsel %vm764_vm1, %v1820_v25, %v6974_v0  ;;  %v1313_v0 = vld [vmem:[%s5792_s19 + $0xc9] sm:$0xff] }
 0x1cb   : > { %5499 = vmatmul.mubr.msk.f32.vlgmr.msra.gmra.mrb[0].mxu1 %vm834_vm3, %v1873_v11  ;;  %v1719_v30 = vpop.permute.xlu1 %1718  ;;  %v1717_v42 = vpop.permute.xlu0 %1716  ;;  %v8608_v25 = vld [vmem:[#allocation68_spill] sm:$0xff] }
 0x1cc   : > { %v1875_v57 = vsel %vm797_vm2, %v1843_v45, %v1719_v30  ;;  %v1874_v17 = vsel %vm797_vm2, %v1842_v6, %v1717_v42  ;;  %5685 = vmatpush3.bf16.msra.mxu1 %v5682_v60  ;;  %v1845_v60 = vsel %vm764_vm1, %v1813_v46, %v6924_v53  ;;  %v1814_v53 = vsel %vm731_vm0, %v6966_v35, %v6804_v38 }
 0x1cd   : > { %3615 = vrot.lane.b32.xlu1 %v5188_v36, %s5745_s20  ;;  %2796 = vrot.lane.b32.xlu0 %v6963_v1, %s5747_s30  ;;  %v1846_v36 = vsel %vm764_vm1, %v1814_v53, %v6932_v56  ;;  %v1816_v56 = vsel %vm731_vm0, %v6980_v5, %v6812_v26  ;;  %v1819_v26 = vsel %vm731_vm0, %v6997_v21, %v6818_v27 }
 0x1ce   : > { %5501 = vmatprep.mubr.msk.f32.mxu1 %vm834_vm3, %v1874_v17  ;;  %5687 = vmatprep.subr.bf16.mxu1 %v5686_v13  ;;  %v1848_v12 = vsel %vm764_vm1, %v1816_v56, %v6946_v23  ;;  %v1851_v23 = vsel %vm764_vm1, %v1819_v26, %v6958_v24  ;;  %v1853_v30 = vsel %vm764_vm1, %v1821_v40, %v6972_v2  ;;  %v1314_v56 = vld [vmem:[%s5792_s19 + $0xd9] sm:$0xff] }
 0x1cf   : > { %5502 = vmatmul.mubr.msk.f32.gmra.mrb[2].mxu1 %vm834_vm3, %v1875_v57  ;;  %v1723_v52 = vpop.permute.xlu1 %1722  ;;  %v1721_v44 = vpop.permute.xlu0 %1720  ;;  %v8607_v40 = vld [vmem:[#allocation21_spill] sm:$0xff] }
 0x1d0   : > { %v1877_v54 = vsel %vm797_vm2, %v1845_v60, %v1723_v52  ;;  %v1876_v62 = vsel %vm797_vm2, %v1844_v43, %v1721_v44  ;;  %5689 = vmatpush3.bf16.msra.mxu1 %v5686_v13  ;;  %v1823_v60 = vsel %vm731_vm0, %v7031_v55, %v6834_v22  ;;  %v1822_v44 = vsel %vm731_vm0, %v7034_v7, %v6836_v18 }
 0x1d1   : > { %3743 = vrot.lane.b32.xlu1 %v6963_v1, %s5746_s21  ;;  %3741 = vrot.lane.b32.xlu0 %v6966_v35, %s5746_s21  ;;  %v7182_v35 = vld [vmem:[%s5792_s19 + $0x68] sm:$0xff]  ;;  %v1854_v22 = vsel %vm764_vm1, %v1822_v44, %v6988_v48 }
 0x1d2   : > { %5504 = vmatprep.mubr.msk.f32.mxu1 %vm834_vm3, %v1876_v62  ;;  %v1855_v62 = vsel %vm764_vm1, %v1823_v60, %v6986_v14  ;;  %v1825_v14 = vsel %vm731_vm0, %v1313_v0, %v6842_v8  ;;  %v8610_v0 = vld [vmem:[#allocation34_spill] sm:$0xff] }
 0x1d3   : > { %5505 = vmatmul.mubr.msk.f32.gmra.mrb[4].mxu1 %vm834_vm3, %v1877_v54  ;;  %v1727_v31 = vpop.permute.xlu1 %1726  ;;  %v1725_v1 = vpop.permute.xlu0 %1724  ;;  %v1312_v54 = vld [vmem:[%s5792_s19 + $0xc1] sm:$0xff] }
 0x1d4   : > { %v1879_v28 = vsel %vm797_vm2, %v1847_v47, %v1727_v31  ;;  %v1878_v38 = vsel %vm797_vm2, %v1846_v36, %v1725_v1  ;;  %v1824_v48 = vsel %vm731_vm0, %v1312_v54, %v6844_v9  ;;  %v1315_v36 = vld [vmem:[%s5792_s19 + $0xe1] sm:$0xff] }
 0x1d5   : > { %2670 = vrot.lane.b32.xlu1 %v7161_v15, %s5746_s21  ;;  %3869 = vrot.lane.b32.xlu0 %v5189_v16, %s5747_s30 }
 0x1d6   : > { %5507 = vmatprep.mubr.msk.f32.mxu1 %vm834_vm3, %v1878_v38  ;;  %v7266_v38 = vld [vmem:[%s5792_s19 + $0x78] sm:$0xff] }
 0x1d7   : > { %5508 = vmatmul.mubr.msk.f32.gmra.mrb[6].mxu1 %vm834_vm3, %v1879_v28  ;;  %v1731_v11 = vpop.permute.xlu1 %1730  ;;  %v1729_v19 = vpop.permute.xlu0 %1728 }
 0x1d8   : > { %v1881_v61 = vsel %vm797_vm2, %v1849_v39, %v1731_v11  ;;  %v1880_v33 = vsel %vm797_vm2, %v1848_v12, %v1729_v19 }
 0x1d9   : > { %2672 = vrot.lane.b32.xlu1 %v7182_v35, %s5746_s21  ;;  %3871 = vrot.lane.b32.xlu0 %v5190_v49, %s5747_s30 }
 0x1da   : > { %5510 = vmatprep.mubr.msk.f32.mxu1 %vm834_vm3, %v1880_v33  ;;  %v8606_v33 = vld [vmem:[#allocation4_spill] sm:$0xff] }
 0x1db   : > { %5511 = vmatmul.mubr.msk.f32.gmra.mrb[8].mxu1 %vm834_vm3, %v1881_v61  ;;  %v1735_v13 = vpop.permute.xlu1 %1734  ;;  %v1733_v45 = vpop.permute.xlu0 %1732  ;;  %v1826_v26 = vsel %vm731_vm0, %v1314_v56, %v8606_v33 }
 0x1dc   : > { %v1883_v6 = vsel %vm797_vm2, %v1851_v23, %v1735_v13  ;;  %v1882_v27 = vsel %vm797_vm2, %v1850_v34, %v1733_v45  ;;  %v7292_v45 = vld [vmem:[%s5792_s19 + $0x80] sm:$0xff] }
 0x1dd   : > { %3617 = vrot.lane.b32.xlu1 %v5189_v16, %s5745_s20  ;;  %2798 = vrot.lane.b32.xlu0 %v6980_v5, %s5747_s30 }
 0x1de   : > { %v5444_v24 = vpop.f32.mrb[0].mxu0  ;;  %5513 = vmatprep.mubr.msk.f32.mxu1 %vm834_vm3, %v1882_v27  ;;  %v1316_v27 = vld [vmem:[%s5792_s19 + $0xf1] sm:$0xff] }
 0x1df   : > { %1157 = vst [vmem:[%s7213_s16 + $0x8] sm:$0xff] %v5444_v24  ;;  %v1227_v42 = vmul.f32 %v5444_v24, %v5444_v24  ;;  %v997_v57 = vpop.f32.mrb[1].mxu0  ;;  %5514 = vmatmul.mubr.msk.f32.gmra.mrb[10].mxu1 %vm834_vm3, %v1883_v6  ;;  %v1739_v17 = vpop.permute.xlu1 %1738  ;;  %v7295_v6 = vld [vmem:[%s5792_s19 + $0x6a] sm:$0xff] }
 0x1e0   : > { %1156 = vst [vmem:[%s7213_s16] sm:$0xff] %v997_v57  ;;  %v1188_v20 = vadd.f32 %v5444_v24, %v997_v57  ;;  %v1226_v46 = vmul.f32 %v997_v57, %v997_v57  ;;  %v1885_v63 = vsel %vm797_vm2, %v1853_v30, %v1739_v17  ;;  %v1737_v37 = vpop.permute.xlu0 %1736  ;;  %v1858_v30 = vsel %vm764_vm1, %v1826_v26, %v8608_v25  ;;  %v8620_v25 = vld [vmem:[#allocation3_spill] sm:$0xff] }
 0x1e1   : > { %v1884_v2 = vsel %vm797_vm2, %v1852_v59, %v1737_v37  ;;  %3619 = vrot.lane.b32.xlu1 %v5190_v49, %s5745_s20  ;;  %2800 = vrot.lane.b32.xlu0 %v6977_v4, %s5747_s30  ;;  %v8609_v37 = vld [vmem:[#allocation5_spill] sm:$0xff] }
 0x1e2   : > { %v1258_v43 = vadd.f32 %v1227_v42, %v1226_v46  ;;  %v5447_v52 = vpop.f32.mrb[2].mxu0  ;;  %5516 = vmatprep.mubr.msk.f32.mxu1 %vm834_vm3, %v1884_v2  ;;  %v1829_v2 = vsel %vm731_vm0, %v1317_v50, %v8609_v37 }
 0x1e3   : > { %1159 = vst [vmem:[%s7213_s16 + $0x18] sm:$0xff] %v5447_v52  ;;  %v1007_v3 = vpop.f32.mrb[3].mxu0  ;;  %5517 = vmatmul.mubr.msk.f32.gmra.mrb[12].mxu1 %vm834_vm3, %v1885_v63  ;;  %v1743_v53 = vpop.permute.xlu1 %1742  ;;  %v1229_v31 = vmul.f32 %v5447_v52, %v5447_v52 }
 0x1e4   : > { %1158 = vst [vmem:[%s7213_s16 + $0x10] sm:$0xff] %v1007_v3  ;;  %v1189_v55 = vadd.f32 %v1188_v20, %v1007_v3  ;;  %v1228_v16 = vmul.f32 %v1007_v3, %v1007_v3  ;;  %v1887_v7 = vsel %vm797_vm2, %v1855_v62, %v1743_v53  ;;  %v1741_v18 = vpop.permute.xlu0 %1740  ;;  %v1318_v53 = vld [vmem:[%s5792_s19 + $0x109] sm:$0xff] }
 0x1e5   : > { %v1886_v47 = vsel %vm797_vm2, %v1854_v22, %v1741_v18  ;;  %3747 = vrot.lane.b32.xlu1 %v6977_v4, %s5746_s21  ;;  %3745 = vrot.lane.b32.xlu0 %v6980_v5, %s5746_s21  ;;  %v1857_v4 = vsel %vm764_vm1, %v1825_v14, %v7006_v58  ;;  %v1856_v5 = vsel %vm764_vm1, %v1824_v48, %v7008_v29  ;;  %v8611_v22 = vld [vmem:[#allocation8_spill] sm:$0xff] }
 0x1e6   : > { %v1259_v1 = vadd.f32 %v1258_v43, %v1228_v16  ;;  %v5450_v28 = vpop.f32.mrb[4].mxu0  ;;  %5519 = vmatprep.mubr.msk.f32.mxu1 %vm834_vm3, %v1886_v47  ;;  %v1190_v8 = vadd.f32 %v5447_v52, %v1189_v55  ;;  %v1827_v58 = vsel %vm731_vm0, %v1315_v36, %v6850_v51  ;;  %v1828_v43 = vsel %vm731_vm0, %v1316_v27, %v8610_v0  ;;  %v1319_v52 = vld [vmem:[%s5792_s19 + $0x111] sm:$0xff] }
 0x1e7   : > { %1161 = vst [vmem:[%s7213_s16 + $0x28] sm:$0xff] %v5450_v28  ;;  %v1017_v9 = vpop.f32.mrb[5].mxu0  ;;  %5520 = vmatmul.mubr.msk.f32.gmra.mrb[14].mxu1 %vm834_vm3, %v1887_v7  ;;  %v1747_v49 = vpop.permute.xlu1 %1746  ;;  %v1231_v23 = vmul.f32 %v5450_v28, %v5450_v28  ;;  %v1859_v24 = vsel %vm764_vm1, %v1827_v58, %v8607_v40  ;;  %v1861_v55 = vsel %vm764_vm1, %v1829_v2, %v8611_v22  ;;  %v8612_v16 = vld [vmem:[#allocation9_spill] sm:$0xff]  ;;  %v8625_v22 = vld [vmem:[#allocation6_spill] sm:$0xff] }
 0x1e8   : > { %1160 = vst [vmem:[%s7213_s16 + $0x20] sm:$0xff] %v1017_v9  ;;  %v1191_v39 = vadd.f32 %v1190_v8, %v1017_v9  ;;  %v1230_v12 = vmul.f32 %v1017_v9, %v1017_v9  ;;  %v1260_v11 = vadd.f32 %v1259_v1, %v1229_v31  ;;  %v1889_v19 = vsel %vm797_vm2, %v1857_v4, %v1747_v49  ;;  %v1745_v61 = vpop.permute.xlu0 %1744  ;;  %v8614_v4 = vld [vmem:[#allocation35_spill] sm:$0xff] }
 0x1e9   : > { %v1888_v29 = vsel %vm797_vm2, %v1856_v5, %v1745_v61  ;;  %2674 = vrot.lane.b32.xlu1 %v7266_v38, %s5746_s21  ;;  %3873 = vrot.lane.b32.xlu0 %v7269_v10, %s5747_s30  ;;  %v1860_v7 = vsel %vm764_vm1, %v1828_v43, %v8612_v16  ;;  %v1830_v5 = vsel %vm731_vm0, %v1318_v53, %v8614_v4  ;;  %v8616_v61 = vld [vmem:[#allocation22_spill] sm:$0xff] }
 0x1ea   : > { %v1261_v34 = vadd.f32 %v1260_v11, %v1230_v12  ;;  %v5453_v13 = vpop.f32.mrb[6].mxu0  ;;  %5522 = vmatprep.mubr.msk.f32.mxu1 %vm834_vm3, %v1888_v29  ;;  %v1192_v51 = vadd.f32 %v5450_v28, %v1191_v39  ;;  %v8613_v28 = vld [vmem:[#allocation18_spill] sm:$0xff]  ;;  %v1862_v58 = vsel %vm764_vm1, %v1830_v5, %v8616_v61  ;;  %v8631_v61 = vld [vmem:[#allocation36_spill] sm:$0xff] }
 0x1eb   : > { %1163 = vst [vmem:[%s7213_s16 + $0x38] sm:$0xff] %v5453_v13  ;;  %v1027_v42 = vpop.f32.mrb[7].mxu0  ;;  %5523 = vmatmul.mubr.msk.f32.gmra.mrb[16].mxu1 %vm834_vm3, %v1889_v19  ;;  %v1751_v57 = vpop.permute.xlu1 %1750  ;;  %v1233_v44 = vmul.f32 %v5453_v13, %v5453_v13  ;;  %v1831_v8 = vsel %vm731_vm0, %v1319_v52, %v8613_v28  ;;  %v8615_v11 = vld [vmem:[#allocation38_spill] sm:$0xff] }
 0x1ec   : > { %1162 = vst [vmem:[%s7213_s16 + $0x30] sm:$0xff] %v1027_v42  ;;  %v1193_v17 = vadd.f32 %v1192_v51, %v1027_v42  ;;  %v1232_v59 = vmul.f32 %v1027_v42, %v1027_v42  ;;  %v1262_v20 = vadd.f32 %v1261_v34, %v1231_v23  ;;  %v1891_v46 = vsel %vm797_vm2, %v1859_v24, %v1751_v57  ;;  %v1749_v63 = vpop.permute.xlu0 %1748  ;;  %v8618_v51 = vld [vmem:[#allocation2_spill] sm:$0xff]  ;;  %v8619_v24 = vld [vmem:[#allocation64_spill] sm:$0xff] }
 0x1ed   : > { %v1890_v60 = vsel %vm797_vm2, %v1858_v30, %v1749_v63  ;;  %2676 = vrot.lane.b32.xlu1 %v7292_v45, %s5746_s21  ;;  %3875 = vrot.lane.b32.xlu0 %v7295_v6, %s5747_s30  ;;  %v1863_v19 = vsel %vm764_vm1, %v1831_v8, %v8615_v11  ;;  %v1832_v30 = vsel %vm731_vm0, %v8620_v25, %v8619_v24  ;;  %v8622_v63 = vld [vmem:[#allocation23_spill] sm:$0xff] }
 0x1ee   : > { %v1263_v54 = vadd.f32 %v1262_v20, %v1232_v59  ;;  %v5456_v62 = vpop.f32.mrb[8].mxu0  ;;  %5525 = vmatprep.mubr.msk.f32.mxu1 %vm834_vm3, %v1890_v60  ;;  %v1194_v3 = vadd.f32 %v5453_v13, %v1193_v17  ;;  %v8617_v13 = vld [vmem:[#allocation19_spill] sm:$0xff]  ;;  %v1864_v37 = vsel %vm764_vm1, %v1832_v30, %v8622_v63 }
 0x1ef   : > { %1165 = vst [vmem:[%s7213_s16 + $0x48] sm:$0xff] %v5456_v62  ;;  %v1037_v18 = vpop.f32.mrb[9].mxu0  ;;  %5526 = vmatmul.mubr.msk.f32.gmra.mrb[18].mxu1 %vm834_vm3, %v1891_v46  ;;  %v1755_v14 = vpop.permute.xlu1 %1754  ;;  %v1235_v9 = vmul.f32 %v5456_v62, %v5456_v62  ;;  %v1833_v27 = vsel %vm731_vm0, %v8618_v51, %v8617_v13  ;;  %v8621_v20 = vld [vmem:[#allocation39_spill] sm:$0xff]  ;;  %v8633_v13 = vld [vmem:[#allocation10_spill] sm:$0xff] }
 0x1f0   : > { %1164 = vst [vmem:[%s7213_s16 + $0x40] sm:$0xff] %v1037_v18  ;;  %v1195_v47 = vadd.f32 %v1194_v3, %v1037_v18  ;;  %v1234_v48 = vmul.f32 %v1037_v18, %v1037_v18  ;;  %v1264_v36 = vadd.f32 %v1263_v54, %v1233_v44  ;;  %v1893_v31 = vsel %vm797_vm2, %v1861_v55, %v1755_v14  ;;  %v1753_v1 = vpop.permute.xlu0 %1752  ;;  %v8623_v54 = vld [vmem:[#allocation65_spill] sm:$0xff]  ;;  %v8626_v55 = vld [vmem:[#allocation16_spill] sm:$0xff] }
 0x1f1   : > { %v1892_v56 = vsel %vm797_vm2, %v1860_v7, %v1753_v1  ;;  %3621 = vrot.lane.b32.xlu1 %v7269_v10, %s5745_s20  ;;  %2802 = vrot.lane.b32.xlu0 %v7000_v41, %s5747_s30  ;;  %v1865_v46 = vsel %vm764_vm1, %v1833_v27, %v8621_v20  ;;  %v1834_v16 = vsel %vm731_vm0, %v8626_v55, %v8625_v22  ;;  %v8628_v1 = vld [vmem:[#allocation73_spill] sm:$0xff]  ;;  %v8634_v27 = vld [vmem:[#allocation11_spill] sm:$0xff]  ;;  %v8635_v20 = vld [vmem:[#allocation20_spill] sm:$0xff] }
 0x1f2   : > { %v1265_v49 = vadd.f32 %v1264_v36, %v1234_v48  ;;  %v5459_v39 = vpop.f32.mrb[10].mxu0  ;;  %5528 = vmatprep.mubr.msk.f32.mxu1 %vm834_vm3, %v1892_v56  ;;  %v1196_v12 = vadd.f32 %v5456_v62, %v1195_v47  ;;  %v8624_v62 = vld [vmem:[#allocation32_spill] sm:$0xff]  ;;  %v5193_v36 = vld [vmem:[%s5792_s19 + $0x7a] sm:$0xff]  ;;  %v1866_v28 = vsel %vm764_vm1, %v1834_v16, %v8628_v1 }
 0x1f3   : > { %1167 = vst [vmem:[%s7213_s16 + $0x58] sm:$0xff] %v5459_v39  ;;  %v1047_v10 = vpop.f32.mrb[11].mxu0  ;;  %5529 = vmatmul.mubr.msk.f32.gmra.mrb[20].mxu1 %vm834_vm3, %v1893_v31  ;;  %v1759_v29 = vpop.permute.xlu1 %1758  ;;  %v1237_v42 = vmul.f32 %v5459_v39, %v5459_v39  ;;  %v1835_v3 = vsel %vm731_vm0, %v8624_v62, %v8623_v54  ;;  %v7377_v48 = vld [vmem:[%s5792_s19 + $0x90] sm:$0xff] }
 0x1f4   : > { %1166 = vst [vmem:[%s7213_s16 + $0x50] sm:$0xff] %v1047_v10  ;;  %v1197_v33 = vadd.f32 %v1196_v12, %v1047_v10  ;;  %v1236_v26 = vmul.f32 %v1047_v10, %v1047_v10  ;;  %v1266_v50 = vadd.f32 %v1265_v49, %v1235_v9  ;;  %v1895_v23 = vsel %vm797_vm2, %v1863_v19, %v1759_v29  ;;  %v1757_v34 = vpop.permute.xlu0 %1756  ;;  %v8627_v31 = vld [vmem:[#allocation72_spill] sm:$0xff]  ;;  %v8630_v12 = vld [vmem:[#allocation33_spill] sm:$0xff] }
 0x1f5   : > { %v1894_v40 = vsel %vm797_vm2, %v1862_v58, %v1757_v34  ;;  %3623 = vrot.lane.b32.xlu1 %v7295_v6, %s5745_s20  ;;  %2804 = vrot.lane.b32.xlu0 %v6997_v21, %s5747_s30  ;;  %v8632_v58 = vld [vmem:[#allocation17_spill] sm:$0xff]  ;;  %v5194_v34 = vld [vmem:[%s5792_s19 + $0x82] sm:$0xff]  ;;  %v8639_v54 = vld [vmem:[#allocation40_spill] sm:$0xff] }
 0x1f6   : > { %v1267_v57 = vadd.f32 %v1266_v50, %v1236_v26  ;;  %v5462_v17 = vpop.f32.mrb[12].mxu0  ;;  %5531 = vmatprep.mubr.msk.f32.mxu1 %vm834_vm3, %v1894_v40  ;;  %v1198_v59 = vadd.f32 %v5459_v39, %v1197_v33  ;;  %v8629_v39 = vld [vmem:[#allocation7_spill] sm:$0xff]  ;;  %v1836_v10 = vsel %vm731_vm0, %v8632_v58, %v8631_v61 }
 0x1f7   : > { %1169 = vst [vmem:[%s7213_s16 + $0x68] sm:$0xff] %v5462_v17  ;;  %v1057_v6 = vpop.f32.mrb[13].mxu0  ;;  %5532 = vmatmul.mubr.msk.f32.gmra.mrb[22].mxu1 %vm834_vm3, %v1895_v23  ;;  %v1763_v2 = vpop.permute.xlu1 %1762  ;;  %v1239_v7 = vmul.f32 %v5462_v17, %v5462_v17  ;;  %v1837_v11 = vsel %vm731_vm0, %v8630_v12, %v8629_v39  ;;  %v7400_v23 = vld [vmem:[%s5792_s19 + $0x98] sm:$0xff]  ;;  %v1868_v40 = vsel %vm764_vm1, %v1836_v10, %v8634_v27  ;;  %v7462_v27 = vld [vmem:[%s5792_s19 + $0xa8] sm:$0xff] }
 0x1f8   : > { %1168 = vst [vmem:[%s7213_s16 + $0x60] sm:$0xff] %v1057_v6  ;;  %v1199_v60 = vadd.f32 %v1198_v59, %v1057_v6  ;;  %v1238_v0 = vmul.f32 %v1057_v6, %v1057_v6  ;;  %v1268_v43 = vadd.f32 %v1267_v57, %v1237_v42  ;;  %v1897_v52 = vsel %vm797_vm2, %v1865_v46, %v1763_v2  ;;  %v1761_v44 = vpop.permute.xlu0 %1760  ;;  %v8636_v46 = vld [vmem:[#allocation60_spill] sm:$0xff]  ;;  %v8637_v6 = vld [vmem:[#allocation37_spill] sm:$0xff] }
 0x1f9   : > { %v1896_v53 = vsel %vm797_vm2, %v1864_v37, %v1761_v44  ;;  %3751 = vrot.lane.b32.xlu1 %v6997_v21, %s5746_s21  ;;  %3749 = vrot.lane.b32.xlu0 %v7000_v41, %s5746_s21  ;;  %v1867_v21 = vsel %vm764_vm1, %v1835_v3, %v8627_v31  ;;  %v1869_v51 = vsel %vm764_vm1, %v1837_v11, %v8633_v13  ;;  %v8638_v2 = vld [vmem:[#allocation61_spill] sm:$0xff]  ;;  %v8640_v3 = vld [vmem:[#allocation24_spill] sm:$0xff] }
 0x1fa   : > { %v1269_v18 = vadd.f32 %v1268_v43, %v1238_v0  ;;  %v5465_v14 = vpop.f32.mrb[14].mxu0  ;;  %5534 = vmatprep.mubr.msk.f32.mxu1 %vm834_vm3, %v1896_v53  ;;  %v1200_v47 = vadd.f32 %v5462_v17, %v1199_v60  ;;  %v1839_v63 = vsel %vm731_vm0, %v8636_v46, %v8635_v20  ;;  %v1838_v60 = vsel %vm731_vm0, %v8638_v2, %v8637_v6  ;;  %v5196_v6 = vld [vmem:[%s5792_s19 + $0x9a] sm:$0xff] }
 0x1fb   : > { %1171 = vst [vmem:[%s7213_s16 + $0x78] sm:$0xff] %v5465_v14  ;;  %v1067_v41 = vpop.f32.mrb[15].mxu0  ;;  %5535 = vmatmul.mubr.msk.f32.gmra.mrb[24].mxu1 %vm834_vm3, %v1897_v52  ;;  %v1767_v8 = vpop.permute.xlu1 %1766  ;;  %v1241_v29 = vmul.f32 %v5465_v14, %v5465_v14  ;;  %v1871_v62 = vsel %vm764_vm1, %v1839_v63, %v8639_v54  ;;  %v1870_v53 = vsel %vm764_vm1, %v1838_v60, %v8640_v3 }
 0x1fc   : > { %1170 = vst [vmem:[%s7213_s16 + $0x70] sm:$0xff] %v1067_v41  ;;  %v1201_v56 = vadd.f32 %v1200_v47, %v1067_v41  ;;  %v1240_v4 = vmul.f32 %v1067_v41, %v1067_v41  ;;  %v1270_v5 = vadd.f32 %v1269_v18, %v1239_v7  ;;  %v1899_v9 = vsel %vm797_vm2, %v1867_v21, %v1767_v8  ;;  %v1765_v49 = vpop.permute.xlu0 %1764  ;;  %v7436_v8 = vld [vmem:[%s5792_s19 + $0x99] sm:$0xff] }
 0x1fd   : > { %v1898_v19 = vsel %vm797_vm2, %v1866_v28, %v1765_v49  ;;  %2678 = vrot.lane.b32.xlu1 %v7377_v48, %s5746_s21  ;;  %3877 = vrot.lane.b32.xlu0 %v5193_v36, %s5747_s30 }
 0x1fe   : > { %v1271_v33 = vadd.f32 %v1270_v5, %v1240_v4  ;;  %v5468_v26 = vpop.f32.mrb[16].mxu0  ;;  %5537 = vmatprep.mubr.msk.f32.mxu1 %vm834_vm3, %v1898_v19  ;;  %v1202_v50 = vadd.f32 %v5465_v14, %v1201_v56  ;;  %v7449_v19 = vld [vmem:[%s5792_s19 + $0x91] sm:$0xff] }
 0x1ff   : > { %1173 = vst [vmem:[%s7213_s16 + $0x88] sm:$0xff] %v5468_v26  ;;  %v1077_v24 = vpop.f32.mrb[17].mxu0  ;;  %5538 = vmatmul.mubr.msk.f32.gmra.mrb[26].mxu1 %vm834_vm3, %v1899_v9  ;;  %v1771_v25 = vpop.permute.xlu1 %1770  ;;  %v1243_v0 = vmul.f32 %v5468_v26, %v5468_v26 }
 0x200   : > { %1172 = vst [vmem:[%s7213_s16 + $0x80] sm:$0xff] %v1077_v24  ;;  %v1203_v30 = vadd.f32 %v1202_v50, %v1077_v24  ;;  %v1242_v42 = vmul.f32 %v1077_v24, %v1077_v24  ;;  %v1272_v57 = vadd.f32 %v1271_v33, %v1241_v29  ;;  %v1901_v17 = vsel %vm797_vm2, %v1869_v51, %v1771_v25  ;;  %v1769_v59 = vpop.permute.xlu0 %1768 }
 0x201   : > { %v1900_v37 = vsel %vm797_vm2, %v1868_v40, %v1769_v59  ;;  %2680 = vrot.lane.b32.xlu1 %v7400_v23, %s5746_s21  ;;  %3879 = vrot.lane.b32.xlu0 %v5194_v34, %s5747_s30  ;;  %v5195_v40 = vld [vmem:[%s5792_s19 + $0x92] sm:$0xff] }
 0x202   : > { %v1273_v43 = vadd.f32 %v1272_v57, %v1242_v42  ;;  %v5471_v52 = vpop.f32.mrb[18].mxu0  ;;  %5540 = vmatprep.mubr.msk.f32.mxu1 %vm834_vm3, %v1900_v37  ;;  %v1204_v44 = vadd.f32 %v5468_v26, %v1203_v30  ;;  %v7475_v37 = vld [vmem:[%s5792_s19 + $0xb0] sm:$0xff] }
 0x203   : > { %1175 = vst [vmem:[%s7213_s16 + $0x98] sm:$0xff] %v5471_v52  ;;  %v1087_v22 = vpop.f32.mrb[19].mxu0  ;;  %5541 = vmatmul.mubr.msk.f32.gmra.mrb[28].mxu1 %vm834_vm3, %v1901_v17  ;;  %v1775_v55 = vpop.permute.xlu1 %1774  ;;  %v1245_v21 = vmul.f32 %v5471_v52, %v5471_v52 }
 0x204   : > { %1174 = vst [vmem:[%s7213_s16 + $0x90] sm:$0xff] %v1087_v22  ;;  %v1205_v16 = vadd.f32 %v1204_v44, %v1087_v22  ;;  %v1244_v7 = vmul.f32 %v1087_v22, %v1087_v22  ;;  %v1274_v18 = vadd.f32 %v1273_v43, %v1243_v0  ;;  %v1903_v14 = vsel %vm797_vm2, %v1871_v62, %v1775_v55  ;;  %v1773_v47 = vpop.permute.xlu0 %1772  ;;  %v7488_v22 = vld [vmem:[%s5792_s19 + $0xa9] sm:$0xff] }
 0x205   : > { %v1902_v31 = vsel %vm797_vm2, %v1870_v53, %v1773_v47  ;;  %3625 = vrot.lane.b32.xlu1 %v5193_v36, %s5745_s20  ;;  %2806 = vrot.lane.b32.xlu0 %v7020_v32, %s5747_s30 }
 0x206   : > { %v1275_v1 = vadd.f32 %v1274_v18, %v1244_v7  ;;  %v5474_v28 = vpop.f32.mrb[20].mxu0  ;;  %5543 = vmatprep.mubr.msk.f32.mxu1 %vm834_vm3, %v1902_v31  ;;  %v1206_v41 = vadd.f32 %v5471_v52, %v1205_v16 }
 0x207   : > { %1177 = vst [vmem:[%s7213_s16 + $0xa8] sm:$0xff] %v5474_v28  ;;  %v1097_v56 = vpop.f32.mrb[21].mxu0  ;;  %5544 = vmatmul.mubr.msk.f32.gmra.mrb[30].mxu1 %vm834_vm3, %v1903_v14  ;;  %v7440_v4 = vpop.permute.xlu1 %2536  ;;  %v1247_v49 = vmul.f32 %v5474_v28, %v5474_v28 }
 0x208   : > { %1176 = vst [vmem:[%s7213_s16 + $0xa0] sm:$0xff] %v1097_v56  ;;  %v1207_v36 = vadd.f32 %v1206_v41, %v1097_v56  ;;  %v1246_v32 = vmul.f32 %v1097_v56, %v1097_v56  ;;  %v1276_v5 = vadd.f32 %v1275_v1, %v1245_v21  ;;  %v7443_v9 = vpop.permute.xlu0 %2534  ;;  %v7500_v41 = vld [vmem:[%s5792_s19 + $0xb1] sm:$0xff] }
 0x209   : > { %3627 = vrot.lane.b32.xlu1 %v5194_v34, %s5745_s20  ;;  %2808 = vrot.lane.b32.xlu0 %v7436_v8, %s5747_s30 }
 0x20a   : > { %v1277_v39 = vadd.f32 %v1276_v5, %v1246_v32  ;;  %v5477_v12 = vpop.f32.mrb[22].mxu0  ;;  %v1208_v11 = vadd.f32 %v5474_v28, %v1207_v36 }
 0x20b   : > { %1179 = vst [vmem:[%s7213_s16 + $0xb8] sm:$0xff] %v5477_v12  ;;  %v1107_v61 = vpop.f32.mrb[23].mxu0  ;;  %v7452_v58 = vpop.permute.xlu1 %2540  ;;  %v1249_v50 = vmul.f32 %v5477_v12, %v5477_v12 }
 0x20c   : > { %1178 = vst [vmem:[%s7213_s16 + $0xb0] sm:$0xff] %v1107_v61  ;;  %v1209_v10 = vadd.f32 %v1208_v11, %v1107_v61  ;;  %v1248_v29 = vmul.f32 %v1107_v61, %v1107_v61  ;;  %v1278_v33 = vadd.f32 %v1277_v39, %v1247_v49  ;;  %v7455_v26 = vpop.permute.xlu0 %2538 }
 0x20d   : > { %3755 = vrot.lane.b32.xlu1 %v7436_v8, %s5746_s21  ;;  %3753 = vrot.lane.b32.xlu0 %v7449_v19, %s5746_s21 }
 0x20e   : > { %v1279_v34 = vadd.f32 %v1278_v33, %v1248_v29  ;;  %v5480_v13 = vpop.f32.mrb[24].mxu0  ;;  %v1210_v51 = vadd.f32 %v5477_v12, %v1209_v10 }
 0x20f   : > { %1181 = vst [vmem:[%s7213_s16 + $0xc8] sm:$0xff] %v5480_v13  ;;  %v1117_v24 = vpop.f32.mrb[25].mxu0  ;;  %v7466_v25 = vpop.permute.xlu1 %2544  ;;  %v1251_v59 = vmul.f32 %v5480_v13, %v5480_v13 }
 0x210   : > { %1180 = vst [vmem:[%s7213_s16 + $0xc0] sm:$0xff] %v1117_v24  ;;  %v1211_v30 = vadd.f32 %v1210_v51, %v1117_v24  ;;  %v1250_v42 = vmul.f32 %v1117_v24, %v1117_v24  ;;  %v1280_v57 = vadd.f32 %v1279_v34, %v1249_v50  ;;  %v7469_v17 = vpop.permute.xlu0 %2542  ;;  %v7524_v50 = vld [vmem:[%s5792_s19 + $0xc0] sm:$0xff]  ;;  %v5197_v34 = vld [vmem:[%s5792_s19 + $0xaa] sm:$0xff]  ;;  %v4895_v51 = vld [vmem:[%s5792_s19 + $0x18] sm:$0xff] }
 0x211   : > { %2682 = vrot.lane.b32.xlu1 %v7462_v27, %s5746_s21  ;;  %3881 = vrot.lane.b32.xlu0 %v5195_v40, %s5747_s30  ;;  %v7532_v24 = vld [vmem:[%s5792_s19 + $0xc8] sm:$0xff] }
 0x212   : > { %v1281_v20 = vadd.f32 %v1280_v57, %v1250_v42  ;;  %v5483_v46 = vpop.f32.mrb[26].mxu0  ;;  %v1212_v63 = vadd.f32 %v5480_v13, %v1211_v30  ;;  %v5198_v30 = vld [vmem:[%s5792_s19 + $0xb2] sm:$0xff]  ;;  %v2886_v42 = vsel %vm731_vm0, %v4895_v51, %v7443_v9 }
 0x213   : > { %1183 = vst [vmem:[%s7213_s16 + $0xd8] sm:$0xff] %v5483_v46  ;;  %v1127_v2 = vpop.f32.mrb[27].mxu0  ;;  %v7479_v60 = vpop.permute.xlu1 %2548  ;;  %v1253_v54 = vmul.f32 %v5483_v46, %v5483_v46 }
 0x214   : > { %1182 = vst [vmem:[%s7213_s16 + $0xd0] sm:$0xff] %v1127_v2  ;;  %v1213_v0 = vadd.f32 %v1212_v63, %v1127_v2  ;;  %v1252_v43 = vmul.f32 %v1127_v2, %v1127_v2  ;;  %v1282_v52 = vadd.f32 %v1281_v20, %v1251_v59  ;;  %v7482_v44 = vpop.permute.xlu0 %2546  ;;  %v4896_v59 = vld [vmem:[%s5792_s19 + $0x20] sm:$0xff] }
 0x215   : > { %2684 = vrot.lane.b32.xlu1 %v7475_v37, %s5746_s21  ;;  %3883 = vrot.lane.b32.xlu0 %v5196_v6, %s5747_s30  ;;  %v2887_v9 = vsel %vm731_vm0, %v4896_v59, %v7440_v4 }
 0x216   : > { %v1283_v62 = vadd.f32 %v1282_v52, %v1252_v43  ;;  %v5486_v3 = vpop.f32.mrb[28].mxu0  ;;  %v1214_v53 = vadd.f32 %v5483_v46, %v1213_v0 }
 0x217   : > { %1185 = vst [vmem:[%s7213_s16 + $0xe8] sm:$0xff] %v5486_v3  ;;  %v1137_v55 = vpop.f32.mrb[29].mxu0  ;;  %v7491_v16 = vpop.permute.xlu1 %2552  ;;  %v1255_v31 = vmul.f32 %v5486_v3, %v5486_v3 }
 0x218   : > { %1184 = vst [vmem:[%s7213_s16 + $0xe0] sm:$0xff] %v1137_v55  ;;  %v1215_v7 = vadd.f32 %v1214_v53, %v1137_v55  ;;  %v1254_v18 = vmul.f32 %v1137_v55, %v1137_v55  ;;  %v1284_v14 = vadd.f32 %v1283_v62, %v1253_v54  ;;  %v7494_v47 = vpop.permute.xlu0 %2550  ;;  %v7556_v54 = vld [vmem:[%s5792_s19 + $0xc9] sm:$0xff] }
 0x219   : > { %3629 = vrot.lane.b32.xlu1 %v5195_v40, %s5745_s20  ;;  %2810 = vrot.lane.b32.xlu0 %v7488_v22, %s5747_s30 }
 0x21a   : > { %v1285_v21 = vadd.f32 %v1284_v14, %v1254_v18  ;;  %v5489_v1 = vpop.f32.mrb[30].mxu0  ;;  %v1216_v28 = vadd.f32 %v5486_v3, %v1215_v7  ;;  %v5091_v3 = vld [vmem:[%s5792_s19 + $0x19] sm:$0xff]  ;;  %v5092_v7 = vld [vmem:[%s5792_s19 + $0x21] sm:$0xff] }
 0x21b   : > { %1187 = vst [vmem:[%s7213_s16 + $0xf8] sm:$0xff] %v5489_v1  ;;  %v1147_v56 = vpop.f32.mrb[31].mxu0  ;;  %v7503_v36 = vpop.permute.xlu1 %2556  ;;  %v1257_v12 = vmul.f32 %v5489_v1, %v5489_v1 }
 0x21c   : > { %1186 = vst [vmem:[%s7213_s16 + $0xf0] sm:$0xff] %v1147_v56  ;;  %v1217_v32 = vadd.f32 %v1216_v28, %v1147_v56  ;;  %v1256_v5 = vmul.f32 %v1147_v56, %v1147_v56  ;;  %v1286_v49 = vadd.f32 %v1285_v21, %v1255_v31  ;;  %v7506_v39 = vpop.permute.xlu0 %2554  ;;  %v5199_v21 = vld [vmem:[%s5792_s19 + $0xc2] sm:$0xff] }
 0x21d   : > { %3631 = vrot.lane.b32.xlu1 %v5196_v6, %s5745_s20  ;;  %2812 = vrot.lane.b32.xlu0 %v7500_v41, %s5747_s30  ;;  %v7545_v6 = vld [vmem:[%s5792_s19 + $0xc1] sm:$0xff] }
 0x21e   : > { %v7511_v11 = vadd.f32 %v5489_v1, %v1217_v32  ;;  %v1287_v61 = vadd.f32 %v1286_v49, %v1256_v5  ;;  %v7580_v49 = vld [vmem:[%s5792_s19 + $0xd8] sm:$0xff] }
 0x21f   : > { %v7513_v10 = vpop.permute.xlu1 %2560 }
 0x220   : > { %v7515_v29 = vadd.f32 %v1287_v61, %v1257_v12  ;;  %v7517_v33 = vpop.permute.xlu0 %2558  ;;  %v8641_v12 = vld [vmem:[#allocation69_spill] sm:$0xff] }
 0x221   : > { %3759 = vrot.lane.b32.xlu1 %v7500_v41, %s5746_s21  ;;  %3757 = vrot.lane.b32.xlu0 %v7488_v22, %s5746_s21  ;;  %v2888_v61 = vsel %vm731_vm0, %v8641_v12, %v7455_v26  ;;  %v5718_v26 = vld [vmem:[%s5792_s19 + $0x38] sm:$0xff] }
 0x223   : > { %v2665_v13 = vpop.permute.xlu1 %2664 }
 0x224   : > { %v2663_v40 = vpop.permute.xlu0 %2662  ;;  %v2919_v0 = vsel %vm764_vm1, %v2887_v9, %v2665_v13  ;;  %v7606_v9 = vld [vmem:[%s5792_s19 + $0xd9] sm:$0xff] }
 0x225   : > { %2686 = vrot.lane.b32.xlu1 %v7524_v50, %s5746_s21  ;;  %3885 = vrot.lane.b32.xlu0 %v5197_v34, %s5747_s30  ;;  %v2918_v20 = vsel %vm764_vm1, %v2886_v42, %v2663_v40  ;;  %v5200_v42 = vld [vmem:[%s5792_s19 + $0xca] sm:$0xff] }
 0x227   : > { %v3610_v57 = vpop.permute.xlu1 %3609 }
 0x228   : > { %v2791_v46 = vpop.permute.xlu0 %2790  ;;  %v3961_v53 = vsel %vm731_vm0, %v5091_v3, %v3610_v57  ;;  %v2889_v57 = vsel %vm731_vm0, %v5718_v26, %v7452_v58  ;;  %v7613_v58 = vld [vmem:[%s5792_s19 + $0xe1] sm:$0xff]  ;;  %v5094_v3 = vld [vmem:[%s5792_s19 + $0x39] sm:$0xff] }
 0x229   : > { %v2950_v63 = vsel %vm797_vm2, %v2918_v20, %v2791_v46  ;;  %2688 = vrot.lane.b32.xlu1 %v7532_v24, %s5746_s21  ;;  %3887 = vrot.lane.b32.xlu0 %v5198_v30, %s5747_s30 }
 0x22a   : > { %5554 = vmatprep.mubr.msk.f32.mxu0 %vm834_vm3, %v2950_v63 }
 0x22b   : > { %v3612_v2 = vpop.permute.xlu1 %3611 }
 0x22c   : > { %v2793_v43 = vpop.permute.xlu0 %2792  ;;  %v3962_v1 = vsel %vm731_vm0, %v5092_v7, %v3612_v2 }
 0x22d   : > { %v2951_v52 = vsel %vm797_vm2, %v2919_v0, %v2793_v43  ;;  %3633 = vrot.lane.b32.xlu1 %v5197_v34, %s5745_s20  ;;  %2814 = vrot.lane.b32.xlu0 %v7545_v6, %s5747_s30  ;;  %v5093_v0 = vld [vmem:[%s5792_s19 + $0x31] sm:$0xff] }
 0x22e   : > { %5555 = vmatmul.mubr.msk.f32.vlgmr.msra.gmra.mrb[32].mxu0 %vm834_vm3, %v2951_v52 }
 0x22f   : > { %v3740_v62 = vpop.permute.xlu1 %3739 }
 0x230   : > { %v3738_v4 = vpop.permute.xlu0 %3737  ;;  %v3994_v56 = vsel %vm764_vm1, %v3962_v1, %v3740_v62  ;;  %v5201_v1 = vld [vmem:[%s5792_s19 + $0xda] sm:$0xff] }
 0x231   : > { %3635 = vrot.lane.b32.xlu1 %v5198_v30, %s5745_s20  ;;  %2816 = vrot.lane.b32.xlu0 %v7556_v54, %s5747_s30  ;;  %v3993_v18 = vsel %vm764_vm1, %v3961_v53, %v3738_v4  ;;  %v7593_v30 = vld [vmem:[%s5792_s19 + $0xe0] sm:$0xff] }
 0x233   : > { %v2667_v55 = vpop.permute.xlu1 %2666 }
 0x234   : > { %v3866_v14 = vpop.permute.xlu0 %3865  ;;  %v2920_v13 = vsel %vm764_vm1, %v2888_v61, %v2667_v55 }
 0x235   : > { %v4025_v31 = vsel %vm797_vm2, %v3993_v18, %v3866_v14  ;;  %2562 = vrot.lane.b32.xlu1 %v7545_v6, %s5745_s20  ;;  %3761 = vrot.lane.b32.xlu0 %v7545_v6, %s5746_s21 }
 0x236   : > { %5610 = vmatprep.mubr.msk.f32.mxu1 %vm834_vm3, %v4025_v31 }
 0x237   : > { %v2669_v28 = vpop.permute.xlu1 %2668 }
 0x238   : > { %v3868_v32 = vpop.permute.xlu0 %3867  ;;  %v2921_v20 = vsel %vm764_vm1, %v2889_v57, %v2669_v28  ;;  %v5719_v28 = vld [vmem:[%s5792_s19 + $0x48] sm:$0xff]  ;;  %v7655_v57 = vld [vmem:[%s5792_s19 + $0xf8] sm:$0xff] }
 0x239   : > { %v4026_v5 = vsel %vm797_vm2, %v3994_v56, %v3868_v32  ;;  %3889 = vrot.lane.b32.xlu1 %v5199_v21, %s5747_s30  ;;  %3763 = vrot.lane.b32.xlu0 %v7556_v54, %s5746_s21  ;;  %v2890_v56 = vsel %vm731_vm0, %v5719_v28, %v7469_v17 }
 0x23a   : > { %5611 = vmatmul.mubr.msk.f32.vlgmr.msra.gmra.mrb[32].mxu1 %vm834_vm3, %v4026_v5 }
 0x23b   : > { %v3614_v34 = vpop.permute.xlu1 %3613 }
 0x23c   : > { %v2795_v51 = vpop.permute.xlu0 %2794  ;;  %v3963_v52 = vsel %vm731_vm0, %v5093_v0, %v3614_v34  ;;  %v7642_v34 = vld [vmem:[%s5792_s19 + $0xf0] sm:$0xff] }
 0x23d   : > { %v2952_v40 = vsel %vm797_vm2, %v2920_v13, %v2795_v51  ;;  %2690 = vrot.lane.b32.xlu1 %v7580_v49, %s5746_s21  ;;  %2564 = vrot.lane.b32.xlu0 %v7556_v54, %s5745_s20  ;;  %v5720_v13 = vld [vmem:[%s5792_s19 + $0x50] sm:$0xff] }
 0x23e   : > { %5557 = vmatprep.mubr.msk.f32.mxu0 %vm834_vm3, %v2952_v40  ;;  %v2891_v17 = vsel %vm731_vm0, %v5720_v13, %v7466_v25  ;;  %v7704_v13 = vld [vmem:[%s5792_s19 + $0x108] sm:$0xff] }
 0x23f   : > { %v3616_v59 = vpop.permute.xlu1 %3615 }
 0x240   : > { %v2797_v46 = vpop.permute.xlu0 %2796  ;;  %v3964_v7 = vsel %vm731_vm0, %v5094_v3, %v3616_v59  ;;  %v5202_v59 = vld [vmem:[%s5792_s19 + $0xe2] sm:$0xff] }
 0x241   : > { %v2953_v63 = vsel %vm797_vm2, %v2921_v20, %v2797_v46  ;;  %2692 = vrot.lane.b32.xlu1 %v7593_v30, %s5746_s21  ;;  %3891 = vrot.lane.b32.xlu0 %v5200_v42, %s5747_s30  ;;  %v5095_v20 = vld [vmem:[%s5792_s19 + $0x49] sm:$0xff] }
 0x242   : > { %5558 = vmatmul.mubr.msk.f32.gmra.mrb[34].mxu0 %vm834_vm3, %v2953_v63  ;;  %v7663_v63 = vld [vmem:[%s5792_s19 + $0xf1] sm:$0xff] }
 0x243   : > { %v3744_v2 = vpop.permute.xlu1 %3743 }
 0x244   : > { %v3742_v43 = vpop.permute.xlu0 %3741  ;;  %v3996_v14 = vsel %vm764_vm1, %v3964_v7, %v3744_v2 }
 0x245   : > { %3637 = vrot.lane.b32.xlu1 %v5199_v21, %s5745_s20  ;;  %2818 = vrot.lane.b32.xlu0 %v7606_v9, %s5747_s30  ;;  %v3995_v4 = vsel %vm764_vm1, %v3963_v52, %v3742_v43  ;;  %v5096_v43 = vld [vmem:[%s5792_s19 + $0x51] sm:$0xff] }
 0x247   : > { %v2671_v62 = vpop.permute.xlu1 %2670 }
 0x248   : > { %v3870_v53 = vpop.permute.xlu0 %3869  ;;  %v2922_v5 = vsel %vm764_vm1, %v2890_v56, %v2671_v62 }
 0x249   : > { %v4027_v55 = vsel %vm797_vm2, %v3995_v4, %v3870_v53  ;;  %3639 = vrot.lane.b32.xlu1 %v5200_v42, %s5745_s20  ;;  %2820 = vrot.lane.b32.xlu0 %v7613_v58, %s5747_s30  ;;  %v7674_v4 = vld [vmem:[%s5792_s19 + $0xf9] sm:$0xff] }
 0x24a   : > { %5613 = vmatprep.mubr.msk.f32.mxu1 %vm834_vm3, %v4027_v55 }
 0x24b   : > { %v2673_v18 = vpop.permute.xlu1 %2672 }
 0x24c   : > { %v3872_v31 = vpop.permute.xlu0 %3871  ;;  %v2923_v40 = vsel %vm764_vm1, %v2891_v17, %v2673_v18 }
 0x24d   : > { %v4028_v21 = vsel %vm797_vm2, %v3996_v14, %v3872_v31  ;;  %2566 = vrot.lane.b32.xlu1 %v7606_v9, %s5745_s20  ;;  %3765 = vrot.lane.b32.xlu0 %v7606_v9, %s5746_s21  ;;  %v2892_v31 = vsel %vm731_vm0, %v7161_v15, %v7482_v44  ;;  %v2893_v15 = vsel %vm731_vm0, %v7182_v35, %v7479_v60  ;;  %v7712_v60 = vld [vmem:[%s5792_s19 + $0x110] sm:$0xff] }
 0x24e   : > { %5614 = vmatmul.mubr.msk.f32.gmra.mrb[34].mxu1 %vm834_vm3, %v4028_v21 }
 0x24f   : > { %v3618_v32 = vpop.permute.xlu1 %3617 }
 0x250   : > { %v2799_v12 = vpop.permute.xlu0 %2798  ;;  %v3965_v2 = vsel %vm731_vm0, %v5095_v20, %v3618_v32  ;;  %v5203_v32 = vld [vmem:[%s5792_s19 + $0xf2] sm:$0xff] }
 0x251   : > { %v2954_v61 = vsel %vm797_vm2, %v2922_v5, %v2799_v12  ;;  %3893 = vrot.lane.b32.xlu1 %v5201_v1, %s5747_s30  ;;  %3767 = vrot.lane.b32.xlu0 %v7613_v58, %s5746_s21 }
 0x252   : > { %5560 = vmatprep.mubr.msk.f32.mxu0 %vm834_vm3, %v2954_v61 }
 0x253   : > { %v3620_v51 = vpop.permute.xlu1 %3619 }
 0x254   : > { %v2801_v42 = vpop.permute.xlu0 %2800  ;;  %v3966_v53 = vsel %vm731_vm0, %v5096_v43, %v3620_v51  ;;  %v5097_v51 = vld [vmem:[%s5792_s19 + $0x61] sm:$0xff] }
 0x255   : > { %v2955_v26 = vsel %vm797_vm2, %v2923_v40, %v2801_v42  ;;  %2694 = vrot.lane.b32.xlu1 %v7642_v34, %s5746_s21  ;;  %2568 = vrot.lane.b32.xlu0 %v7613_v58, %s5745_s20  ;;  %v5204_v40 = vld [vmem:[%s5792_s19 + $0xfa] sm:$0xff] }
 0x256   : > { %5561 = vmatmul.mubr.msk.f32.gmra.mrb[36].mxu0 %vm834_vm3, %v2955_v26 }
 0x257   : > { %v3748_v25 = vpop.permute.xlu1 %3747 }
 0x258   : > { %v3746_v46 = vpop.permute.xlu0 %3745  ;;  %v3998_v7 = vsel %vm764_vm1, %v3966_v53, %v3748_v25  ;;  %v7734_v53 = vld [vmem:[%s5792_s19 + $0x111] sm:$0xff] }
 0x259   : > { %2696 = vrot.lane.b32.xlu1 %v7655_v57, %s5746_s21  ;;  %3895 = vrot.lane.b32.xlu0 %v5202_v59, %s5747_s30  ;;  %v3997_v52 = vsel %vm764_vm1, %v3965_v2, %v3746_v46  ;;  %v7724_v2 = vld [vmem:[%s5792_s19 + $0x109] sm:$0xff] }
 0x25b   : > { %v2675_v0 = vpop.permute.xlu1 %2674 }
 0x25c   : > { %v3874_v62 = vpop.permute.xlu0 %3873 }
 0x25d   : > { %v4029_v3 = vsel %vm797_vm2, %v3997_v52, %v3874_v62  ;;  %3641 = vrot.lane.b32.xlu1 %v5201_v1, %s5745_s20  ;;  %2822 = vrot.lane.b32.xlu0 %v7663_v63, %s5747_s30  ;;  %v2924_v1 = vsel %vm764_vm1, %v2892_v31, %v2675_v0 }
 0x25e   : > { %5616 = vmatprep.mubr.msk.f32.mxu1 %vm834_vm3, %v4029_v3 }
 0x25f   : > { %v2677_v55 = vpop.permute.xlu1 %2676 }
 0x260   : > { %v3876_v18 = vpop.permute.xlu0 %3875  ;;  %v2925_v5 = vsel %vm764_vm1, %v2893_v15, %v2677_v55  ;;  %v2894_v55 = vsel %vm731_vm0, %v7266_v38, %v7494_v47  ;;  %v2895_v38 = vsel %vm731_vm0, %v7292_v45, %v7491_v16  ;;  %v5099_v45 = vld [vmem:[%s5792_s19 + $0x79] sm:$0xff] }
 0x261   : > { %v4030_v14 = vsel %vm797_vm2, %v3998_v7, %v3876_v18  ;;  %3643 = vrot.lane.b32.xlu1 %v5202_v59, %s5745_s20  ;;  %2824 = vrot.lane.b32.xlu0 %v7674_v4, %s5747_s30  ;;  %v5098_v59 = vld [vmem:[%s5792_s19 + $0x69] sm:$0xff]  ;;  %v7761_v15 = vld [vmem:[%s5792_s19 + $0x120] sm:$0xff] }
 0x262   : > { %5617 = vmatmul.mubr.msk.f32.gmra.mrb[36].mxu1 %vm834_vm3, %v4030_v14 }
 0x263   : > { %v3622_v21 = vpop.permute.xlu1 %3621 }
 0x264   : > { %v2803_v28 = vpop.permute.xlu0 %2802  ;;  %v3967_v42 = vsel %vm731_vm0, %v5097_v51, %v3622_v21 }
 0x265   : > { %v2956_v56 = vsel %vm797_vm2, %v2924_v1, %v2803_v28  ;;  %2570 = vrot.lane.b32.xlu1 %v7663_v63, %s5745_s20  ;;  %3769 = vrot.lane.b32.xlu0 %v7663_v63, %s5746_s21 }
 0x266   : > { %5563 = vmatprep.mubr.msk.f32.mxu0 %vm834_vm3, %v2956_v56  ;;  %v5205_v56 = vld [vmem:[%s5792_s19 + $0x10a] sm:$0xff] }
 0x267   : > { %v3624_v44 = vpop.permute.xlu1 %3623 }
 0x268   : > { %v2805_v12 = vpop.permute.xlu0 %2804  ;;  %v3968_v0 = vsel %vm731_vm0, %v5098_v59, %v3624_v44 }
 0x269   : > { %v2957_v61 = vsel %vm797_vm2, %v2925_v5, %v2805_v12  ;;  %3897 = vrot.lane.b32.xlu1 %v5203_v32, %s5747_s30  ;;  %3771 = vrot.lane.b32.xlu0 %v7674_v4, %s5746_s21  ;;  %v5100_v12 = vld [vmem:[%s5792_s19 + $0x81] sm:$0xff] }
 0x26a   : > { %5564 = vmatmul.mubr.msk.f32.gmra.mrb[38].mxu0 %vm834_vm3, %v2957_v61 }
 0x26b   : > { %v3752_v17 = vpop.permute.xlu1 %3751 }
 0x26c   : > { %v3750_v35 = vpop.permute.xlu0 %3749  ;;  %v4000_v52 = vsel %vm764_vm1, %v3968_v0, %v3752_v17  ;;  %v2896_v0 = vsel %vm731_vm0, %v7377_v48, %v7506_v39  ;;  %v2897_v48 = vsel %vm731_vm0, %v7400_v23, %v7503_v36  ;;  %v5207_v23 = vld [vmem:[%s5792_s19 + $0x122] sm:$0xff] }
 0x26d   : > { %2698 = vrot.lane.b32.xlu1 %v7704_v13, %s5746_s21  ;;  %2572 = vrot.lane.b32.xlu0 %v7674_v4, %s5745_s20  ;;  %v3999_v25 = vsel %vm764_vm1, %v3967_v42, %v3750_v35  ;;  %v7773_v35 = vld [vmem:[%s5792_s19 + $0x128] sm:$0xff] }
 0x26f   : > { %v2679_v26 = vpop.permute.xlu1 %2678 }
 0x270   : > { %v3878_v20 = vpop.permute.xlu0 %3877  ;;  %v2926_v18 = vsel %vm764_vm1, %v2894_v55, %v2679_v26  ;;  %v7796_v55 = vld [vmem:[%s5792_s19 + $0x129] sm:$0xff] }
 0x271   : > { %v4031_v46 = vsel %vm797_vm2, %v3999_v25, %v3878_v20  ;;  %2700 = vrot.lane.b32.xlu1 %v7712_v60, %s5746_s21  ;;  %3899 = vrot.lane.b32.xlu0 %v5204_v40, %s5747_s30 }
 0x272   : > { %5619 = vmatprep.mubr.msk.f32.mxu1 %vm834_vm3, %v4031_v46  ;;  %v7784_v46 = vld [vmem:[%s5792_s19 + $0x121] sm:$0xff] }
 0x273   : > { %v2681_v43 = vpop.permute.xlu1 %2680 }
 0x274   : > { %v3880_v62 = vpop.permute.xlu0 %3879  ;;  %v2927_v21 = vsel %vm764_vm1, %v2895_v38, %v2681_v43 }
 0x275   : > { %v4032_v3 = vsel %vm797_vm2, %v4000_v52, %v3880_v62  ;;  %3645 = vrot.lane.b32.xlu1 %v5203_v32, %s5745_s20  ;;  %2826 = vrot.lane.b32.xlu0 %v7724_v2, %s5747_s30 }
 0x276   : > { %5620 = vmatmul.mubr.msk.f32.gmra.mrb[38].mxu1 %vm834_vm3, %v4032_v3 }
 0x277   : > { %v3626_v7 = vpop.permute.xlu1 %3625 }
 0x278   : > { %v2807_v14 = vpop.permute.xlu0 %2806  ;;  %v3969_v44 = vsel %vm731_vm0, %v5099_v45, %v3626_v7 }
 0x279   : > { %v2958_v31 = vsel %vm797_vm2, %v2926_v18, %v2807_v14  ;;  %3647 = vrot.lane.b32.xlu1 %v5204_v40, %s5745_s20  ;;  %2828 = vrot.lane.b32.xlu0 %v7734_v53, %s5747_s30  ;;  %v5206_v40 = vld [vmem:[%s5792_s19 + $0x112] sm:$0xff] }
 0x27a   : > { %5566 = vmatprep.mubr.msk.f32.mxu0 %vm834_vm3, %v2958_v31 }
 0x27b   : > { %v3628_v47 = vpop.permute.xlu1 %3627 }
 0x27c   : > { %v2809_v1 = vpop.permute.xlu0 %2808  ;;  %v3970_v42 = vsel %vm731_vm0, %v5100_v12, %v3628_v47  ;;  %v7833_v12 = vld [vmem:[%s5792_s19 + $0x140] sm:$0xff] }
 0x27d   : > { %v2959_v28 = vsel %vm797_vm2, %v2927_v21, %v2809_v1  ;;  %2574 = vrot.lane.b32.xlu1 %v7724_v2, %s5745_s20  ;;  %3773 = vrot.lane.b32.xlu0 %v7724_v2, %s5746_s21 }
 0x27e   : > { %5567 = vmatmul.mubr.msk.f32.gmra.mrb[40].mxu0 %vm834_vm3, %v2959_v28 }
 0x27f   : > { %v3756_v32 = vpop.permute.xlu1 %3755 }
 0x280   : > { %v3754_v16 = vpop.permute.xlu0 %3753  ;;  %v4002_v59 = vsel %vm764_vm1, %v3970_v42, %v3756_v32 }
 0x281   : > { %3901 = vrot.lane.b32.xlu1 %v5205_v56, %s5747_s30  ;;  %3775 = vrot.lane.b32.xlu0 %v7734_v53, %s5746_s21  ;;  %v4001_v61 = vsel %vm764_vm1, %v3969_v44, %v3754_v16 }
 0x283   : > { %v2683_v5 = vpop.permute.xlu1 %2682 }
 0x284   : > { %v3882_v17 = vpop.permute.xlu0 %3881  ;;  %v2928_v52 = vsel %vm764_vm1, %v2896_v0, %v2683_v5  ;;  %v7848_v0 = vld [vmem:[%s5792_s19 + $0x139] sm:$0xff] }
 0x285   : > { %v4033_v51 = vsel %vm797_vm2, %v4001_v61, %v3882_v17  ;;  %2702 = vrot.lane.b32.xlu1 %v7761_v15, %s5746_s21  ;;  %2576 = vrot.lane.b32.xlu0 %v7734_v53, %s5745_s20  ;;  %v5208_v61 = vld [vmem:[%s5792_s19 + $0x12a] sm:$0xff] }
 0x286   : > { %5622 = vmatprep.mubr.msk.f32.mxu1 %vm834_vm3, %v4033_v51 }
 0x287   : > { %v2685_v26 = vpop.permute.xlu1 %2684 }
 0x288   : > { %v3884_v25 = vpop.permute.xlu0 %3883  ;;  %v2929_v7 = vsel %vm764_vm1, %v2897_v48, %v2685_v26 }
 0x289   : > { %v4034_v20 = vsel %vm797_vm2, %v4002_v59, %v3884_v25  ;;  %2704 = vrot.lane.b32.xlu1 %v7773_v35, %s5746_s21  ;;  %3903 = vrot.lane.b32.xlu0 %v5206_v40, %s5747_s30 }
 0x28a   : > { %5623 = vmatmul.mubr.msk.f32.gmra.mrb[40].mxu1 %vm834_vm3, %v4034_v20 }
 0x28b   : > { %v3630_v43 = vpop.permute.xlu1 %3629 }
 0x28c   : > { %v2811_v62 = vpop.permute.xlu0 %2810  ;;  %v3971_v36 = vsel %vm731_vm0, %v7449_v19, %v3630_v43  ;;  %v2899_v43 = vsel %vm731_vm0, %v7475_v37, %v7513_v10 }
 0x28d   : > { %v2960_v3 = vsel %vm797_vm2, %v2928_v52, %v2811_v62  ;;  %3649 = vrot.lane.b32.xlu1 %v5205_v56, %s5745_s20  ;;  %2830 = vrot.lane.b32.xlu0 %v7784_v46, %s5747_s30  ;;  %v7821_v56 = vld [vmem:[%s5792_s19 + $0x138] sm:$0xff] }
 0x28e   : > { %5569 = vmatprep.mubr.msk.f32.mxu0 %vm834_vm3, %v2960_v3 }
 0x28f   : > { %v3632_v39 = vpop.permute.xlu1 %3631 }
 0x290   : > { %v2813_v18 = vpop.permute.xlu0 %2812  ;;  %v3972_v19 = vsel %vm731_vm0, %v7436_v8, %v3632_v39  ;;  %v2898_v8 = vsel %vm731_vm0, %v7462_v27, %v7517_v33 }
 0x291   : > { %v2961_v14 = vsel %vm797_vm2, %v2929_v7, %v2813_v18  ;;  %3651 = vrot.lane.b32.xlu1 %v5206_v40, %s5745_s20  ;;  %2832 = vrot.lane.b32.xlu0 %v7796_v55, %s5747_s30 }
 0x292   : > { %5570 = vmatmul.mubr.msk.f32.gmra.mrb[42].mxu0 %vm834_vm3, %v2961_v14 }
 0x293   : > { %v3760_v31 = vpop.permute.xlu1 %3759 }
 0x294   : > { %v3758_v38 = vpop.permute.xlu0 %3757  ;;  %v4004_v45 = vsel %vm764_vm1, %v3972_v19, %v3760_v31 }
 0x295   : > { %2578 = vrot.lane.b32.xlu1 %v7784_v46, %s5745_s20  ;;  %3777 = vrot.lane.b32.xlu0 %v7784_v46, %s5746_s21  ;;  %v4003_v21 = vsel %vm764_vm1, %v3971_v36, %v3758_v38  ;;  %v7864_v38 = vld [vmem:[%s5792_s19 + $0x141] sm:$0xff] }
 0x297   : > { %v2687_v47 = vpop.permute.xlu1 %2686 }
 0x298   : > { %v3886_v1 = vpop.permute.xlu0 %3885  ;;  %v2930_v42 = vsel %vm764_vm1, %v2898_v8, %v2687_v47 }
 0x299   : > { %v4035_v28 = vsel %vm797_vm2, %v4003_v21, %v3886_v1  ;;  %3905 = vrot.lane.b32.xlu1 %v5207_v23, %s5747_s30  ;;  %3779 = vrot.lane.b32.xlu0 %v7796_v55, %s5746_s21 }
 0x29a   : > { %5625 = vmatprep.mubr.msk.f32.mxu1 %vm834_vm3, %v4035_v28 }
 0x29b   : > { %v2689_v32 = vpop.permute.xlu1 %2688 }
 0x29c   : > { %v3888_v16 = vpop.permute.xlu0 %3887  ;;  %v2931_v3 = vsel %vm764_vm1, %v2899_v43, %v2689_v32 }
 0x29d   : > { %v4036_v44 = vsel %vm797_vm2, %v4004_v45, %v3888_v16  ;;  %2706 = vrot.lane.b32.xlu1 %v7821_v56, %s5746_s21  ;;  %2580 = vrot.lane.b32.xlu0 %v7796_v55, %s5745_s20 }
 0x29e   : > { %v5500_v5 = vpop.f32.mrb[0].mxu1  ;;  %5626 = vmatmul.mubr.msk.f32.gmra.mrb[42].mxu1 %vm834_vm3, %v4036_v44 }
 0x29f   : > { %4864 = vst [vmem:[%s7213_s16 + $0x108] sm:$0xff] %v5500_v5  ;;  %v2302_v17 = vmul.f32 %v5500_v5, %v5500_v5  ;;  %v2071_v51 = vpop.f32.mrb[1].mxu1  ;;  %v3634_v40 = vpop.permute.xlu1 %3633 }
 0x2a0   : > { %4863 = vst [vmem:[%s7213_s16 + $0x100] sm:$0xff] %v2071_v51  ;;  %v2263_v26 = vadd.f32 %v5500_v5, %v2071_v51  ;;  %v2301_v59 = vmul.f32 %v2071_v51, %v2071_v51  ;;  %v2815_v25 = vpop.permute.xlu0 %2814  ;;  %v3973_v19 = vsel %vm731_vm0, %v7488_v22, %v3634_v40 }
 0x2a1   : > { %v2962_v20 = vsel %vm797_vm2, %v2930_v42, %v2815_v25  ;;  %2708 = vrot.lane.b32.xlu1 %v7833_v12, %s5746_s21  ;;  %3907 = vrot.lane.b32.xlu0 %v5208_v61, %s5747_s30 }
 0x2a2   : > { %v2333_v27 = vadd.f32 %v2302_v17, %v2301_v59  ;;  %v5503_v33 = vpop.f32.mrb[2].mxu1  ;;  %5572 = vmatprep.mubr.msk.f32.mxu0 %vm834_vm3, %v2962_v20 }
 0x2a3   : > { %4866 = vst [vmem:[%s7213_s16 + $0x118] sm:$0xff] %v5503_v33  ;;  %v2081_v52 = vpop.f32.mrb[3].mxu1  ;;  %v7854_v62 = vpop.permute.xlu1 %3635  ;;  %v2304_v37 = vmul.f32 %v5503_v33, %v5503_v33 }
 0x2a4   : > { %4865 = vst [vmem:[%s7213_s16 + $0x110] sm:$0xff] %v2081_v52  ;;  %v2264_v48 = vadd.f32 %v2263_v26, %v2081_v52  ;;  %v2303_v39 = vmul.f32 %v2081_v52, %v2081_v52  ;;  %v2817_v7 = vpop.permute.xlu0 %2816 }
 0x2a5   : > { %v2963_v18 = vsel %vm797_vm2, %v2931_v3, %v2817_v7  ;;  %3653 = vrot.lane.b32.xlu1 %v5207_v23, %s5745_s20  ;;  %2834 = vrot.lane.b32.xlu0 %v7848_v0, %s5747_s30 }
 0x2a6   : > { %v2334_v10 = vadd.f32 %v2333_v27, %v2303_v39  ;;  %v5506_v14 = vpop.f32.mrb[4].mxu1  ;;  %5573 = vmatmul.mubr.msk.f32.gmra.mrb[44].mxu0 %vm834_vm3, %v2963_v18  ;;  %v2265_v31 = vadd.f32 %v5503_v33, %v2264_v48  ;;  %v7885_v27 = vld [vmem:[%s5792_s19 + $0x13a] sm:$0xff] }
 0x2a7   : > { %4868 = vst [vmem:[%s7213_s16 + $0x128] sm:$0xff] %v5506_v14  ;;  %v2091_v36 = vpop.f32.mrb[5].mxu1  ;;  %v7867_v47 = vpop.permute.xlu1 %2562  ;;  %v2306_v32 = vmul.f32 %v5506_v14, %v5506_v14 }
 0x2a8   : > { %4867 = vst [vmem:[%s7213_s16 + $0x120] sm:$0xff] %v2091_v36  ;;  %v2266_v21 = vadd.f32 %v2265_v31, %v2091_v36  ;;  %v2305_v23 = vmul.f32 %v2091_v36, %v2091_v36  ;;  %v2335_v1 = vadd.f32 %v2334_v10, %v2304_v37  ;;  %v3762_v28 = vpop.permute.xlu0 %3761  ;;  %v3974_v31 = vsel %vm731_vm0, %v7500_v41, %v7854_v62 }
 0x2a9   : > { %3655 = vrot.lane.b32.xlu1 %v5208_v61, %s5745_s20  ;;  %2836 = vrot.lane.b32.xlu0 %v7864_v38, %s5747_s30  ;;  %v4005_v5 = vsel %vm764_vm1, %v3973_v19, %v3762_v28 }
 0x2aa   : > { %v2336_v45 = vadd.f32 %v2335_v1, %v2305_v23  ;;  %v5509_v16 = vpop.f32.mrb[6].mxu1  ;;  %v2267_v44 = vadd.f32 %v5506_v14, %v2266_v21  ;;  %v7894_v14 = vld [vmem:[%s5792_s19 + $0x150] sm:$0xff] }
 0x2ab   : > { %4870 = vst [vmem:[%s7213_s16 + $0x138] sm:$0xff] %v5509_v16  ;;  %v2101_v8 = vpop.f32.mrb[7].mxu1  ;;  %v3890_v17 = vpop.permute.xlu1 %3889  ;;  %v2308_v22 = vmul.f32 %v5509_v16, %v5509_v16 }
 0x2ac   : > { %4869 = vst [vmem:[%s7213_s16 + $0x130] sm:$0xff] %v2101_v8  ;;  %v2268_v51 = vadd.f32 %v2267_v44, %v2101_v8  ;;  %v2307_v61 = vmul.f32 %v2101_v8, %v2101_v8  ;;  %v2337_v42 = vadd.f32 %v2336_v45, %v2306_v32  ;;  %v4037_v26 = vsel %vm797_vm2, %v4005_v5, %v3890_v17  ;;  %v3764_v59 = vpop.permute.xlu0 %3763  ;;  %v7909_v5 = vld [vmem:[%s5792_s19 + $0x158] sm:$0xff]  ;;  %v5210_v8 = vld [vmem:[%s5792_s19 + $0x142] sm:$0xff] }
 0x2ad   : > { %2582 = vrot.lane.b32.xlu1 %v7848_v0, %s5745_s20  ;;  %3781 = vrot.lane.b32.xlu0 %v7848_v0, %s5746_s21  ;;  %v4006_v23 = vsel %vm764_vm1, %v3974_v31, %v3764_v59  ;;  %v2900_v17 = vsel %vm731_vm0, %v7524_v50, %v7867_v47 }
 0x2ae   : > { %v2338_v40 = vadd.f32 %v2337_v42, %v2307_v61  ;;  %v5512_v25 = vpop.f32.mrb[8].mxu1  ;;  %5628 = vmatprep.mubr.msk.f32.mxu1 %vm834_vm3, %v4037_v26  ;;  %v2269_v20 = vadd.f32 %v5509_v16, %v2268_v51 }
 0x2af   : > { %4872 = vst [vmem:[%s7213_s16 + $0x148] sm:$0xff] %v5512_v25  ;;  %v2111_v33 = vpop.f32.mrb[9].mxu1  ;;  %v2691_v43 = vpop.permute.xlu1 %2690  ;;  %v2310_v7 = vmul.f32 %v5512_v25, %v5512_v25 }
 0x2b0   : > { %4871 = vst [vmem:[%s7213_s16 + $0x140] sm:$0xff] %v2111_v33  ;;  %v2270_v52 = vadd.f32 %v2269_v20, %v2111_v33  ;;  %v2309_v3 = vmul.f32 %v2111_v33, %v2111_v33  ;;  %v2339_v48 = vadd.f32 %v2338_v40, %v2308_v22  ;;  %v2565_v39 = vpop.permute.xlu0 %2564  ;;  %v2932_v42 = vsel %vm764_vm1, %v2900_v17, %v2691_v43  ;;  %v7924_v43 = vld [vmem:[%s5792_s19 + $0x151] sm:$0xff] }
 0x2b1   : > { %3909 = vrot.lane.b32.xlu1 %v7885_v27, %s5747_s30  ;;  %3783 = vrot.lane.b32.xlu0 %v7864_v38, %s5746_s21 }
 0x2b2   : > { %v2340_v18 = vadd.f32 %v2339_v48, %v2309_v3  ;;  %v5515_v37 = vpop.f32.mrb[10].mxu1  ;;  %v2271_v10 = vadd.f32 %v5512_v25, %v2270_v52  ;;  %v2901_v52 = vsel %vm731_vm0, %v7532_v24, %v2565_v39 }
 0x2b3   : > { %4874 = vst [vmem:[%s7213_s16 + $0x158] sm:$0xff] %v5515_v37  ;;  %v2121_v36 = vpop.f32.mrb[11].mxu1  ;;  %v2693_v21 = vpop.permute.xlu1 %2692  ;;  %v2312_v41 = vmul.f32 %v5515_v37, %v5515_v37 }
 0x2b4   : > { %4873 = vst [vmem:[%s7213_s16 + $0x150] sm:$0xff] %v2121_v36  ;;  %v2272_v1 = vadd.f32 %v2271_v10, %v2121_v36  ;;  %v2311_v28 = vmul.f32 %v2121_v36, %v2121_v36  ;;  %v2341_v19 = vadd.f32 %v2340_v18, %v2310_v7  ;;  %v3892_v32 = vpop.permute.xlu0 %3891  ;;  %v2933_v7 = vsel %vm764_vm1, %v2901_v52, %v2693_v21 }
 0x2b5   : > { %v4038_v45 = vsel %vm797_vm2, %v4006_v23, %v3892_v32  ;;  %2710 = vrot.lane.b32.xlu1 %v7894_v14, %s5746_s21  ;;  %2584 = vrot.lane.b32.xlu0 %v7864_v38, %s5745_s20 }
 0x2b6   : > { %v2342_v62 = vadd.f32 %v2341_v19, %v2311_v28  ;;  %v5518_v16 = vpop.f32.mrb[12].mxu1  ;;  %5629 = vmatmul.mubr.msk.f32.gmra.mrb[44].mxu1 %vm834_vm3, %v4038_v45  ;;  %v2273_v44 = vadd.f32 %v5515_v37, %v2272_v1  ;;  %v7940_v1 = vld [vmem:[%s5792_s19 + $0x159] sm:$0xff] }
 0x2b7   : > { %4876 = vst [vmem:[%s7213_s16 + $0x168] sm:$0xff] %v5518_v16  ;;  %v2131_v51 = vpop.f32.mrb[13].mxu1  ;;  %v3638_v61 = vpop.permute.xlu1 %3637  ;;  %v2314_v50 = vmul.f32 %v5518_v16, %v5518_v16 }
 0x2b8   : > { %4875 = vst [vmem:[%s7213_s16 + $0x160] sm:$0xff] %v2131_v51  ;;  %v2274_v26 = vadd.f32 %v2273_v44, %v2131_v51  ;;  %v2313_v59 = vmul.f32 %v2131_v51, %v2131_v51  ;;  %v2343_v22 = vadd.f32 %v2342_v62, %v2312_v41  ;;  %v2819_v40 = vpop.permute.xlu0 %2818  ;;  %v3975_v62 = vsel %vm731_vm0, %v7545_v6, %v3638_v61 }
 0x2b9   : > { %v2964_v25 = vsel %vm797_vm2, %v2932_v42, %v2819_v40  ;;  %2712 = vrot.lane.b32.xlu1 %v7909_v5, %s5746_s21  ;;  %3911 = vrot.lane.b32.xlu0 %v5210_v8, %s5747_s30 }
 0x2ba   : > { %v2344_v47 = vadd.f32 %v2343_v22, %v2313_v59  ;;  %v5521_v20 = vpop.f32.mrb[14].mxu1  ;;  %5575 = vmatprep.mubr.msk.f32.mxu0 %vm834_vm3, %v2964_v25  ;;  %v2275_v33 = vadd.f32 %v5518_v16, %v2274_v26 }
 0x2bb   : > { %4878 = vst [vmem:[%s7213_s16 + $0x178] sm:$0xff] %v5521_v20  ;;  %v2141_v3 = vpop.f32.mrb[15].mxu1  ;;  %v7929_v48 = vpop.permute.xlu1 %3639  ;;  %v2316_v24 = vmul.f32 %v5521_v20, %v5521_v20 }
 0x2bc   : > { %4877 = vst [vmem:[%s7213_s16 + $0x170] sm:$0xff] %v2141_v3  ;;  %v2276_v18 = vadd.f32 %v2275_v33, %v2141_v3  ;;  %v2315_v37 = vmul.f32 %v2141_v3, %v2141_v3  ;;  %v2345_v10 = vadd.f32 %v2344_v47, %v2314_v50  ;;  %v2821_v31 = vpop.permute.xlu0 %2820  ;;  %v7961_v33 = vld [vmem:[%s5792_s19 + $0x152] sm:$0xff] }
 0x2bd   : > { %v2965_v36 = vsel %vm797_vm2, %v2933_v7, %v2821_v31  ;;  %3657 = vrot.lane.b32.xlu1 %v7885_v27, %s5745_s20  ;;  %2838 = vrot.lane.b32.xlu0 %v7924_v43, %s5747_s30 }
 0x2be   : > { %v2346_v39 = vadd.f32 %v2345_v10, %v2315_v37  ;;  %v5524_v23 = vpop.f32.mrb[16].mxu1  ;;  %5576 = vmatmul.mubr.msk.f32.gmra.mrb[46].mxu0 %vm834_vm3, %v2965_v36  ;;  %v2277_v21 = vadd.f32 %v5521_v20, %v2276_v18 }
 0x2bf   : > { %4880 = vst [vmem:[%s7213_s16 + $0x188] sm:$0xff] %v5524_v23  ;;  %v2151_v28 = vpop.f32.mrb[17].mxu1  ;;  %v7943_v19 = vpop.permute.xlu1 %2566  ;;  %v2318_v16 = vmul.f32 %v5524_v23, %v5524_v23 }
 0x2c0   : > { %4879 = vst [vmem:[%s7213_s16 + $0x180] sm:$0xff] %v2151_v28  ;;  %v2278_v32 = vadd.f32 %v2277_v21, %v2151_v28  ;;  %v2317_v27 = vmul.f32 %v2151_v28, %v2151_v28  ;;  %v2347_v45 = vadd.f32 %v2346_v39, %v2316_v24  ;;  %v3766_v41 = vpop.permute.xlu0 %3765  ;;  %v3976_v21 = vsel %vm731_vm0, %v7556_v54, %v7929_v48 }
 0x2c1   : > { %3659 = vrot.lane.b32.xlu1 %v5210_v8, %s5745_s20  ;;  %2840 = vrot.lane.b32.xlu0 %v7940_v1, %s5747_s30  ;;  %v4007_v42 = vsel %vm764_vm1, %v3975_v62, %v3766_v41 }
 0x2c2   : > { %v2348_v44 = vadd.f32 %v2347_v45, %v2317_v27  ;;  %v5527_v17 = vpop.f32.mrb[18].mxu1  ;;  %v2279_v51 = vadd.f32 %v5524_v23, %v2278_v32  ;;  %v7970_v23 = vld [vmem:[%s5792_s19 + $0x168] sm:$0xff] }
 0x2c3   : > { %4882 = vst [vmem:[%s7213_s16 + $0x198] sm:$0xff] %v5527_v17  ;;  %v2161_v26 = vpop.f32.mrb[19].mxu1  ;;  %v3894_v59 = vpop.permute.xlu1 %3893  ;;  %v2320_v6 = vmul.f32 %v5527_v17, %v5527_v17 }
 0x2c4   : > { %4881 = vst [vmem:[%s7213_s16 + $0x190] sm:$0xff] %v2161_v26  ;;  %v2280_v22 = vadd.f32 %v2279_v51, %v2161_v26  ;;  %v2319_v8 = vmul.f32 %v2161_v26, %v2161_v26  ;;  %v2349_v40 = vadd.f32 %v2348_v44, %v2318_v16  ;;  %v4039_v25 = vsel %vm797_vm2, %v4007_v42, %v3894_v59  ;;  %v3768_v50 = vpop.permute.xlu0 %3767  ;;  %v7985_v42 = vld [vmem:[%s5792_s19 + $0x170] sm:$0xff]  ;;  %v5212_v26 = vld [vmem:[%s5792_s19 + $0x15a] sm:$0xff] }
 0x2c5   : > { %2586 = vrot.lane.b32.xlu1 %v7924_v43, %s5745_s20  ;;  %3785 = vrot.lane.b32.xlu0 %v7924_v43, %s5746_s21  ;;  %v4008_v27 = vsel %vm764_vm1, %v3976_v21, %v3768_v50  ;;  %v2902_v59 = vsel %vm731_vm0, %v7580_v49, %v7943_v19 }
 0x2c6   : > { %v2350_v61 = vadd.f32 %v2349_v40, %v2319_v8  ;;  %v5530_v47 = vpop.f32.mrb[20].mxu1  ;;  %5631 = vmatprep.mubr.msk.f32.mxu1 %vm834_vm3, %v4039_v25  ;;  %v2281_v20 = vadd.f32 %v5527_v17, %v2280_v22 }
 0x2c7   : > { %4884 = vst [vmem:[%s7213_s16 + $0x1a8] sm:$0xff] %v5530_v47  ;;  %v2171_v52 = vpop.f32.mrb[21].mxu1  ;;  %v2695_v3 = vpop.permute.xlu1 %2694  ;;  %v2322_v31 = vmul.f32 %v5530_v47, %v5530_v47 }
 0x2c8   : > { %4883 = vst [vmem:[%s7213_s16 + $0x1a0] sm:$0xff] %v2171_v52  ;;  %v2282_v7 = vadd.f32 %v2281_v20, %v2171_v52  ;;  %v2321_v18 = vmul.f32 %v2171_v52, %v2171_v52  ;;  %v2351_v37 = vadd.f32 %v2350_v61, %v2320_v6  ;;  %v2569_v10 = vpop.permute.xlu0 %2568  ;;  %v2934_v40 = vsel %vm764_vm1, %v2902_v59, %v2695_v3  ;;  %v8000_v3 = vld [vmem:[%s5792_s19 + $0x169] sm:$0xff] }
 0x2c9   : > { %3913 = vrot.lane.b32.xlu1 %v7961_v33, %s5747_s30  ;;  %3787 = vrot.lane.b32.xlu0 %v7940_v1, %s5746_s21 }
 0x2ca   : > { %v2352_v36 = vadd.f32 %v2351_v37, %v2321_v18  ;;  %v5533_v24 = vpop.f32.mrb[22].mxu1  ;;  %v2283_v39 = vadd.f32 %v5530_v47, %v2282_v7  ;;  %v2903_v7 = vsel %vm731_vm0, %v7593_v30, %v2569_v10 }
 0x2cb   : > { %4886 = vst [vmem:[%s7213_s16 + $0x1b8] sm:$0xff] %v5533_v24  ;;  %v2181_v28 = vpop.f32.mrb[23].mxu1  ;;  %v2697_v32 = vpop.permute.xlu1 %2696  ;;  %v2324_v54 = vmul.f32 %v5533_v24, %v5533_v24 }
 0x2cc   : > { %4885 = vst [vmem:[%s7213_s16 + $0x1b0] sm:$0xff] %v2181_v28  ;;  %v2284_v45 = vadd.f32 %v2283_v39, %v2181_v28  ;;  %v2323_v41 = vmul.f32 %v2181_v28, %v2181_v28  ;;  %v2353_v62 = vadd.f32 %v2352_v36, %v2322_v31  ;;  %v3896_v16 = vpop.permute.xlu0 %3895  ;;  %v2935_v31 = vsel %vm764_vm1, %v2903_v7, %v2697_v32 }
 0x2cd   : > { %v4040_v44 = vsel %vm797_vm2, %v4008_v27, %v3896_v16  ;;  %2714 = vrot.lane.b32.xlu1 %v7970_v23, %s5746_s21  ;;  %2588 = vrot.lane.b32.xlu0 %v7940_v1, %s5745_s20  ;;  %v1219_v28 = vrot.slane %v7511_v11, 4 }
 0x2ce   : > { %v2354_v48 = vadd.f32 %v2353_v62, %v2323_v41  ;;  %v5536_v17 = vpop.f32.mrb[24].mxu1  ;;  %5632 = vmatmul.mubr.msk.f32.gmra.mrb[46].mxu1 %vm834_vm3, %v4040_v44  ;;  %v2285_v51 = vadd.f32 %v5533_v24, %v2284_v45  ;;  %v8017_v41 = vld [vmem:[%s5792_s19 + $0x171] sm:$0xff]  ;;  %v1289_v62 = vrot.slane %v7515_v29, 4 }
 0x2cf   : > { %4888 = vst [vmem:[%s7213_s16 + $0x1c8] sm:$0xff] %v5536_v17  ;;  %v2191_v22 = vpop.f32.mrb[25].mxu1  ;;  %v3642_v8 = vpop.permute.xlu1 %3641  ;;  %v2326_v49 = vmul.f32 %v5536_v17, %v5536_v17 }
 0x2d0   : > { %4887 = vst [vmem:[%s7213_s16 + $0x1c0] sm:$0xff] %v2191_v22  ;;  %v2286_v25 = vadd.f32 %v2285_v51, %v2191_v22  ;;  %v2325_v50 = vmul.f32 %v2191_v22, %v2191_v22  ;;  %v2355_v6 = vadd.f32 %v2354_v48, %v2324_v54  ;;  %v2823_v61 = vpop.permute.xlu0 %2822  ;;  %v1220_v51 = vadd.f32 %v1219_v28, %v7511_v11 }
 0x2d1   : > { %v2966_v47 = vsel %vm797_vm2, %v2934_v40, %v2823_v61  ;;  %2716 = vrot.lane.b32.xlu1 %v7985_v42, %s5746_s21  ;;  %3915 = vrot.lane.b32.xlu0 %v5212_v26, %s5747_s30  ;;  %v3977_v59 = vsel %vm731_vm0, %v7606_v9, %v3642_v8 }
 0x2d2   : > { %v2356_v19 = vadd.f32 %v2355_v6, %v2325_v50  ;;  %v5539_v20 = vpop.f32.mrb[26].mxu1  ;;  %5578 = vmatprep.mubr.msk.f32.mxu0 %vm834_vm3, %v2966_v47  ;;  %v2287_v52 = vadd.f32 %v5536_v17, %v2286_v25  ;;  %v1290_v6 = vadd.f32 %v1289_v62, %v7515_v29  ;;  %v1221_v29 = vrot.slane %v1220_v51, 2 }
 0x2d3   : > { %4890 = vst [vmem:[%s7213_s16 + $0x1d8] sm:$0xff] %v5539_v20  ;;  %v2201_v18 = vpop.f32.mrb[27].mxu1  ;;  %v8005_v37 = vpop.permute.xlu1 %3643  ;;  %v2328_v30 = vmul.f32 %v5539_v20, %v5539_v20 }
 0x2d4   : > { %4889 = vst [vmem:[%s7213_s16 + $0x1d0] sm:$0xff] %v2201_v18  ;;  %v2288_v36 = vadd.f32 %v2287_v52, %v2201_v18  ;;  %v2327_v24 = vmul.f32 %v2201_v18, %v2201_v18  ;;  %v2357_v39 = vadd.f32 %v2356_v19, %v2326_v49  ;;  %v2825_v21 = vpop.permute.xlu0 %2824  ;;  %v5213_v18 = vld [vmem:[%s5792_s19 + $0x16a] sm:$0xff]  ;;  %v1222_v28 = vadd.f32 %v1221_v29, %v1220_v51 }
 0x2d5   : > { %v2967_v27 = vsel %vm797_vm2, %v2935_v31, %v2825_v21  ;;  %3661 = vrot.lane.b32.xlu1 %v7961_v33, %s5745_s20  ;;  %2842 = vrot.lane.b32.xlu0 %v8000_v3, %s5747_s30 }
 0x2d6   : > { %v2358_v10 = vadd.f32 %v2357_v39, %v2327_v24  ;;  %v5542_v32 = vpop.f32.mrb[28].mxu1  ;;  %5579 = vmatmul.mubr.msk.f32.gmra.mrb[48].mxu0 %vm834_vm3, %v2967_v27  ;;  %v2289_v45 = vadd.f32 %v5539_v20, %v2288_v36  ;;  %v1291_v36 = vrot.slane %v1290_v6, 2  ;;  %v1223_v51 = vrot.slane %v1222_v28, 1 }
 0x2d7   : > { %4892 = vst [vmem:[%s7213_s16 + $0x1e8] sm:$0xff] %v5542_v32  ;;  %v2211_v16 = vpop.f32.mrb[29].mxu1  ;;  %v2571_v44 = vpop.permute.xlu1 %2570  ;;  %v2330_v22 = vmul.f32 %v5542_v32, %v5542_v32 }
 0x2d8   : > { %4891 = vst [vmem:[%s7213_s16 + $0x1e0] sm:$0xff] %v2211_v16  ;;  %v2290_v54 = vadd.f32 %v2289_v45, %v2211_v16  ;;  %v2329_v33 = vmul.f32 %v2211_v16, %v2211_v16  ;;  %v2359_v48 = vadd.f32 %v2358_v10, %v2328_v30  ;;  %v3770_v17 = vpop.permute.xlu0 %3769  ;;  %v8043_v10 = vld [vmem:[%s5792_s19 + $0x180] sm:$0xff]  ;;  %v1292_v62 = vadd.f32 %v1291_v36, %v1290_v6 }
 0x2d9   : > { %3663 = vrot.lane.b32.xlu1 %v5212_v26, %s5745_s20  ;;  %2844 = vrot.lane.b32.xlu0 %v8017_v41, %s5747_s30  ;;  %v4009_v61 = vsel %vm764_vm1, %v3977_v59, %v3770_v17 }
 0x2da   : > { %v2360_v40 = vadd.f32 %v2359_v48, %v2329_v33  ;;  %v5545_v25 = vpop.f32.mrb[30].mxu1  ;;  %v2291_v50 = vadd.f32 %v5542_v32, %v2290_v54  ;;  %v3978_v32 = vsel %vm731_vm0, %v7613_v58, %v8005_v37  ;;  %v8056_v58 = vld [vmem:[%s5792_s19 + $0x188] sm:$0xff]  ;;  %v5214_v37 = vld [vmem:[%s5792_s19 + $0x172] sm:$0xff] }
 0x2db   : > { %4894 = vst [vmem:[%s7213_s16 + $0x1f8] sm:$0xff] %v5545_v25  ;;  %v2221_v47 = vpop.f32.mrb[31].mxu1  ;;  %v3898_v11 = vpop.permute.xlu1 %3897  ;;  %v2332_v9 = vmul.f32 %v5545_v25, %v5545_v25 }
 0x2dc   : > { %4893 = vst [vmem:[%s7213_s16 + $0x1f0] sm:$0xff] %v2221_v47  ;;  %v2292_v26 = vadd.f32 %v2291_v50, %v2221_v47  ;;  %v2331_v49 = vmul.f32 %v2221_v47, %v2221_v47  ;;  %v2361_v19 = vadd.f32 %v2360_v40, %v2330_v22  ;;  %v4041_v20 = vsel %vm797_vm2, %v4009_v61, %v3898_v11  ;;  %v3772_v52 = vpop.permute.xlu0 %3771 }
 0x2dd   : > { %2590 = vrot.lane.b32.xlu1 %v8000_v3, %s5745_s20  ;;  %3789 = vrot.lane.b32.xlu0 %v8000_v3, %s5746_s21  ;;  %v4010_v33 = vsel %vm764_vm1, %v3978_v32, %v3772_v52  ;;  %v2904_v40 = vsel %vm731_vm0, %v7642_v34, %v2571_v44  ;;  %v1293_v50 = vrot.slane %v1292_v62, 1  ;;  %v8068_v34 = vld [vmem:[%s5792_s19 + $0x181] sm:$0xff] }
 0x2de   : > { %v2293_v8 = vadd.f32 %v5545_v25, %v2292_v26  ;;  %v2362_v7 = vadd.f32 %v2361_v19, %v2331_v49  ;;  %5634 = vmatprep.mubr.msk.f32.mxu1 %vm834_vm3, %v4041_v20  ;;  %v1224_v49 = vadd.f32 %v1223_v51, %v1222_v28 }
 0x2df   : > { %v2699_v31 = vpop.permute.xlu1 %2698  ;;  %v1294_v29 = vadd.f32 %v1293_v50, %v1292_v62 }
 0x2e0   : > { %v2294_v24 = vrot.slane %v2293_v8, 4  ;;  %v2363_v39 = vadd.f32 %v2362_v7, %v2332_v9  ;;  %v2573_v21 = vpop.permute.xlu0 %2572  ;;  %v2936_v47 = vsel %vm764_vm1, %v2904_v40, %v2699_v31 }
 0x2e1   : > { %3917 = vrot.lane.b32.xlu1 %v5213_v18, %s5747_s30  ;;  %3791 = vrot.lane.b32.xlu0 %v8017_v41, %s5746_s21  ;;  %v2905_v44 = vsel %vm731_vm0, %v7655_v57, %v2573_v21  ;;  %v8083_v57 = vld [vmem:[%s5792_s19 + $0x189] sm:$0xff] }
 0x2e2   : > { %v2295_v27 = vadd.f32 %v2294_v24, %v2293_v8  ;;  %v2364_v30 = vrot.slane %v2363_v39, 4 }
 0x2e3   : > { %v2701_v45 = vpop.permute.xlu1 %2700 }
 0x2e4   : > { %v2296_v16 = vrot.slane %v2295_v27, 2  ;;  %v2365_v54 = vadd.f32 %v2364_v30, %v2363_v39  ;;  %v3900_v48 = vpop.permute.xlu0 %3899  ;;  %v2937_v7 = vsel %vm764_vm1, %v2905_v44, %v2701_v45  ;;  %v5215_v45 = vld [vmem:[%s5792_s19 + $0x182] sm:$0xff] }
 0x2e5   : > { %v4042_v17 = vsel %vm797_vm2, %v4010_v33, %v3900_v48  ;;  %2718 = vrot.lane.b32.xlu1 %v8043_v10, %s5746_s21  ;;  %2592 = vrot.lane.b32.xlu0 %v8017_v41, %s5745_s20 }
 0x2e6   : > { %v2297_v59 = vadd.f32 %v2296_v16, %v2295_v27  ;;  %v2366_v22 = vrot.slane %v2365_v54, 2  ;;  %5635 = vmatmul.mubr.msk.f32.gmra.mrb[48].mxu1 %vm834_vm3, %v4042_v17 }
 0x2e7   : > { %v3646_v25 = vpop.permute.xlu1 %3645 }
 0x2e8   : > { %v2298_v6 = vrot.slane %v2297_v59, 1  ;;  %v2367_v61 = vadd.f32 %v2366_v22, %v2365_v54  ;;  %v2827_v11 = vpop.permute.xlu0 %2826  ;;  %v5216_v22 = vld [vmem:[%s5792_s19 + $0x18a] sm:$0xff] }
 0x2e9   : > { %v2968_v26 = vsel %vm797_vm2, %v2936_v47, %v2827_v11  ;;  %2720 = vrot.lane.b32.xlu1 %v8056_v58, %s5746_s21  ;;  %3919 = vrot.lane.b32.xlu0 %v5214_v37, %s5747_s30  ;;  %v5021_v11 = vld [vmem:[%s5792_s19 + $0x199] sm:$0xff] }
 0x2ea   : > { %v2299_v19 = vadd.f32 %v2298_v6, %v2297_v59  ;;  %v2368_v20 = vrot.slane %v2367_v61, 1  ;;  %5581 = vmatprep.mubr.msk.f32.mxu0 %vm834_vm3, %v2968_v26  ;;  %v4990_v59 = vld [vmem:[%s5792_s19 + $0x1a0] sm:$0xff] }
 0x2eb   : > { %v3648_v52 = vpop.permute.xlu1 %3647 }
 0x2ec   : > { %v8072_v9 = vadd.f32 %v2299_v19, %v1224_v49  ;;  %v2369_v8 = vadd.f32 %v2368_v20, %v2367_v61  ;;  %v2829_v31 = vpop.permute.xlu0 %2828  ;;  %v3980_v54 = vsel %vm731_vm0, %v7674_v4, %v3648_v52 }
 0x2ed   : > { %v2969_v36 = vsel %vm797_vm2, %v2937_v7, %v2829_v31  ;;  %3665 = vrot.lane.b32.xlu1 %v5213_v18, %s5745_s20  ;;  %2846 = vrot.lane.b32.xlu0 %v8068_v34, %s5747_s30  ;;  %v3979_v18 = vsel %vm731_vm0, %v7663_v63, %v3646_v25  ;;  %v4989_v63 = vld [vmem:[%s5792_s19 + $0x198] sm:$0xff] }
 0x2ee   : > { %v8079_v24 = vadd.f32 %v2369_v8, %v1294_v29  ;;  %5582 = vmatmul.mubr.msk.f32.gmra.mrb[50].mxu0 %vm834_vm3, %v2969_v36  ;;  %v5022_v8 = vld [vmem:[%s5792_s19 + $0x1a1] sm:$0xff] }
 0x2ef   : > { %v2575_v39 = vpop.permute.xlu1 %2574 }
 0x2f0   : > { %v3774_v21 = vpop.permute.xlu0 %3773  ;;  %v2906_v4 = vsel %vm731_vm0, %v7704_v13, %v2575_v39 }
 0x2f1   : > { %3667 = vrot.lane.b32.xlu1 %v5214_v37, %s5745_s20  ;;  %2848 = vrot.lane.b32.xlu0 %v8083_v57, %s5747_s30  ;;  %v4011_v28 = vsel %vm764_vm1, %v3979_v18, %v3774_v21 }
 0x2f3   : > { %v3902_v27 = vpop.permute.xlu1 %3901 }
 0x2f4   : > { %v4043_v30 = vsel %vm797_vm2, %v4011_v28, %v3902_v27  ;;  %v3776_v32 = vpop.permute.xlu0 %3775 }
 0x2f5   : > { %2594 = vrot.lane.b32.xlu1 %v8068_v34, %s5745_s20  ;;  %3793 = vrot.lane.b32.xlu0 %v8068_v34, %s5746_s21  ;;  %v4012_v48 = vsel %vm764_vm1, %v3980_v54, %v3776_v32  ;;  %v5218_v32 = vld [vmem:[%s5792_s19 + $0x1a2] sm:$0xff] }
 0x2f6   : > { %5637 = vmatprep.mubr.msk.f32.mxu1 %vm834_vm3, %v4043_v30 }
 0x2f7   : > { %v2703_v62 = vpop.permute.xlu1 %2702 }
 0x2f8   : > { %v2577_v16 = vpop.permute.xlu0 %2576  ;;  %v2938_v40 = vsel %vm764_vm1, %v2906_v4, %v2703_v62 }
 0x2f9   : > { %3921 = vrot.lane.b32.xlu1 %v5215_v45, %s5747_s30  ;;  %3795 = vrot.lane.b32.xlu0 %v8083_v57, %s5746_s21  ;;  %v2907_v13 = vsel %vm731_vm0, %v7712_v60, %v2577_v16 }
 0x2fb   : > { %v2705_v33 = vpop.permute.xlu1 %2704 }
 0x2fc   : > { %v3904_v17 = vpop.permute.xlu0 %3903  ;;  %v2939_v20 = vsel %vm764_vm1, %v2907_v13, %v2705_v33 }
 0x2fd   : > { %v4044_v51 = vsel %vm797_vm2, %v4012_v48, %v3904_v17  ;;  %2722 = vrot.lane.b32.xlu1 %v4989_v63, %s5746_s21  ;;  %2596 = vrot.lane.b32.xlu0 %v8083_v57, %s5745_s20 }
 0x2fe   : > { %5638 = vmatmul.mubr.msk.f32.gmra.mrb[50].mxu1 %vm834_vm3, %v4044_v51 }
 0x2ff   : > { %v3650_v37 = vpop.permute.xlu1 %3649 }
 0x300   : > { %v2831_v25 = vpop.permute.xlu0 %2830  ;;  %v3981_v31 = vsel %vm731_vm0, %v7724_v2, %v3650_v37 }
 0x301   : > { %v2970_v50 = vsel %vm797_vm2, %v2938_v40, %v2831_v25  ;;  %v5556_v6 = vpop.f32.mrb[32].mxu0  ;;  %2724 = vrot.lane.b32.xlu1 %v4990_v59, %s5746_s21  ;;  %3923 = vrot.lane.b32.xlu0 %v5216_v22, %s5747_s30 }
 0x302   : > { %5060 = vst [vmem:[%s7213_s16 + $0x208] sm:$0xff] %v5556_v6  ;;  %v3380_v61 = vmul.f32 %v5556_v6, %v5556_v6  ;;  %v3149_v47 = vpop.f32.mrb[33].mxu0  ;;  %5584 = vmatprep.mubr.msk.f32.mxu0 %vm834_vm3, %v2970_v50 }
 0x303   : > { %5059 = vst [vmem:[%s7213_s16 + $0x200] sm:$0xff] %v3149_v47  ;;  %v3341_v26 = vadd.f32 %v5556_v6, %v3149_v47  ;;  %v3379_v49 = vmul.f32 %v3149_v47, %v3149_v47  ;;  %v3652_v19 = vpop.permute.xlu1 %3651 }
 0x304   : > { %v2833_v44 = vpop.permute.xlu0 %2832  ;;  %v3982_v33 = vsel %vm731_vm0, %v7734_v53, %v3652_v19 }
 0x305   : > { %v3411_v52 = vadd.f32 %v3380_v61, %v3379_v49  ;;  %v2971_v29 = vsel %vm797_vm2, %v2939_v20, %v2833_v44  ;;  %3669 = vrot.lane.b32.xlu1 %v5215_v45, %s5745_s20  ;;  %2850 = vrot.lane.b32.xlu0 %v5021_v11, %s5747_s30  ;;  %v5217_v45 = vld [vmem:[%s5792_s19 + $0x19a] sm:$0xff]  ;;  %s4666_s19 = sshll.u32 %s8647_s12, 1 }
 0x306   : > { %5585 = vmatmul.mubr.msk.f32.gmra.mrb[52].mxu0 %vm834_vm3, %v2971_v29 }
 0x307   : > { %v2579_v7 = vpop.permute.xlu1 %2578 }
 0x308   : > { %v3778_v60 = vpop.permute.xlu0 %3777  ;;  %v2908_v37 = vsel %vm731_vm0, %v7761_v15, %v2579_v7 }
 0x309   : > { %3671 = vrot.lane.b32.xlu1 %v5216_v22, %s5745_s20  ;;  %2852 = vrot.lane.b32.xlu0 %v5022_v8, %s5747_s30  ;;  %v4013_v36 = vsel %vm764_vm1, %v3981_v31, %v3778_v60 }
 0x30b   : > { %v3906_v39 = vpop.permute.xlu1 %3905 }
 0x30c   : > { %v4045_v21 = vsel %vm797_vm2, %v4013_v36, %v3906_v39  ;;  %v3780_v18 = vpop.permute.xlu0 %3779 }
 0x30d   : > { %v5612_v28 = vpop.f32.mrb[32].mxu1  ;;  %3799 = vrot.lane.b32.xlu1 %v5022_v8, %s5746_s21  ;;  %3797 = vrot.lane.b32.xlu0 %v5021_v11, %s5746_s21  ;;  %v4014_v17 = vsel %vm764_vm1, %v3982_v33, %v3780_v18 }
 0x30e   : > { %5256 = vst [vmem:[%s7213_s16 + $0x308] sm:$0xff] %v5612_v28  ;;  %v4455_v27 = vmul.f32 %v5612_v28, %v5612_v28  ;;  %v4224_v30 = vpop.f32.mrb[33].mxu1  ;;  %5640 = vmatprep.mubr.msk.f32.mxu1 %vm834_vm3, %v4045_v21 }
 0x30f   : > { %5255 = vst [vmem:[%s7213_s16 + $0x300] sm:$0xff] %v4224_v30  ;;  %v4416_v2 = vadd.f32 %v5612_v28, %v4224_v30  ;;  %v4454_v62 = vmul.f32 %v4224_v30, %v4224_v30  ;;  %v2707_v16 = vpop.permute.xlu1 %2706 }
 0x310   : > { %v2581_v63 = vpop.permute.xlu0 %2580  ;;  %v2940_v53 = vsel %vm764_vm1, %v2908_v37, %v2707_v16 }
 0x311   : > { %v4486_v54 = vadd.f32 %v4455_v27, %v4454_v62  ;;  %3927 = vrot.lane.b32.xlu1 %v5218_v32, %s5747_s30  ;;  %3925 = vrot.lane.b32.xlu0 %v5217_v45, %s5747_s30  ;;  %v2909_v49 = vsel %vm731_vm0, %v7773_v35, %v2581_v63  ;;  %s212_s30 = scalar_lea.vmem %s8328_s3, %s4666_s19 }
 0x313   : > { %v2709_v48 = vpop.permute.xlu1 %2708 }
 0x314   : > { %v3908_v51 = vpop.permute.xlu0 %3907 }
 0x315   : > { %v4046_v59 = vsel %vm797_vm2, %v4014_v17, %v3908_v51  ;;  %v5559_v22 = vpop.f32.mrb[34].mxu0 }
 0x316   : > { %5062 = vst [vmem:[%s7213_s16 + $0x218] sm:$0xff] %v5559_v22  ;;  %v3159_v4 = vpop.f32.mrb[35].mxu0  ;;  %5641 = vmatmul.mubr.msk.f32.gmra.mrb[52].mxu1 %vm834_vm3, %v4046_v59  ;;  %v3382_v61 = vmul.f32 %v5559_v22, %v5559_v22 }
 0x317   : > { %5061 = vst [vmem:[%s7213_s16 + $0x210] sm:$0xff] %v3159_v4  ;;  %v3342_v40 = vadd.f32 %v3341_v26, %v3159_v4  ;;  %v3381_v25 = vmul.f32 %v3159_v4, %v3159_v4  ;;  %v3654_v50 = vpop.permute.xlu1 %3653  ;;  %v2941_v26 = vsel %vm764_vm1, %v2909_v49, %v2709_v48 }
 0x318   : > { %v2835_v6 = vpop.permute.xlu0 %2834  ;;  %v3983_v7 = vsel %vm731_vm0, %v7784_v46, %v3654_v50 }
 0x319   : > { %v3412_v47 = vadd.f32 %v3411_v52, %v3381_v25  ;;  %v2972_v11 = vsel %vm797_vm2, %v2940_v53, %v2835_v6  ;;  %v3343_v13 = vadd.f32 %v5559_v22, %v3342_v40 }
 0x31a   : > { %5587 = vmatprep.mubr.msk.f32.mxu0 %vm834_vm3, %v2972_v11 }
 0x31b   : > { %v3656_v15 = vpop.permute.xlu1 %3655  ;;  %v3413_v19 = vadd.f32 %v3412_v47, %v3382_v61 }
 0x31c   : > { %v2837_v20 = vpop.permute.xlu0 %2836 }
 0x31d   : > { %v2973_v44 = vsel %vm797_vm2, %v2941_v26, %v2837_v20 }
 0x31e   : > { %5588 = vmatmul.mubr.msk.f32.gmra.mrb[54].mxu0 %vm834_vm3, %v2973_v44 }
 0x31f   : > { %v2583_v29 = vpop.permute.xlu1 %2582 }
 0x320   : > { %v3782_v52 = vpop.permute.xlu0 %3781  ;;  %v2910_v37 = vsel %vm731_vm0, %v7821_v56, %v2583_v29 }
 0x321   : > { %v5615_v8 = vpop.f32.mrb[34].mxu1  ;;  %v4015_v35 = vsel %vm764_vm1, %v3983_v7, %v3782_v52 }
 0x322   : > { %5258 = vst [vmem:[%s7213_s16 + $0x318] sm:$0xff] %v5615_v8  ;;  %v4234_v60 = vpop.f32.mrb[35].mxu1  ;;  %v4457_v28 = vmul.f32 %v5615_v8, %v5615_v8 }
 0x323   : > { %5257 = vst [vmem:[%s7213_s16 + $0x310] sm:$0xff] %v4234_v60  ;;  %v4417_v31 = vadd.f32 %v4416_v2, %v4234_v60  ;;  %v4456_v36 = vmul.f32 %v4234_v60, %v4234_v60  ;;  %v3910_v39 = vpop.permute.xlu1 %3909  ;;  %v3984_v2 = vsel %vm731_vm0, %v7796_v55, %v3656_v15 }
 0x324   : > { %v4047_v21 = vsel %vm797_vm2, %v4015_v35, %v3910_v39  ;;  %v3784_v18 = vpop.permute.xlu0 %3783 }
 0x325   : > { %v4487_v27 = vadd.f32 %v4486_v54, %v4456_v36  ;;  %5643 = vmatprep.mubr.msk.f32.mxu1 %vm834_vm3, %v4047_v21  ;;  %v4418_v30 = vadd.f32 %v5615_v8, %v4417_v31  ;;  %v4016_v17 = vsel %vm764_vm1, %v3984_v2, %v3784_v18 }
 0x327   : > { %v2711_v32 = vpop.permute.xlu1 %2710  ;;  %v4488_v46 = vadd.f32 %v4487_v27, %v4457_v28 }
 0x328   : > { %v2585_v45 = vpop.permute.xlu0 %2584  ;;  %v2942_v25 = vsel %vm764_vm1, %v2910_v37, %v2711_v32 }
 0x329   : > { %v5562_v62 = vpop.f32.mrb[36].mxu0  ;;  %v2911_v6 = vsel %vm731_vm0, %v7833_v12, %v2585_v45 }
 0x32a   : > { %5064 = vst [vmem:[%s7213_s16 + $0x228] sm:$0xff] %v5562_v62  ;;  %v3169_v16 = vpop.f32.mrb[37].mxu0  ;;  %v3384_v54 = vmul.f32 %v5562_v62, %v5562_v62 }
 0x32b   : > { %5063 = vst [vmem:[%s7213_s16 + $0x220] sm:$0xff] %v3169_v16  ;;  %v3344_v63 = vadd.f32 %v3343_v13, %v3169_v16  ;;  %v3383_v33 = vmul.f32 %v3169_v16, %v3169_v16  ;;  %v2713_v48 = vpop.permute.xlu1 %2712 }
 0x32c   : > { %v3912_v51 = vpop.permute.xlu0 %3911  ;;  %v2943_v47 = vsel %vm764_vm1, %v2911_v6, %v2713_v48 }
 0x32d   : > { %v3414_v59 = vadd.f32 %v3413_v19, %v3383_v33  ;;  %v4048_v22 = vsel %vm797_vm2, %v4016_v17, %v3912_v51  ;;  %v3345_v4 = vadd.f32 %v5562_v62, %v3344_v63 }
 0x32e   : > { %5644 = vmatmul.mubr.msk.f32.gmra.mrb[54].mxu1 %vm834_vm3, %v4048_v22 }
 0x32f   : > { %v3658_v55 = vpop.permute.xlu1 %3657  ;;  %v3415_v40 = vadd.f32 %v3414_v59, %v3384_v54 }
 0x330   : > { %v2839_v50 = vpop.permute.xlu0 %2838  ;;  %v3985_v52 = vsel %vm731_vm0, %v7848_v0, %v3658_v55 }
 0x331   : > { %v2974_v53 = vsel %vm797_vm2, %v2942_v25, %v2839_v50 }
 0x332   : > { %5590 = vmatprep.mubr.msk.f32.mxu0 %vm834_vm3, %v2974_v53 }
 0x333   : > { %v3660_v61 = vpop.permute.xlu1 %3659 }
 0x334   : > { %v2841_v11 = vpop.permute.xlu0 %2840 }
 0x335   : > { %v2975_v13 = vsel %vm797_vm2, %v2943_v47, %v2841_v11  ;;  %v5618_v56 = vpop.f32.mrb[36].mxu1 }
 0x336   : > { %5260 = vst [vmem:[%s7213_s16 + $0x328] sm:$0xff] %v5618_v56  ;;  %5591 = vmatmul.mubr.msk.f32.gmra.mrb[56].mxu0 %vm834_vm3, %v2975_v13  ;;  %v4244_v49 = vpop.f32.mrb[37].mxu1  ;;  %v4459_v44 = vmul.f32 %v5618_v56, %v5618_v56 }
 0x337   : > { %5259 = vst [vmem:[%s7213_s16 + $0x320] sm:$0xff] %v4244_v49  ;;  %v4419_v15 = vadd.f32 %v4418_v30, %v4244_v49  ;;  %v4458_v19 = vmul.f32 %v4244_v49, %v4244_v49  ;;  %v2587_v26 = vpop.permute.xlu1 %2586 }
 0x338   : > { %v3786_v20 = vpop.permute.xlu0 %3785  ;;  %v2912_v33 = vsel %vm731_vm0, %v7894_v14, %v2587_v26 }
 0x339   : > { %v4489_v12 = vadd.f32 %v4488_v46, %v4458_v19  ;;  %v4420_v29 = vadd.f32 %v5618_v56, %v4419_v15  ;;  %v4017_v8 = vsel %vm764_vm1, %v3985_v52, %v3786_v20  ;;  %v3986_v46 = vsel %vm731_vm0, %v7864_v38, %v3660_v61 }
 0x33b   : > { %v3914_v7 = vpop.permute.xlu1 %3913  ;;  %v4490_v60 = vadd.f32 %v4489_v12, %v4459_v44 }
 0x33c   : > { %v4049_v35 = vsel %vm797_vm2, %v4017_v8, %v3914_v7  ;;  %v3788_v31 = vpop.permute.xlu0 %3787 }
 0x33d   : > { %v5565_v36 = vpop.f32.mrb[38].mxu0  ;;  %5646 = vmatprep.mubr.msk.f32.mxu1 %vm834_vm3, %v4049_v35  ;;  %v4018_v16 = vsel %vm764_vm1, %v3986_v46, %v3788_v31 }
 0x33e   : > { %5066 = vst [vmem:[%s7213_s16 + $0x238] sm:$0xff] %v5565_v36  ;;  %v3179_v39 = vpop.f32.mrb[39].mxu0  ;;  %v3386_v30 = vmul.f32 %v5565_v36, %v5565_v36 }
 0x33f   : > { %5065 = vst [vmem:[%s7213_s16 + $0x230] sm:$0xff] %v3179_v39  ;;  %v3346_v21 = vadd.f32 %v3345_v4, %v3179_v39  ;;  %v3385_v18 = vmul.f32 %v3179_v39, %v3179_v39  ;;  %v2715_v28 = vpop.permute.xlu1 %2714 }
 0x340   : > { %v2589_v27 = vpop.permute.xlu0 %2588  ;;  %v2944_v17 = vsel %vm764_vm1, %v2912_v33, %v2715_v28 }
 0x341   : > { %v3416_v0 = vadd.f32 %v3415_v40, %v3385_v18  ;;  %v3347_v32 = vadd.f32 %v5565_v36, %v3346_v21  ;;  %v2913_v22 = vsel %vm731_vm0, %v7909_v5, %v2589_v27 }
 0x343   : > { %v2717_v45 = vpop.permute.xlu1 %2716  ;;  %v3417_v62 = vadd.f32 %v3416_v0, %v3386_v30 }
 0x344   : > { %v3916_v2 = vpop.permute.xlu0 %3915  ;;  %v2945_v14 = vsel %vm764_vm1, %v2913_v22, %v2717_v45 }
 0x345   : > { %v4050_v63 = vsel %vm797_vm2, %v4018_v16, %v3916_v2 }
 0x346   : > { %5647 = vmatmul.mubr.msk.f32.gmra.mrb[56].mxu1 %vm834_vm3, %v4050_v63 }
 0x347   : > { %v3662_v48 = vpop.permute.xlu1 %3661 }
 0x348   : > { %v2843_v51 = vpop.permute.xlu0 %2842  ;;  %v3987_v13 = vsel %vm731_vm0, %v7924_v43, %v3662_v48 }
 0x349   : > { %v2976_v54 = vsel %vm797_vm2, %v2944_v17, %v2843_v51  ;;  %v5621_v38 = vpop.f32.mrb[38].mxu1 }
 0x34a   : > { %5262 = vst [vmem:[%s7213_s16 + $0x338] sm:$0xff] %v5621_v38  ;;  %5593 = vmatprep.mubr.msk.f32.mxu0 %vm834_vm3, %v2976_v54  ;;  %v4254_v59 = vpop.f32.mrb[39].mxu1  ;;  %v4461_v25 = vmul.f32 %v5621_v38, %v5621_v38 }
 0x34b   : > { %5261 = vst [vmem:[%s7213_s16 + $0x330] sm:$0xff] %v4254_v59  ;;  %v4421_v4 = vadd.f32 %v4420_v29, %v4254_v59  ;;  %v4460_v37 = vmul.f32 %v4254_v59, %v4254_v59  ;;  %v3664_v55 = vpop.permute.xlu1 %3663 }
 0x34c   : > { %v2845_v40 = vpop.permute.xlu0 %2844 }
 0x34d   : > { %v4491_v50 = vadd.f32 %v4490_v60, %v4460_v37  ;;  %v2977_v53 = vsel %vm797_vm2, %v2945_v14, %v2845_v40  ;;  %v4422_v6 = vadd.f32 %v5621_v38, %v4421_v4  ;;  %v3988_v60 = vsel %vm731_vm0, %v7940_v1, %v3664_v55 }
 0x34e   : > { %5594 = vmatmul.mubr.msk.f32.gmra.mrb[58].mxu0 %vm834_vm3, %v2977_v53 }
 0x34f   : > { %v2591_v61 = vpop.permute.xlu1 %2590  ;;  %v4492_v47 = vadd.f32 %v4491_v50, %v4461_v25 }
 0x350   : > { %v3790_v11 = vpop.permute.xlu0 %3789  ;;  %v2914_v28 = vsel %vm731_vm0, %v7970_v23, %v2591_v61 }
 0x351   : > { %v5568_v5 = vpop.f32.mrb[40].mxu0  ;;  %v4019_v49 = vsel %vm764_vm1, %v3987_v13, %v3790_v11 }
 0x352   : > { %5068 = vst [vmem:[%s7213_s16 + $0x248] sm:$0xff] %v5568_v5  ;;  %v3189_v56 = vpop.f32.mrb[41].mxu0  ;;  %v3388_v12 = vmul.f32 %v5568_v5, %v5568_v5 }
 0x353   : > { %5067 = vst [vmem:[%s7213_s16 + $0x240] sm:$0xff] %v3189_v56  ;;  %v3348_v15 = vadd.f32 %v3347_v32, %v3189_v56  ;;  %v3387_v19 = vmul.f32 %v3189_v56, %v3189_v56  ;;  %v3918_v26 = vpop.permute.xlu1 %3917 }
 0x354   : > { %v4051_v20 = vsel %vm797_vm2, %v4019_v49, %v3918_v26  ;;  %v3792_v44 = vpop.permute.xlu0 %3791 }
 0x355   : > { %v3418_v29 = vadd.f32 %v3417_v62, %v3387_v19  ;;  %5649 = vmatprep.mubr.msk.f32.mxu1 %vm834_vm3, %v4051_v20  ;;  %v3349_v52 = vadd.f32 %v5568_v5, %v3348_v15  ;;  %v4020_v31 = vsel %vm764_vm1, %v3988_v60, %v3792_v44 }
 0x357   : > { %v2719_v8 = vpop.permute.xlu1 %2718  ;;  %v3419_v43 = vadd.f32 %v3418_v29, %v3388_v12 }
 0x358   : > { %v2593_v7 = vpop.permute.xlu0 %2592  ;;  %v2946_v1 = vsel %vm764_vm1, %v2914_v28, %v2719_v8 }
 0x359   : > { %v2915_v2 = vsel %vm731_vm0, %v7985_v42, %v2593_v7 }
 0x35b   : > { %v2721_v35 = vpop.permute.xlu1 %2720 }
 0x35c   : > { %v3920_v36 = vpop.permute.xlu0 %3919  ;;  %v2947_v33 = vsel %vm764_vm1, %v2915_v2, %v2721_v35 }
 0x35d   : > { %v4052_v39 = vsel %vm797_vm2, %v4020_v31, %v3920_v36  ;;  %v5624_v21 = vpop.f32.mrb[40].mxu1 }
 0x35e   : > { %5264 = vst [vmem:[%s7213_s16 + $0x348] sm:$0xff] %v5624_v21  ;;  %v4264_v18 = vpop.f32.mrb[41].mxu1  ;;  %5650 = vmatmul.mubr.msk.f32.gmra.mrb[58].mxu1 %vm834_vm3, %v4052_v39  ;;  %v4463_v46 = vmul.f32 %v5624_v21, %v5624_v21 }
 0x35f   : > { %5263 = vst [vmem:[%s7213_s16 + $0x340] sm:$0xff] %v4264_v18  ;;  %v4423_v27 = vadd.f32 %v4422_v6, %v4264_v18  ;;  %v4462_v30 = vmul.f32 %v4264_v18, %v4264_v18  ;;  %v3666_v0 = vpop.permute.xlu1 %3665 }
 0x360   : > { %v2847_v32 = vpop.permute.xlu0 %2846  ;;  %v3989_v14 = vsel %vm731_vm0, %v8000_v3, %v3666_v0 }
 0x361   : > { %v4493_v45 = vadd.f32 %v4492_v47, %v4462_v30  ;;  %v2978_v62 = vsel %vm797_vm2, %v2946_v1, %v2847_v32  ;;  %v4424_v16 = vadd.f32 %v5624_v21, %v4423_v27 }
 0x362   : > { %5596 = vmatprep.mubr.msk.f32.mxu0 %vm834_vm3, %v2978_v62 }
 0x363   : > { %v3668_v23 = vpop.permute.xlu1 %3667  ;;  %v4494_v63 = vadd.f32 %v4493_v45, %v4463_v46 }
 0x364   : > { %v2849_v48 = vpop.permute.xlu0 %2848  ;;  %v3990_v13 = vsel %vm731_vm0, %v8017_v41, %v3668_v23 }
 0x365   : > { %v2979_v17 = vsel %vm797_vm2, %v2947_v33, %v2849_v48  ;;  %v5571_v51 = vpop.f32.mrb[42].mxu0 }
 0x366   : > { %5070 = vst [vmem:[%s7213_s16 + $0x258] sm:$0xff] %v5571_v51  ;;  %v3199_v54 = vpop.f32.mrb[43].mxu0  ;;  %5597 = vmatmul.mubr.msk.f32.gmra.mrb[60].mxu0 %vm834_vm3, %v2979_v17  ;;  %v3390_v37 = vmul.f32 %v5571_v51, %v5571_v51 }
 0x367   : > { %5069 = vst [vmem:[%s7213_s16 + $0x250] sm:$0xff] %v3199_v54  ;;  %v3350_v38 = vadd.f32 %v3349_v52, %v3199_v54  ;;  %v3389_v59 = vmul.f32 %v3199_v54, %v3199_v54  ;;  %v2595_v22 = vpop.permute.xlu1 %2594 }
 0x368   : > { %v3794_v4 = vpop.permute.xlu0 %3793  ;;  %v2916_v29 = vsel %vm731_vm0, %v8043_v10, %v2595_v22 }
 0x369   : > { %v3420_v42 = vadd.f32 %v3419_v43, %v3389_v59  ;;  %v3351_v55 = vadd.f32 %v5571_v51, %v3350_v38  ;;  %v4021_v40 = vsel %vm764_vm1, %v3989_v14, %v3794_v4 }
 0x36b   : > { %v3922_v25 = vpop.permute.xlu1 %3921  ;;  %v3421_v50 = vadd.f32 %v3420_v42, %v3390_v37 }
 0x36c   : > { %v4053_v53 = vsel %vm797_vm2, %v4021_v40, %v3922_v25  ;;  %v3796_v6 = vpop.permute.xlu0 %3795 }
 0x36d   : > { %5652 = vmatprep.mubr.msk.f32.mxu1 %vm834_vm3, %v4053_v53  ;;  %v4022_v15 = vsel %vm764_vm1, %v3990_v13, %v3796_v6 }
 0x36f   : > { %v2723_v61 = vpop.permute.xlu1 %2722 }
 0x370   : > { %v2597_v47 = vpop.permute.xlu0 %2596  ;;  %v2948_v8 = vsel %vm764_vm1, %v2916_v29, %v2723_v61 }
 0x371   : > { %v5627_v11 = vpop.f32.mrb[42].mxu1  ;;  %v2917_v31 = vsel %vm731_vm0, %v8056_v58, %v2597_v47 }
 0x372   : > { %5266 = vst [vmem:[%s7213_s16 + $0x358] sm:$0xff] %v5627_v11  ;;  %v4274_v5 = vpop.f32.mrb[43].mxu1  ;;  %v4465_v26 = vmul.f32 %v5627_v11, %v5627_v11 }
 0x373   : > { %5265 = vst [vmem:[%s7213_s16 + $0x350] sm:$0xff] %v4274_v5  ;;  %v4425_v56 = vadd.f32 %v4424_v16, %v4274_v5  ;;  %v4464_v3 = vmul.f32 %v4274_v5, %v4274_v5  ;;  %v2725_v49 = vpop.permute.xlu1 %2724 }
 0x374   : > { %v3924_v19 = vpop.permute.xlu0 %3923  ;;  %v2949_v10 = vsel %vm764_vm1, %v2917_v31, %v2725_v49 }
 0x375   : > { %v4495_v20 = vadd.f32 %v4494_v63, %v4464_v3  ;;  %v4054_v44 = vsel %vm797_vm2, %v4022_v15, %v3924_v19  ;;  %v4426_v12 = vadd.f32 %v5627_v11, %v4425_v56 }
 0x376   : > { %5653 = vmatmul.mubr.msk.f32.gmra.mrb[60].mxu1 %vm834_vm3, %v4054_v44 }
 0x377   : > { %v3670_v41 = vpop.permute.xlu1 %3669  ;;  %v4496_v52 = vadd.f32 %v4495_v20, %v4465_v26 }
 0x378   : > { %v2851_v43 = vpop.permute.xlu0 %2850  ;;  %v3991_v45 = vsel %vm731_vm0, %v8068_v34, %v3670_v41 }
 0x379   : > { %v2980_v7 = vsel %vm797_vm2, %v2948_v8, %v2851_v43  ;;  %v5574_v60 = vpop.f32.mrb[44].mxu0 }
 0x37a   : > { %5072 = vst [vmem:[%s7213_s16 + $0x268] sm:$0xff] %v5574_v60  ;;  %v3209_v35 = vpop.f32.mrb[45].mxu0  ;;  %5599 = vmatprep.mubr.msk.f32.mxu0 %vm834_vm3, %v2980_v7  ;;  %v3392_v28 = vmul.f32 %v5574_v60, %v5574_v60 }
 0x37b   : > { %5071 = vst [vmem:[%s7213_s16 + $0x260] sm:$0xff] %v3209_v35  ;;  %v3352_v36 = vadd.f32 %v3351_v55, %v3209_v35  ;;  %v3391_v39 = vmul.f32 %v3209_v35, %v3209_v35  ;;  %v3672_v21 = vpop.permute.xlu1 %3671 }
 0x37c   : > { %v2853_v18 = vpop.permute.xlu0 %2852  ;;  %v3992_v58 = vsel %vm731_vm0, %v8083_v57, %v3672_v21 }
 0x37d   : > { %v3422_v27 = vadd.f32 %v3421_v50, %v3391_v39  ;;  %v2981_v30 = vsel %vm797_vm2, %v2949_v10, %v2853_v18  ;;  %v3353_v0 = vadd.f32 %v5574_v60, %v3352_v36 }
 0x37e   : > { %5600 = vmatmul.mubr.msk.f32.gmra.mrb[62].mxu0 %vm834_vm3, %v2981_v30 }
 0x37f   : > { %v3800_v1 = vpop.permute.xlu1 %3799  ;;  %v3423_v32 = vadd.f32 %v3422_v27, %v3392_v28 }
 0x380   : > { %v3798_v46 = vpop.permute.xlu0 %3797  ;;  %v4024_v62 = vsel %vm764_vm1, %v3992_v58, %v3800_v1 }
 0x381   : > { %v4023_v2 = vsel %vm764_vm1, %v3991_v45, %v3798_v46 }
 0x383   : > { %v3928_v16 = vpop.permute.xlu1 %3927 }
 0x384   : > { %v4056_v23 = vsel %vm797_vm2, %v4024_v62, %v3928_v16  ;;  %v3926_v63 = vpop.permute.xlu0 %3925 }
 0x385   : > { %v4055_v33 = vsel %vm797_vm2, %v4023_v2, %v3926_v63 }
 0x386   : > { %5655 = vmatprep.mubr.msk.f32.mxu1 %vm834_vm3, %v4055_v33 }
 0x387   : > { %5656 = vmatmul.mubr.msk.f32.gmra.mrb[62].mxu1 %vm834_vm3, %v4056_v23 }
 0x389   : > { %v5630_v57 = vpop.f32.mrb[44].mxu1 }
 0x38a   : > { %5268 = vst [vmem:[%s7213_s16 + $0x368] sm:$0xff] %v5630_v57  ;;  %v4284_v48 = vpop.f32.mrb[45].mxu1  ;;  %v4467_v51 = vmul.f32 %v5630_v57, %v5630_v57 }
 0x38b   : > { %5267 = vst [vmem:[%s7213_s16 + $0x360] sm:$0xff] %v4284_v48  ;;  %v4427_v34 = vadd.f32 %v4426_v12, %v4284_v48  ;;  %v4466_v17 = vmul.f32 %v4284_v48, %v4284_v48 }
 0x38d   : > { %v4497_v54 = vadd.f32 %v4496_v52, %v4466_v17  ;;  %v4428_v38 = vadd.f32 %v5630_v57, %v4427_v34 }
 0x38f   : > { %v4498_v59 = vadd.f32 %v4497_v54, %v4467_v51 }
 0x391   : > { %v5577_v22 = vpop.f32.mrb[46].mxu0 }
 0x392   : > { %5074 = vst [vmem:[%s7213_s16 + $0x278] sm:$0xff] %v5577_v22  ;;  %v3219_v4 = vpop.f32.mrb[47].mxu0  ;;  %v3394_v55 = vmul.f32 %v5577_v22, %v5577_v22 }
 0x393   : > { %5073 = vst [vmem:[%s7213_s16 + $0x270] sm:$0xff] %v3219_v4  ;;  %v3354_v37 = vadd.f32 %v3353_v0, %v3219_v4  ;;  %v3393_v42 = vmul.f32 %v3219_v4, %v3219_v4 }
 0x395   : > { %v3424_v14 = vadd.f32 %v3423_v32, %v3393_v42  ;;  %v3355_v40 = vadd.f32 %v5577_v22, %v3354_v37 }
 0x397   : > { %v3425_v25 = vadd.f32 %v3424_v14, %v3394_v55 }
 0x3a1   : > { %v5633_v50 = vpop.f32.mrb[46].mxu1 }
 0x3a2   : > { %5270 = vst [vmem:[%s7213_s16 + $0x378] sm:$0xff] %v5633_v50  ;;  %v4294_v53 = vpop.f32.mrb[47].mxu1  ;;  %v4469_v47 = vmul.f32 %v5633_v50, %v5633_v50 }
 0x3a3   : > { %5269 = vst [vmem:[%s7213_s16 + $0x370] sm:$0xff] %v4294_v53  ;;  %v4429_v6 = vadd.f32 %v4428_v38, %v4294_v53  ;;  %v4468_v61 = vmul.f32 %v4294_v53, %v4294_v53 }
 0x3a5   : > { %v4499_v11 = vadd.f32 %v4498_v59, %v4468_v61  ;;  %v4430_v5 = vadd.f32 %v5633_v50, %v4429_v6 }
 0x3a7   : > { %v4500_v13 = vadd.f32 %v4499_v11, %v4469_v47 }
 0x3a9   : > { %v5580_v56 = vpop.f32.mrb[48].mxu0 }
 0x3aa   : > { %5076 = vst [vmem:[%s7213_s16 + $0x288] sm:$0xff] %v5580_v56  ;;  %v3229_v3 = vpop.f32.mrb[49].mxu0  ;;  %v3396_v19 = vmul.f32 %v5580_v56, %v5580_v56 }
 0x3ab   : > { %5075 = vst [vmem:[%s7213_s16 + $0x280] sm:$0xff] %v3229_v3  ;;  %v3356_v49 = vadd.f32 %v3355_v40, %v3229_v3  ;;  %v3395_v15 = vmul.f32 %v3229_v3, %v3229_v3 }
 0x3ad   : > { %v3426_v26 = vadd.f32 %v3425_v25, %v3395_v15  ;;  %v3357_v20 = vadd.f32 %v5580_v56, %v3356_v49 }
 0x3af   : > { %v3427_v44 = vadd.f32 %v3426_v26, %v3396_v19 }
 0x3b9   : > { %v5636_v12 = vpop.f32.mrb[48].mxu1 }
 0x3ba   : > { %5272 = vst [vmem:[%s7213_s16 + $0x388] sm:$0xff] %v5636_v12  ;;  %v4304_v29 = vpop.f32.mrb[49].mxu1  ;;  %v4471_v8 = vmul.f32 %v5636_v12, %v5636_v12 }
 0x3bb   : > { %5271 = vst [vmem:[%s7213_s16 + $0x380] sm:$0xff] %v4304_v29  ;;  %v4431_v41 = vadd.f32 %v4430_v5, %v4304_v29  ;;  %v4470_v52 = vmul.f32 %v4304_v29, %v4304_v29 }
 0x3bd   : > { %v4501_v43 = vadd.f32 %v4500_v13, %v4470_v52  ;;  %v4432_v7 = vadd.f32 %v5636_v12, %v4431_v41 }
 0x3bf   : > { %v4502_v60 = vadd.f32 %v4501_v43, %v4471_v8 }
 0x3c1   : > { %v5583_v35 = vpop.f32.mrb[50].mxu0 }
 0x3c2   : > { %5078 = vst [vmem:[%s7213_s16 + $0x298] sm:$0xff] %v5583_v35  ;;  %v3239_v31 = vpop.f32.mrb[51].mxu0  ;;  %v3398_v21 = vmul.f32 %v5583_v35, %v5583_v35 }
 0x3c3   : > { %5077 = vst [vmem:[%s7213_s16 + $0x290] sm:$0xff] %v3239_v31  ;;  %v3358_v36 = vadd.f32 %v3357_v20, %v3239_v31  ;;  %v3397_v39 = vmul.f32 %v3239_v31, %v3239_v31 }
 0x3c5   : > { %v3428_v10 = vadd.f32 %v3427_v44, %v3397_v39  ;;  %v3359_v18 = vadd.f32 %v5583_v35, %v3358_v36 }
 0x3c7   : > { %v3429_v28 = vadd.f32 %v3428_v10, %v3398_v21 }
 0x3d1   : > { %v5639_v27 = vpop.f32.mrb[50].mxu1 }
 0x3d2   : > { %5274 = vst [vmem:[%s7213_s16 + $0x398] sm:$0xff] %v5639_v27  ;;  %v4314_v30 = vpop.f32.mrb[51].mxu1  ;;  %v4473_v32 = vmul.f32 %v5639_v27, %v5639_v27 }
 0x3d3   : > { %5273 = vst [vmem:[%s7213_s16 + $0x390] sm:$0xff] %v4314_v30  ;;  %v4433_v0 = vadd.f32 %v4432_v7, %v4314_v30  ;;  %v4472_v1 = vmul.f32 %v4314_v30, %v4314_v30 }
 0x3d5   : > { %v4503_v46 = vadd.f32 %v4502_v60, %v4472_v1  ;;  %v4434_v58 = vadd.f32 %v5639_v27, %v4433_v0 }
 0x3d7   : > { %v4504_v45 = vadd.f32 %v4503_v46, %v4473_v32 }
 0x3d9   : > { %v5586_v62 = vpop.f32.mrb[52].mxu0 }
 0x3da   : > { %5080 = vst [vmem:[%s7213_s16 + $0x2a8] sm:$0xff] %v5586_v62  ;;  %v3249_v16 = vpop.f32.mrb[53].mxu0  ;;  %v3400_v63 = vmul.f32 %v5586_v62, %v5586_v62 }
 0x3db   : > { %5079 = vst [vmem:[%s7213_s16 + $0x2a0] sm:$0xff] %v3249_v16  ;;  %v3360_v2 = vadd.f32 %v3359_v18, %v3249_v16  ;;  %v3399_v23 = vmul.f32 %v3249_v16, %v3249_v16 }
 0x3dd   : > { %v3430_v33 = vadd.f32 %v3429_v28, %v3399_v23  ;;  %v3361_v57 = vadd.f32 %v5586_v62, %v3360_v2 }
 0x3df   : > { %v3431_v48 = vadd.f32 %v3430_v33, %v3400_v63 }
 0x3e9   : > { %v5642_v34 = vpop.f32.mrb[52].mxu1 }
 0x3ea   : > { %5276 = vst [vmem:[%s7213_s16 + $0x3a8] sm:$0xff] %v5642_v34  ;;  %v4324_v17 = vpop.f32.mrb[53].mxu1  ;;  %v4475_v38 = vmul.f32 %v5642_v34, %v5642_v34 }
 0x3eb   : > { %5275 = vst [vmem:[%s7213_s16 + $0x3a0] sm:$0xff] %v4324_v17  ;;  %v4435_v51 = vadd.f32 %v4434_v58, %v4324_v17  ;;  %v4474_v54 = vmul.f32 %v4324_v17, %v4324_v17 }
 0x3ed   : > { %v4505_v59 = vadd.f32 %v4504_v45, %v4474_v54  ;;  %v4436_v22 = vadd.f32 %v5642_v34, %v4435_v51 }
 0x3ef   : > { %v4506_v4 = vadd.f32 %v4505_v59, %v4475_v38 }
 0x3f1   : > { %v5589_v37 = vpop.f32.mrb[54].mxu0 }
 0x3f2   : > { %5082 = vst [vmem:[%s7213_s16 + $0x2b8] sm:$0xff] %v5589_v37  ;;  %v3259_v42 = vpop.f32.mrb[55].mxu0  ;;  %v3402_v40 = vmul.f32 %v5589_v37, %v5589_v37 }
 0x3f3   : > { %5081 = vst [vmem:[%s7213_s16 + $0x2b0] sm:$0xff] %v3259_v42  ;;  %v3362_v55 = vadd.f32 %v3361_v57, %v3259_v42  ;;  %v3401_v14 = vmul.f32 %v3259_v42, %v3259_v42 }
 0x3f5   : > { %v3432_v25 = vadd.f32 %v3431_v48, %v3401_v14  ;;  %v3363_v50 = vadd.f32 %v5589_v37, %v3362_v55 }
 0x3f7   : > { %v3433_v53 = vadd.f32 %v3432_v25, %v3402_v40 }
 0x401   : > { %v5645_v6 = vpop.f32.mrb[54].mxu1 }
 0x402   : > { %5278 = vst [vmem:[%s7213_s16 + $0x3b8] sm:$0xff] %v5645_v6  ;;  %v4334_v61 = vpop.f32.mrb[55].mxu1  ;;  %v4477_v5 = vmul.f32 %v5645_v6, %v5645_v6 }
 0x403   : > { %5277 = vst [vmem:[%s7213_s16 + $0x3b0] sm:$0xff] %v4334_v61  ;;  %v4437_v47 = vadd.f32 %v4436_v22, %v4334_v61  ;;  %v4476_v11 = vmul.f32 %v4334_v61, %v4334_v61 }
 0x405   : > { %v4507_v13 = vadd.f32 %v4506_v4, %v4476_v11  ;;  %v4438_v56 = vadd.f32 %v5645_v6, %v4437_v47 }
 0x407   : > { %v4508_v3 = vadd.f32 %v4507_v13, %v4477_v5 }
 0x409   : > { %v5592_v49 = vpop.f32.mrb[56].mxu0 }
 0x40a   : > { %5084 = vst [vmem:[%s7213_s16 + $0x2c8] sm:$0xff] %v5592_v49  ;;  %v3269_v15 = vpop.f32.mrb[57].mxu0  ;;  %v3404_v20 = vmul.f32 %v5592_v49, %v5592_v49 }
 0x40b   : > { %5083 = vst [vmem:[%s7213_s16 + $0x2c0] sm:$0xff] %v3269_v15  ;;  %v3364_v19 = vadd.f32 %v3363_v50, %v3269_v15  ;;  %v3403_v26 = vmul.f32 %v3269_v15, %v3269_v15 }
 0x40d   : > { %v3434_v44 = vadd.f32 %v3433_v53, %v3403_v26  ;;  %v3365_v12 = vadd.f32 %v5592_v49, %v3364_v19 }
 0x40f   : > { %v3435_v29 = vadd.f32 %v3434_v44, %v3404_v20 }
 0x419   : > { %v5648_v41 = vpop.f32.mrb[56].mxu1 }
 0x41a   : > { %5280 = vst [vmem:[%s7213_s16 + $0x3c8] sm:$0xff] %v5648_v41  ;;  %v4344_v52 = vpop.f32.mrb[57].mxu1  ;;  %v4479_v7 = vmul.f32 %v5648_v41, %v5648_v41 }
 0x41b   : > { %5279 = vst [vmem:[%s7213_s16 + $0x3c0] sm:$0xff] %v4344_v52  ;;  %v4439_v8 = vadd.f32 %v4438_v56, %v4344_v52  ;;  %v4478_v43 = vmul.f32 %v4344_v52, %v4344_v52 }
 0x41d   : > { %v4509_v60 = vadd.f32 %v4508_v3, %v4478_v43  ;;  %v4440_v35 = vadd.f32 %v5648_v41, %v4439_v8 }
 0x41f   : > { %v4510_v31 = vadd.f32 %v4509_v60, %v4479_v7 }
 0x421   : > { %v5595_v36 = vpop.f32.mrb[58].mxu0 }
 0x422   : > { %5086 = vst [vmem:[%s7213_s16 + $0x2d8] sm:$0xff] %v5595_v36  ;;  %v3279_v39 = vpop.f32.mrb[59].mxu0  ;;  %v3406_v18 = vmul.f32 %v5595_v36, %v5595_v36 }
 0x423   : > { %5085 = vst [vmem:[%s7213_s16 + $0x2d0] sm:$0xff] %v3279_v39  ;;  %v3366_v21 = vadd.f32 %v3365_v12, %v3279_v39  ;;  %v3405_v10 = vmul.f32 %v3279_v39, %v3279_v39 }
 0x425   : > { %v3436_v28 = vadd.f32 %v3435_v29, %v3405_v10  ;;  %v3367_v27 = vadd.f32 %v5595_v36, %v3366_v21 }
 0x427   : > { %v3437_v30 = vadd.f32 %v3436_v28, %v3406_v18 }
 0x431   : > { %v5651_v0 = vpop.f32.mrb[58].mxu1 }
 0x432   : > { %5282 = vst [vmem:[%s7213_s16 + $0x3d8] sm:$0xff] %v5651_v0  ;;  %v4354_v1 = vpop.f32.mrb[59].mxu1  ;;  %v4481_v58 = vmul.f32 %v5651_v0, %v5651_v0 }
 0x433   : > { %5281 = vst [vmem:[%s7213_s16 + $0x3d0] sm:$0xff] %v4354_v1  ;;  %v4441_v32 = vadd.f32 %v4440_v35, %v4354_v1  ;;  %v4480_v46 = vmul.f32 %v4354_v1, %v4354_v1 }
 0x435   : > { %v4511_v45 = vadd.f32 %v4510_v31, %v4480_v46  ;;  %v4442_v62 = vadd.f32 %v5651_v0, %v4441_v32 }
 0x437   : > { %v4512_v16 = vadd.f32 %v4511_v45, %v4481_v58 }
 0x439   : > { %v5598_v2 = vpop.f32.mrb[60].mxu0 }
 0x43a   : > { %5088 = vst [vmem:[%s7213_s16 + $0x2e8] sm:$0xff] %v5598_v2  ;;  %v3289_v23 = vpop.f32.mrb[61].mxu0  ;;  %v3408_v57 = vmul.f32 %v5598_v2, %v5598_v2 }
 0x43b   : > { %5087 = vst [vmem:[%s7213_s16 + $0x2e0] sm:$0xff] %v3289_v23  ;;  %v3368_v63 = vadd.f32 %v3367_v27, %v3289_v23  ;;  %v3407_v33 = vmul.f32 %v3289_v23, %v3289_v23 }
 0x43d   : > { %v3438_v48 = vadd.f32 %v3437_v30, %v3407_v33  ;;  %v3369_v34 = vadd.f32 %v5598_v2, %v3368_v63 }
 0x43f   : > { %v3439_v17 = vadd.f32 %v3438_v48, %v3408_v57 }
 0x449   : > { %v5654_v51 = vpop.f32.mrb[60].mxu1 }
 0x44a   : > { %5284 = vst [vmem:[%s7213_s16 + $0x3e8] sm:$0xff] %v5654_v51  ;;  %v4364_v54 = vpop.f32.mrb[61].mxu1  ;;  %v4483_v22 = vmul.f32 %v5654_v51, %v5654_v51 }
 0x44b   : > { %5283 = vst [vmem:[%s7213_s16 + $0x3e0] sm:$0xff] %v4364_v54  ;;  %v4443_v38 = vadd.f32 %v4442_v62, %v4364_v54  ;;  %v4482_v59 = vmul.f32 %v4364_v54, %v4364_v54 }
 0x44d   : > { %v4513_v4 = vadd.f32 %v4512_v16, %v4482_v59  ;;  %v4444_v37 = vadd.f32 %v5654_v51, %v4443_v38 }
 0x44f   : > { %v4514_v42 = vadd.f32 %v4513_v4, %v4483_v22 }
 0x451   : > { %v5601_v55 = vpop.f32.mrb[62].mxu0 }
 0x452   : > { %5090 = vst [vmem:[%s7213_s16 + $0x2f8] sm:$0xff] %v5601_v55  ;;  %v3299_v14 = vpop.f32.mrb[63].mxu0  ;;  %v3410_v50 = vmul.f32 %v5601_v55, %v5601_v55 }
 0x453   : > { %5089 = vst [vmem:[%s7213_s16 + $0x2f0] sm:$0xff] %v3299_v14  ;;  %v3370_v40 = vadd.f32 %v3369_v34, %v3299_v14  ;;  %v3409_v25 = vmul.f32 %v3299_v14, %v3299_v14 }
 0x455   : > { %v3371_v53 = vadd.f32 %v5601_v55, %v3370_v40  ;;  %v3440_v6 = vadd.f32 %v3439_v17, %v3409_v25 }
 0x457   : > { %v3372_v61 = vrot.slane %v3371_v53, 4  ;;  %v3441_v47 = vadd.f32 %v3440_v6, %v3410_v50 }
 0x459   : > { %v3373_v11 = vadd.f32 %v3372_v61, %v3371_v53  ;;  %v3442_v5 = vrot.slane %v3441_v47, 4 }
 0x45a   : > { %v5657_v13 = vpop.f32.mrb[62].mxu1 }
 0x45b   : > { %v3374_v56 = vrot.slane %v3373_v11, 2  ;;  %v3443_v3 = vadd.f32 %v3442_v5, %v3441_v47  ;;  %5286 = vst [vmem:[%s7213_s16 + $0x3f8] sm:$0xff] %v5657_v13  ;;  %v4374_v49 = vpop.f32.mrb[63].mxu1  ;;  %v4485_v44 = vmul.f32 %v5657_v13, %v5657_v13 }
 0x45c   : > { %5285 = vst [vmem:[%s7213_s16 + $0x3f0] sm:$0xff] %v4374_v49  ;;  %v4445_v15 = vadd.f32 %v4444_v37, %v4374_v49  ;;  %v4484_v19 = vmul.f32 %v4374_v49, %v4374_v49 }
 0x45d   : > { %v3375_v26 = vadd.f32 %v3374_v56, %v3373_v11  ;;  %v3444_v20 = vrot.slane %v3443_v3, 2 }
 0x45e   : > { %v4446_v12 = vadd.f32 %v5657_v13, %v4445_v15  ;;  %v4515_v29 = vadd.f32 %v4514_v42, %v4484_v19 }
 0x45f   : > { %v3376_v41 = vrot.slane %v3375_v26, 1  ;;  %v3445_v52 = vadd.f32 %v3444_v20, %v3443_v3 }
 0x460   : > { %v4447_v8 = vrot.slane %v4446_v12, 4  ;;  %v4516_v43 = vadd.f32 %v4515_v29, %v4485_v44 }
 0x461   : > { %v3377_v7 = vadd.f32 %v3376_v41, %v3375_v26  ;;  %v3446_v60 = vrot.slane %v3445_v52, 1 }
 0x462   : > { %v4448_v35 = vadd.f32 %v4447_v8, %v4446_v12  ;;  %v4517_v31 = vrot.slane %v4516_v43, 4 }
 0x463   : > { %v3378_v36 = vadd.f32 %v3377_v7, %v8072_v9  ;;  %v3447_v39 = vadd.f32 %v3446_v60, %v3445_v52 }
 0x464   : > { %v4449_v21 = vrot.slane %v4448_v35, 2  ;;  %v4518_v10 = vadd.f32 %v4517_v31, %v4516_v43 }
 0x465   : > { %v3448_v18 = vadd.f32 %v3447_v39, %v8079_v24 }
 0x466   : > { %v4450_v28 = vadd.f32 %v4449_v21, %v4448_v35  ;;  %v4519_v27 = vrot.slane %v4518_v10, 2 }
 0x468   : > { %v4451_v30 = vrot.slane %v4450_v28, 1  ;;  %v4520_v0 = vadd.f32 %v4519_v27, %v4518_v10 }
 0x46a   : > { %v4452_v1 = vadd.f32 %v4451_v30, %v4450_v28  ;;  %v4521_v32 = vrot.slane %v4520_v0, 1 }
 0x46c   : > { %v4453_v46 = vadd.f32 %v4452_v1, %v3378_v36  ;;  %v4522_v58 = vadd.f32 %v4521_v32, %v4520_v0 }
 0x46e   : > { %v4523_v45 = vadd.f32 %v4522_v58, %v3448_v18  ;;  %4524 = vst [vmem:[%s212_s30] sm:$0x1] %v4453_v46 }
 0x470   : > { %4525 = vst [vmem:[%s212_s30 + $0x1] sm:$0x1] %v4523_v45 }
 0x471 PF: > { %s14_s14 = sadd.s32 1, %s5743_s14   ;;  %s8642_s12 = smov %s5739_s13 }
 0x472   : > { %p11_p5 = scmp.ge.s32.totalorder %s14_s14, 4   ;;  %s8643_s13 = smov %s8645_s15 }
 0x474   :  { %13 = sbr.rel (!%p11_p5) target bundleno = 2 (0x2), region = 79 }

</bundles_post_ra>
